<compile_context>
chip_gen: v5e
topology: v5e:2x2
jax: 0.10.0
libtpu: 0.0.40
codegen_flags: <defaults>
</compile_context>

<pallas_src>
import math

import jax
import jax.numpy as jnp
from jax.experimental import pallas as pl
from jax.experimental.pallas import tpu as pltpu


def _vmem_spec():
    return pl.BlockSpec(memory_space=pltpu.MemorySpace.VMEM)


# ----------------------------------------------------------------------------
# In-kernel helpers (operate on VMEM values; all shapes static)
# ----------------------------------------------------------------------------
def _sigmoid(x):
    # exp + divide lower cleanly (EUP); avoids relying on logistic_p lowering.
    return 1.0 / (1.0 + jnp.exp(-x))


def _tflip(x):
    """Reverse the leading (time) axis with static slices (no lax.rev)."""
    S = x.shape[0]
    if S <= 1:
        return x
    return jnp.concatenate([x[i:i + 1] for i in range(S - 1, -1, -1)], axis=0)


def _gate_inputs(x, wih, bih, H):
    """Hoisted input projection for one bi-GRU branch.

    x   : (S, B, E) time-major embeddings
    wih : (E, 6H) columns [fwd r z n | bwd r z n]  (input bias folded via bih)
    bih : (1, 6H) matching column layout
    returns (S, B, 6H) per-step gate inputs in the combined gate-major layout
    [r_f r_b | z_f z_b | n_f n_b]: forward gates at time t, backward gates at
    time S-1-t (one sequence-level flip, NO per-step slicing).
    """
    S, B, E = x.shape
    G = 3 * H
    gi = (jnp.dot(x.reshape(S * B, E), wih,
                  preferred_element_type=jnp.float32) + bih).reshape(S, B, 2 * G)
    gfwd = gi[..., :G]                       # (S, B, 3H)  [r_f z_f n_f]
    gbwd = _tflip(gi[..., G:])               # (S, B, 3H)  [r_b z_b n_b], time-flipped
    return jnp.concatenate(
        [gfwd[..., 0:H],       gbwd[..., 0:H],
         gfwd[..., H:2 * H],   gbwd[..., H:2 * H],
         gfwd[..., 2 * H:],    gbwd[..., 2 * H:]], axis=-1)   # (S, B, 6H)


def _gru_step(h, gx_t, gh, W):
    """One GRU step on a width-W state (PyTorch gate semantics).

    h: (B, W); gx_t, gh: (B, 3W) in gate-major layout [r | z | n].
    """
    r = _sigmoid(gx_t[:, :W] + gh[:, :W])
    z = _sigmoid(gx_t[:, W:2 * W] + gh[:, W:2 * W])
    n = jnp.tanh(gx_t[:, 2 * W:] + r * gh[:, 2 * W:])
    return (1.0 - z) * n + z * h


def _masked_mean(rnn_tm, mask_tm):
    """rnn_tm: (S, B, D); mask_tm: (S, B) float -> (B, D)."""
    m = mask_tm[:, :, None]
    s = jnp.sum(rnn_tm * m, axis=0)                              # (B, D)
    denom = jnp.maximum(jnp.sum(m, axis=0), 1e-9)                # (B, 1)
    return s * pl.reciprocal(denom, approx=True)


def _attend(hidden_tm, guide, w, b):
    """hidden_tm: (S, B, D); guide: (B, D); w: (D, D) pre-transposed; b: (1, D).

    Scores / weighted sum use VPU multiply + reduce (no q=1 MXU matmuls);
    softmax uses exact division for fidelity with the PyTorch reference.
    """
    S, B, D = hidden_tm.shape
    proj = jnp.tanh(
        jnp.dot(hidden_tm.reshape(S * B, D), w,
                preferred_element_type=jnp.float32).reshape(S, B, D) + b)
    scores = jnp.sum(proj * guide[None, :, :], axis=-1, keepdims=True)   # (S, B, 1)
    mx = jnp.max(scores, axis=0, keepdims=True)
    e = jnp.exp(scores - mx)
    wts = e / jnp.sum(e, axis=0, keepdims=True)                          # (S, B, 1)
    return jnp.sum(wts * hidden_tm, axis=0)                              # (B, D)


# ----------------------------------------------------------------------------
# Fused IAN forward kernel: merged bi-GRUs + pooling + 2x attention + FC
# ----------------------------------------------------------------------------
def ian_kernel(xc_ref, xa_ref, cmask_ref, amask_ref,
               c_wih_ref, c_bih_ref, c_whh_ref, c_bhh_ref,
               a_wih_ref, a_bih_ref, a_whh_ref, a_bhh_ref,
               m_whh_ref, m_bhh_ref,
               attc_w_ref, attc_b_ref, atta_w_ref, atta_b_ref,
               fc_w_ref, fc_b_ref,
               out_ref,
               ctx_hs, asp_hs):
    H = c_whh_ref.shape[0] // 2
    D = 2 * H
    Sc, B, _ = xc_ref.shape
    Sa = xa_ref.shape[0]
    Sm = min(Sc, Sa)

    # Hoisted input projections (one big MXU matmul per branch, bias folded in).
    gxc = _gate_inputs(xc_ref[...], c_wih_ref[...], c_bih_ref[...], H)   # (Sc,B,6H)
    gxa = _gate_inputs(xa_ref[...], a_wih_ref[...], a_bih_ref[...], H)   # (Sa,B,6H)

    # Merged gate inputs for the first Sm steps: [r: c a | z: c a | n: c a].
    gx4 = jnp.concatenate(
        [gxc[:Sm, :, 0:D],       gxa[:Sm, :, 0:D],
         gxc[:Sm, :, D:2 * D],   gxa[:Sm, :, D:2 * D],
         gxc[:Sm, :, 2 * D:],    gxa[:Sm, :, 2 * D:]], axis=-1)          # (Sm,B,12H)

    # --- merged recurrence: {ctx_fwd, ctx_bwd, asp_fwd, asp_bwd} in one state ---
    whh4 = m_whh_ref[...]                                   # (4H, 12H) block-diag
    bhh4 = jnp.broadcast_to(m_bhh_ref[...], (B, 6 * D))     # hoisted once
    h4 = jnp.zeros((B, 2 * D), jnp.float32)                 # [cf | cb | af | ab]
    for t in range(Sm):                                     # static unroll
        gh = jnp.dot(h4, whh4, preferred_element_type=jnp.float32) + bhh4
        h4 = _gru_step(h4, gx4[t], gh, 2 * D)
        ctx_hs[t] = h4[:, :D]
        asp_hs[t] = h4[:, D:]

    # --- tail: remaining steps of the longer branch on a (B, 2H) state ---
    if Sc > Sa:
        whh = c_whh_ref[...]
        bhh = jnp.broadcast_to(c_bhh_ref[...], (B, 3 * D))
        h = h4[:, :D]
        for t in range(Sm, Sc):
            gh = jnp.dot(h, whh, preferred_element_type=jnp.float32) + bhh
            h = _gru_step(h, gxc[t], gh, D)
            ctx_hs[t] = h
    elif Sa > Sc:
        whh = a_whh_ref[...]
        bhh = jnp.broadcast_to(a_bhh_ref[...], (B, 3 * D))
        h = h4[:, D:]
        for t in range(Sm, Sa):
            gh = jnp.dot(h, whh, preferred_element_type=jnp.float32) + bhh
            h = _gru_step(h, gxa[t], gh, D)
            asp_hs[t] = h

    # Recombine fwd/bwd halves: one time-flip of the backward half + one concat.
    ctx_all = ctx_hs[...]                                                 # (Sc,B,2H)
    asp_all = asp_hs[...]                                                 # (Sa,B,2H)
    ctx_rnn = jnp.concatenate([ctx_all[..., :H], _tflip(ctx_all[..., H:])], axis=-1)
    asp_rnn = jnp.concatenate([asp_all[..., :H], _tflip(asp_all[..., H:])], axis=-1)

    # Masked mean pooling (matches torch: sum*mask / clamp(sum(mask), 1e-9)).
    ctx_pool = _masked_mean(ctx_rnn, cmask_ref[...])                      # (B, 2H)
    asp_pool = _masked_mean(asp_rnn, amask_ref[...])                      # (B, 2H)

    # Interactive attention (unmasked, as in the reference model).
    ctx_final = _attend(ctx_rnn, asp_pool, attc_w_ref[...], attc_b_ref[...])
    asp_final = _attend(asp_rnn, ctx_pool, atta_w_ref[...], atta_b_ref[...])

    rep = jnp.concatenate([ctx_final, asp_final], axis=1)                 # (B, 4H)
    # nn.Dropout: identity in eval mode.
    out_ref[...] = (jnp.dot(rep, fc_w_ref[...],
                            preferred_element_type=jnp.float32) + fc_b_ref[...])


def ian_fused_forward(ctx_emb_tm, asp_emb_tm, cmask_tm, amask_tm, params):
    Sc, B, E = ctx_emb_tm.shape
    Sa = asp_emb_tm.shape[0]
    H = params['gru_ctx']['whh'].shape[0] // 2
    D = 2 * H
    L = params['fc']['w'].shape[1]

    gc, ga, gm = params['gru_ctx'], params['gru_asp'], params['gru_merged']
    ac, aa, fcp = params['attn_ctx'], params['attn_asp'], params['fc']

    args = (ctx_emb_tm, asp_emb_tm, cmask_tm, amask_tm,
            gc['wih'], gc['bih'], gc['whh'], gc['bhh'],
            ga['wih'], ga['bih'], ga['whh'], ga['bhh'],
            gm['whh'], gm['bhh'],
            ac['w'], ac['b'], aa['w'], aa['b'],
            fcp['w'], fcp['b'])

    Smin, Sdiff = min(Sc, Sa), abs(Sc - Sa)
    flops = (2 * B * (Sc + Sa) * E * 6 * H            # input projections
             + Smin * 2 * B * (2 * D) * (6 * D)       # merged recurrence
             + Sdiff * 2 * B * D * (3 * D)            # tail recurrence
             + 2 * B * (Sc + Sa) * D * D              # attention projections
             + 6 * B * (Sc + Sa) * D                  # scores + weighted sums
             + 2 * B * (2 * D) * L)                   # FC
    trans = (Sc + Sa) * B * (4 * D + 1)               # sigmoid/tanh/exp (rough)
    bytes_accessed = 4 * (B * (Sc + Sa) * (E + 1)
                          + 2 * (E * 6 * H + D * 6 * H + 12 * H)
                          + (2 * D) * (6 * D) + 6 * D
                          + 2 * (D * D + D) + (2 * D) * L + L + B * L)

    # TODO(synk): add batch-tiled grid + dimension_semantics + vmem_limit_bytes
    # when scaling beyond whole-array-in-VMEM shapes.
    return pl.pallas_call(
        ian_kernel,
        out_shape=jax.ShapeDtypeStruct((B, L), jnp.float32),
        in_specs=[_vmem_spec() for _ in args],
        out_specs=_vmem_spec(),
        scratch_shapes=[pltpu.VMEM((Sc, B, D), jnp.float32),
                        pltpu.VMEM((Sa, B, D), jnp.float32)],
        cost_estimate=pl.CostEstimate(flops=flops, transcendentals=trans,
                                      bytes_accessed=bytes_accessed),
    )(*args)


# ----------------------------------------------------------------------------
# Parameter init (PyTorch-style uniform bounds) + packing for the fused kernel
# ----------------------------------------------------------------------------
def _pack_bigru(raw, H):
    """Pack PyTorch-layout bi-GRU weights into the kernel's fused layouts."""
    # Input projection: columns [fwd r z n | bwd r z n].
    wih = jnp.concatenate([raw['w_ih_f'].T, raw['w_ih_b'].T], axis=1)     # (E, 6H)
    bih = jnp.concatenate([raw['b_ih_f'], raw['b_ih_b']]).reshape(1, 6 * H)

    # Recurrent: gate-major combined [r_f r_b | z_f z_b | n_f n_b], rows [h_f|h_b],
    # block-diagonal per gate over the two directions.
    wfT, wbT = raw['w_hh_f'].T, raw['w_hh_b'].T                           # (H, 3H)
    Z = jnp.zeros((H, H), jnp.float32)

    def bd(a, b):
        return jnp.concatenate([jnp.concatenate([a, Z], axis=1),
                                jnp.concatenate([Z, b], axis=1)], axis=0)

    whh = jnp.concatenate(
        [bd(wfT[:, g * H:(g + 1) * H], wbT[:, g * H:(g + 1) * H])
         for g in range(3)], axis=1)                                      # (2H, 6H)
    bf, bb = raw['b_hh_f'], raw['b_hh_b']
    bhh = jnp.concatenate(
        [jnp.concatenate([bf[g * H:(g + 1) * H], bb[g * H:(g + 1) * H]])
         for g in range(3)]).reshape(1, 6 * H)
    return {'wih': wih, 'bih': bih, 'whh': whh, 'bhh': bhh}


def _merge_branches(gc, ga, H):
    """Block-diagonal merge of ctx/asp recurrent weights onto a (B,4H) state."""
    D = 2 * H
    Z = jnp.zeros((D, D), jnp.float32)
    whh4 = jnp.concatenate(
        [jnp.concatenate(
            [jnp.concatenate([gc['whh'][:, g * D:(g + 1) * D], Z], axis=1),
             jnp.concatenate([Z, ga['whh'][:, g * D:(g + 1) * D]], axis=1)],
            axis=0)
         for g in range(3)], axis=1)                                      # (4H, 12H)
    bhh4 = jnp.concatenate(
        [jnp.concatenate([gc['bhh'][:, g * D:(g + 1) * D],
                          ga['bhh'][:, g * D:(g + 1) * D]], axis=1)
         for g in range(3)], axis=1)                                      # (1, 12H)
    return {'whh': whh4, 'bhh': bhh4}


def init_params(key, E, H, L, vocab):
    keys = iter(jax.random.split(key, 64))

    def u(shape, bound):
        return jax.random.uniform(next(keys), shape, jnp.float32, -bound, bound)

    def gru_raw():
        b = 1.0 / math.sqrt(H)
        return {
            'w_ih_f': u((3 * H, E), b), 'w_hh_f': u((3 * H, H), b),
            'b_ih_f': u((3 * H,), b),   'b_hh_f': u((3 * H,), b),
            'w_ih_b': u((3 * H, E), b), 'w_hh_b': u((3 * H, H), b),
            'b_ih_b': u((3 * H,), b),   'b_hh_b': u((3 * H,), b),
        }

    def attn_params():
        D = 2 * H
        b = 1.0 / math.sqrt(D)
        return {'w': u((D, D), b).T, 'b': u((1, D), b)}

    def fc_params():
        b = 1.0 / math.sqrt(4 * H)
        return {'w': u((L, 4 * H), b).T, 'b': u((1, L), b)}

    gc = _pack_bigru(gru_raw(), H)
    ga = _pack_bigru(gru_raw(), H)
    return {
        'emb': 0.02 * jax.random.normal(next(keys), (vocab, E), jnp.float32),
        'gru_ctx': gc,
        'gru_asp': ga,
        'gru_merged': _merge_branches(gc, ga, H),
        'attn_ctx': attn_params(),
        'attn_asp': attn_params(),
        'fc': fc_params(),
    }


# ----------------------------------------------------------------------------
# IAN_Model forward
# ----------------------------------------------------------------------------
@jax.jit
def ian_forward(params, ctx_ids, ctx_mask, asp_ids, asp_mask):
    # TODO(synk): external `bert_model` dependency — replaced by a deterministic
    # embedding lookup standing in for `bert(...).last_hidden_state`.
    ctx_emb = params['emb'][ctx_ids.T]      # (S_ctx, B, E) time-major
    asp_emb = params['emb'][asp_ids.T]      # (S_asp, B, E) time-major
    return ian_fused_forward(ctx_emb, asp_emb,
                             ctx_mask.T.astype(jnp.float32),
                             asp_mask.T.astype(jnp.float32), params)


if __name__ == "__main__":
    B, S_CTX, S_ASP = 2, 8, 4
    BERT_HIDDEN = 32       # stand-in for bert_model.config.hidden_size
    HIDDEN_DIM = 32
    NUM_LABELS = 3
    VOCAB = 100

    key = jax.random.PRNGKey(0)
    k_ctx, k_asp, k_param = jax.random.split(key, 3)
    context_input_ids = jax.random.randint(k_ctx, (B, S_CTX), 0, VOCAB, jnp.int32)
    aspect_input_ids = jax.random.randint(k_asp, (B, S_ASP), 0, VOCAB, jnp.int32)
    context_attention_mask = jnp.array(
        [[1, 1, 1, 1, 1, 1, 1, 1],
         [1, 1, 1, 1, 1, 1, 0, 0]], dtype=jnp.int32)
    aspect_attention_mask = jnp.array(
        [[1, 1, 1, 1],
         [1, 1, 0, 0]], dtype=jnp.int32)

    params = init_params(k_param, BERT_HIDDEN, HIDDEN_DIM, NUM_LABELS, VOCAB)

    logits = ian_forward(params, context_input_ids, context_attention_mask,
                         aspect_input_ids, aspect_attention_mask)
    jax.block_until_ready(logits)
    assert logits.shape == (B, NUM_LABELS)
    print("KERNEL_OK")
</pallas_src>

<mosaic_0001>
module attributes {stable_mosaic.version = 11 : i64} {
  func.func @ian_kernel(%arg0: memref<8x2x32xf32, #tpu.memory_space<vmem>>, %arg1: memref<4x2x32xf32, #tpu.memory_space<vmem>>, %arg2: memref<8x2xf32, #tpu.memory_space<vmem>>, %arg3: memref<4x2xf32, #tpu.memory_space<vmem>>, %arg4: memref<32x192xf32, #tpu.memory_space<vmem>>, %arg5: memref<1x192xf32, #tpu.memory_space<vmem>>, %arg6: memref<64x192xf32, #tpu.memory_space<vmem>>, %arg7: memref<1x192xf32, #tpu.memory_space<vmem>>, %arg8: memref<32x192xf32, #tpu.memory_space<vmem>>, %arg9: memref<1x192xf32, #tpu.memory_space<vmem>>, %arg10: memref<64x192xf32, #tpu.memory_space<vmem>>, %arg11: memref<1x192xf32, #tpu.memory_space<vmem>>, %arg12: memref<128x384xf32, #tpu.memory_space<vmem>>, %arg13: memref<1x384xf32, #tpu.memory_space<vmem>>, %arg14: memref<64x64xf32, #tpu.memory_space<vmem>>, %arg15: memref<1x64xf32, #tpu.memory_space<vmem>>, %arg16: memref<64x64xf32, #tpu.memory_space<vmem>>, %arg17: memref<1x64xf32, #tpu.memory_space<vmem>>, %arg18: memref<128x3xf32, #tpu.memory_space<vmem>>, %arg19: memref<1x3xf32, #tpu.memory_space<vmem>>, %arg20: memref<2x3xf32, #tpu.memory_space<vmem>>, %arg21: memref<8x2x64xf32, #tpu.memory_space<vmem>>, %arg22: memref<4x2x64xf32, #tpu.memory_space<vmem>>) attributes {dimension_semantics = [], scalar_prefetch = 0 : i64, scratch_operands = 2 : i64, tpu.core_type = #tpu.core_type<tc>} {
    %c0 = arith.constant 0 : index
    %c0_0 = arith.constant 0 : index
    %c0_1 = arith.constant 0 : index
    %0 = vector.load %arg0[%c0, %c0_0, %c0_1] : memref<8x2x32xf32, #tpu.memory_space<vmem>>, vector<8x2x32xf32>
    %c0_2 = arith.constant 0 : index
    %c0_3 = arith.constant 0 : index
    %1 = vector.load %arg4[%c0_2, %c0_3] : memref<32x192xf32, #tpu.memory_space<vmem>>, vector<32x192xf32>
    %c0_4 = arith.constant 0 : index
    %c0_5 = arith.constant 0 : index
    %2 = vector.load %arg5[%c0_4, %c0_5] : memref<1x192xf32, #tpu.memory_space<vmem>>, vector<1x192xf32>
    %3 = vector.shape_cast %0 : vector<8x2x32xf32> to vector<16x32xf32>
    %cst = arith.constant dense<0.000000e+00> : vector<16x192xf32>
    %4 = tpu.matmul %3, %1, %cst {dimension_numbers = #tpu.dot_dimension_numbers<[1], [0], [0], [1], [0, 0, 1, 1], [], []>} : vector<16x32xf32>, vector<32x192xf32>, vector<16x192xf32> -> vector<16x192xf32>
    %5 = vector.broadcast %2 : vector<1x192xf32> to vector<16x192xf32>
    %6 = arith.addf %4, %5 : vector<16x192xf32>
    %7 = vector.shape_cast %6 : vector<16x192xf32> to vector<8x2x192xf32>
    %8 = vector.extract_strided_slice %7 {offsets = [0, 0, 0], sizes = [8, 2, 96], strides = [1, 1, 1]} : vector<8x2x192xf32> to vector<8x2x96xf32>
    %9 = vector.extract_strided_slice %7 {offsets = [0, 0, 96], sizes = [8, 2, 96], strides = [1, 1, 1]} : vector<8x2x192xf32> to vector<8x2x96xf32>
    %10 = vector.extract_strided_slice %9 {offsets = [7, 0, 0], sizes = [1, 2, 96], strides = [1, 1, 1]} : vector<8x2x96xf32> to vector<1x2x96xf32>
    %11 = vector.extract_strided_slice %9 {offsets = [6, 0, 0], sizes = [1, 2, 96], strides = [1, 1, 1]} : vector<8x2x96xf32> to vector<1x2x96xf32>
    %12 = vector.extract_strided_slice %9 {offsets = [5, 0, 0], sizes = [1, 2, 96], strides = [1, 1, 1]} : vector<8x2x96xf32> to vector<1x2x96xf32>
    %13 = vector.extract_strided_slice %9 {offsets = [4, 0, 0], sizes = [1, 2, 96], strides = [1, 1, 1]} : vector<8x2x96xf32> to vector<1x2x96xf32>
    %14 = vector.extract_strided_slice %9 {offsets = [3, 0, 0], sizes = [1, 2, 96], strides = [1, 1, 1]} : vector<8x2x96xf32> to vector<1x2x96xf32>
    %15 = vector.extract_strided_slice %9 {offsets = [2, 0, 0], sizes = [1, 2, 96], strides = [1, 1, 1]} : vector<8x2x96xf32> to vector<1x2x96xf32>
    %16 = vector.extract_strided_slice %9 {offsets = [1, 0, 0], sizes = [1, 2, 96], strides = [1, 1, 1]} : vector<8x2x96xf32> to vector<1x2x96xf32>
    %17 = vector.extract_strided_slice %9 {offsets = [0, 0, 0], sizes = [1, 2, 96], strides = [1, 1, 1]} : vector<8x2x96xf32> to vector<1x2x96xf32>
    %18 = tpu.concatenate %10, %11, %12, %13, %14, %15, %16, %17 in 0 : vector<1x2x96xf32>, vector<1x2x96xf32>, vector<1x2x96xf32>, vector<1x2x96xf32>, vector<1x2x96xf32>, vector<1x2x96xf32>, vector<1x2x96xf32>, vector<1x2x96xf32> -> vector<8x2x96xf32>
    %19 = vector.extract_strided_slice %8 {offsets = [0, 0, 0], sizes = [8, 2, 32], strides = [1, 1, 1]} : vector<8x2x96xf32> to vector<8x2x32xf32>
    %20 = vector.extract_strided_slice %18 {offsets = [0, 0, 0], sizes = [8, 2, 32], strides = [1, 1, 1]} : vector<8x2x96xf32> to vector<8x2x32xf32>
    %21 = vector.extract_strided_slice %8 {offsets = [0, 0, 32], sizes = [8, 2, 32], strides = [1, 1, 1]} : vector<8x2x96xf32> to vector<8x2x32xf32>
    %22 = vector.extract_strided_slice %18 {offsets = [0, 0, 32], sizes = [8, 2, 32], strides = [1, 1, 1]} : vector<8x2x96xf32> to vector<8x2x32xf32>
    %23 = vector.extract_strided_slice %8 {offsets = [0, 0, 64], sizes = [8, 2, 32], strides = [1, 1, 1]} : vector<8x2x96xf32> to vector<8x2x32xf32>
    %24 = vector.extract_strided_slice %18 {offsets = [0, 0, 64], sizes = [8, 2, 32], strides = [1, 1, 1]} : vector<8x2x96xf32> to vector<8x2x32xf32>
    %25 = tpu.concatenate %19, %20, %21, %22, %23, %24 in 2 : vector<8x2x32xf32>, vector<8x2x32xf32>, vector<8x2x32xf32>, vector<8x2x32xf32>, vector<8x2x32xf32>, vector<8x2x32xf32> -> vector<8x2x192xf32>
    %c0_6 = arith.constant 0 : index
    %c0_7 = arith.constant 0 : index
    %c0_8 = arith.constant 0 : index
    %26 = vector.load %arg1[%c0_6, %c0_7, %c0_8] : memref<4x2x32xf32, #tpu.memory_space<vmem>>, vector<4x2x32xf32>
    %c0_9 = arith.constant 0 : index
    %c0_10 = arith.constant 0 : index
    %27 = vector.load %arg8[%c0_9, %c0_10] : memref<32x192xf32, #tpu.memory_space<vmem>>, vector<32x192xf32>
    %c0_11 = arith.constant 0 : index
    %c0_12 = arith.constant 0 : index
    %28 = vector.load %arg9[%c0_11, %c0_12] : memref<1x192xf32, #tpu.memory_space<vmem>>, vector<1x192xf32>
    %29 = vector.shape_cast %26 : vector<4x2x32xf32> to vector<8x32xf32>
    %cst_13 = arith.constant dense<0.000000e+00> : vector<8x192xf32>
    %30 = tpu.matmul %29, %27, %cst_13 {dimension_numbers = #tpu.dot_dimension_numbers<[1], [0], [0], [1], [0, 0, 1, 1], [], []>} : vector<8x32xf32>, vector<32x192xf32>, vector<8x192xf32> -> vector<8x192xf32>
    %31 = vector.broadcast %28 : vector<1x192xf32> to vector<8x192xf32>
    %32 = arith.addf %30, %31 : vector<8x192xf32>
    %33 = vector.shape_cast %32 : vector<8x192xf32> to vector<4x2x192xf32>
    %34 = vector.extract_strided_slice %33 {offsets = [0, 0, 0], sizes = [4, 2, 96], strides = [1, 1, 1]} : vector<4x2x192xf32> to vector<4x2x96xf32>
    %35 = vector.extract_strided_slice %33 {offsets = [0, 0, 96], sizes = [4, 2, 96], strides = [1, 1, 1]} : vector<4x2x192xf32> to vector<4x2x96xf32>
    %36 = vector.extract_strided_slice %35 {offsets = [3, 0, 0], sizes = [1, 2, 96], strides = [1, 1, 1]} : vector<4x2x96xf32> to vector<1x2x96xf32>
    %37 = vector.extract_strided_slice %35 {offsets = [2, 0, 0], sizes = [1, 2, 96], strides = [1, 1, 1]} : vector<4x2x96xf32> to vector<1x2x96xf32>
    %38 = vector.extract_strided_slice %35 {offsets = [1, 0, 0], sizes = [1, 2, 96], strides = [1, 1, 1]} : vector<4x2x96xf32> to vector<1x2x96xf32>
    %39 = vector.extract_strided_slice %35 {offsets = [0, 0, 0], sizes = [1, 2, 96], strides = [1, 1, 1]} : vector<4x2x96xf32> to vector<1x2x96xf32>
    %40 = tpu.concatenate %36, %37, %38, %39 in 0 : vector<1x2x96xf32>, vector<1x2x96xf32>, vector<1x2x96xf32>, vector<1x2x96xf32> -> vector<4x2x96xf32>
    %41 = vector.extract_strided_slice %34 {offsets = [0, 0, 0], sizes = [4, 2, 32], strides = [1, 1, 1]} : vector<4x2x96xf32> to vector<4x2x32xf32>
    %42 = vector.extract_strided_slice %40 {offsets = [0, 0, 0], sizes = [4, 2, 32], strides = [1, 1, 1]} : vector<4x2x96xf32> to vector<4x2x32xf32>
    %43 = vector.extract_strided_slice %34 {offsets = [0, 0, 32], sizes = [4, 2, 32], strides = [1, 1, 1]} : vector<4x2x96xf32> to vector<4x2x32xf32>
    %44 = vector.extract_strided_slice %40 {offsets = [0, 0, 32], sizes = [4, 2, 32], strides = [1, 1, 1]} : vector<4x2x96xf32> to vector<4x2x32xf32>
    %45 = vector.extract_strided_slice %34 {offsets = [0, 0, 64], sizes = [4, 2, 32], strides = [1, 1, 1]} : vector<4x2x96xf32> to vector<4x2x32xf32>
    %46 = vector.extract_strided_slice %40 {offsets = [0, 0, 64], sizes = [4, 2, 32], strides = [1, 1, 1]} : vector<4x2x96xf32> to vector<4x2x32xf32>
    %47 = tpu.concatenate %41, %42, %43, %44, %45, %46 in 2 : vector<4x2x32xf32>, vector<4x2x32xf32>, vector<4x2x32xf32>, vector<4x2x32xf32>, vector<4x2x32xf32>, vector<4x2x32xf32> -> vector<4x2x192xf32>
    %48 = vector.extract_strided_slice %25 {offsets = [0, 0, 0], sizes = [4, 2, 64], strides = [1, 1, 1]} : vector<8x2x192xf32> to vector<4x2x64xf32>
    %49 = vector.extract_strided_slice %47 {offsets = [0, 0, 0], sizes = [4, 2, 64], strides = [1, 1, 1]} : vector<4x2x192xf32> to vector<4x2x64xf32>
    %50 = vector.extract_strided_slice %25 {offsets = [0, 0, 64], sizes = [4, 2, 64], strides = [1, 1, 1]} : vector<8x2x192xf32> to vector<4x2x64xf32>
    %51 = vector.extract_strided_slice %47 {offsets = [0, 0, 64], sizes = [4, 2, 64], strides = [1, 1, 1]} : vector<4x2x192xf32> to vector<4x2x64xf32>
    %52 = vector.extract_strided_slice %25 {offsets = [0, 0, 128], sizes = [4, 2, 64], strides = [1, 1, 1]} : vector<8x2x192xf32> to vector<4x2x64xf32>
    %53 = vector.extract_strided_slice %47 {offsets = [0, 0, 128], sizes = [4, 2, 64], strides = [1, 1, 1]} : vector<4x2x192xf32> to vector<4x2x64xf32>
    %54 = tpu.concatenate %48, %49, %50, %51, %52, %53 in 2 : vector<4x2x64xf32>, vector<4x2x64xf32>, vector<4x2x64xf32>, vector<4x2x64xf32>, vector<4x2x64xf32>, vector<4x2x64xf32> -> vector<4x2x384xf32>
    %c0_14 = arith.constant 0 : index
    %c0_15 = arith.constant 0 : index
    %55 = vector.load %arg12[%c0_14, %c0_15] : memref<128x384xf32, #tpu.memory_space<vmem>>, vector<128x384xf32>
    %c0_16 = arith.constant 0 : index
    %c0_17 = arith.constant 0 : index
    %56 = vector.load %arg13[%c0_16, %c0_17] : memref<1x384xf32, #tpu.memory_space<vmem>>, vector<1x384xf32>
    %57 = vector.shape_cast %56 : vector<1x384xf32> to vector<1x384xf32>
    %58 = vector.broadcast %57 : vector<1x384xf32> to vector<2x384xf32>
    %cst_18 = arith.constant 0.000000e+00 : f32
    %59 = vector.broadcast %cst_18 : f32 to vector<2x128xf32>
    %cst_19 = arith.constant dense<0.000000e+00> : vector<2x384xf32>
    %60 = tpu.matmul %59, %55, %cst_19 {dimension_numbers = #tpu.dot_dimension_numbers<[1], [0], [0], [1], [0, 0, 1, 1], [], []>} : vector<2x128xf32>, vector<128x384xf32>, vector<2x384xf32> -> vector<2x384xf32>
    %61 = arith.addf %60, %58 : vector<2x384xf32>
    %62 = vector.extract_strided_slice %54 {offsets = [0, 0, 0], sizes = [1, 2, 384], strides = [1, 1, 1]} : vector<4x2x384xf32> to vector<1x2x384xf32>
    %63 = vector.shape_cast %62 : vector<1x2x384xf32> to vector<2x384xf32>
    %64 = vector.extract_strided_slice %63 {offsets = [0, 0], sizes = [2, 128], strides = [1, 1]} : vector<2x384xf32> to vector<2x128xf32>
    %65 = vector.extract_strided_slice %61 {offsets = [0, 0], sizes = [2, 128], strides = [1, 1]} : vector<2x384xf32> to vector<2x128xf32>
    %66 = arith.addf %64, %65 : vector<2x128xf32>
    %cst_20 = arith.constant 0.000000e+00 : f32
    %67 = vector.broadcast %cst_20 : f32 to vector<2x128xf32>
    %68 = arith.subf %67, %66 : vector<2x128xf32>
    %69 = math.exp %68 : vector<2x128xf32>
    %cst_21 = arith.constant 1.000000e+00 : f32
    %70 = vector.broadcast %cst_21 : f32 to vector<2x128xf32>
    %71 = arith.addf %70, %69 : vector<2x128xf32>
    %cst_22 = arith.constant 1.000000e+00 : f32
    %72 = vector.broadcast %cst_22 : f32 to vector<2x128xf32>
    %73 = arith.divf %72, %71 : vector<2x128xf32>
    %74 = vector.extract_strided_slice %63 {offsets = [0, 128], sizes = [2, 128], strides = [1, 1]} : vector<2x384xf32> to vector<2x128xf32>
    %75 = vector.extract_strided_slice %61 {offsets = [0, 128], sizes = [2, 128], strides = [1, 1]} : vector<2x384xf32> to vector<2x128xf32>
    %76 = arith.addf %74, %75 : vector<2x128xf32>
    %cst_23 = arith.constant 0.000000e+00 : f32
    %77 = vector.broadcast %cst_23 : f32 to vector<2x128xf32>
    %78 = arith.subf %77, %76 : vector<2x128xf32>
    %79 = math.exp %78 : vector<2x128xf32>
    %cst_24 = arith.constant 1.000000e+00 : f32
    %80 = vector.broadcast %cst_24 : f32 to vector<2x128xf32>
    %81 = arith.addf %80, %79 : vector<2x128xf32>
    %cst_25 = arith.constant 1.000000e+00 : f32
    %82 = vector.broadcast %cst_25 : f32 to vector<2x128xf32>
    %83 = arith.divf %82, %81 : vector<2x128xf32>
    %84 = vector.extract_strided_slice %63 {offsets = [0, 256], sizes = [2, 128], strides = [1, 1]} : vector<2x384xf32> to vector<2x128xf32>
    %85 = vector.extract_strided_slice %61 {offsets = [0, 256], sizes = [2, 128], strides = [1, 1]} : vector<2x384xf32> to vector<2x128xf32>
    %86 = arith.mulf %73, %85 : vector<2x128xf32>
    %87 = arith.addf %84, %86 : vector<2x128xf32>
    %88 = math.tanh %87 : vector<2x128xf32>
    %cst_26 = arith.constant 1.000000e+00 : f32
    %89 = vector.broadcast %cst_26 : f32 to vector<2x128xf32>
    %90 = arith.subf %89, %83 : vector<2x128xf32>
    %91 = arith.mulf %90, %88 : vector<2x128xf32>
    %92 = arith.mulf %83, %59 : vector<2x128xf32>
    %93 = arith.addf %91, %92 : vector<2x128xf32>
    %94 = vector.extract_strided_slice %93 {offsets = [0, 0], sizes = [2, 64], strides = [1, 1]} : vector<2x128xf32> to vector<2x64xf32>
    %c0_27 = arith.constant 0 : index
    %c0_28 = arith.constant 0 : index
    %c0_29 = arith.constant 0 : index
    %95 = vector.load %arg21[%c0_27, %c0_28, %c0_29] : memref<8x2x64xf32, #tpu.memory_space<vmem>>, vector<1x2x64xf32>
    %96 = vector.shape_cast %95 : vector<1x2x64xf32> to vector<2x64xf32>
    %97 = vector.shape_cast %94 : vector<2x64xf32> to vector<1x2x64xf32>
    tpu.vector_store %arg21[%c0_27, %c0_28, %c0_29], %97 {strides = array<i32>} : memref<8x2x64xf32, #tpu.memory_space<vmem>>, vector<1x2x64xf32>,
    %98 = vector.extract_strided_slice %93 {offsets = [0, 64], sizes = [2, 64], strides = [1, 1]} : vector<2x128xf32> to vector<2x64xf32>
    %c0_30 = arith.constant 0 : index
    %c0_31 = arith.constant 0 : index
    %c0_32 = arith.constant 0 : index
    %99 = vector.load %arg22[%c0_30, %c0_31, %c0_32] : memref<4x2x64xf32, #tpu.memory_space<vmem>>, vector<1x2x64xf32>
    %100 = vector.shape_cast %99 : vector<1x2x64xf32> to vector<2x64xf32>
    %101 = vector.shape_cast %98 : vector<2x64xf32> to vector<1x2x64xf32>
    tpu.vector_store %arg22[%c0_30, %c0_31, %c0_32], %101 {strides = array<i32>} : memref<4x2x64xf32, #tpu.memory_space<vmem>>, vector<1x2x64xf32>,
    %cst_33 = arith.constant dense<0.000000e+00> : vector<2x384xf32>
    %102 = tpu.matmul %93, %55, %cst_33 {dimension_numbers = #tpu.dot_dimension_numbers<[1], [0], [0], [1], [0, 0, 1, 1], [], []>} : vector<2x128xf32>, vector<128x384xf32>, vector<2x384xf32> -> vector<2x384xf32>
    %103 = arith.addf %102, %58 : vector<2x384xf32>
    %104 = vector.extract_strided_slice %54 {offsets = [1, 0, 0], sizes = [1, 2, 384], strides = [1, 1, 1]} : vector<4x2x384xf32> to vector<1x2x384xf32>
    %105 = vector.shape_cast %104 : vector<1x2x384xf32> to vector<2x384xf32>
    %106 = vector.extract_strided_slice %105 {offsets = [0, 0], sizes = [2, 128], strides = [1, 1]} : vector<2x384xf32> to vector<2x128xf32>
    %107 = vector.extract_strided_slice %103 {offsets = [0, 0], sizes = [2, 128], strides = [1, 1]} : vector<2x384xf32> to vector<2x128xf32>
    %108 = arith.addf %106, %107 : vector<2x128xf32>
    %cst_34 = arith.constant 0.000000e+00 : f32
    %109 = vector.broadcast %cst_34 : f32 to vector<2x128xf32>
    %110 = arith.subf %109, %108 : vector<2x128xf32>
    %111 = math.exp %110 : vector<2x128xf32>
    %cst_35 = arith.constant 1.000000e+00 : f32
    %112 = vector.broadcast %cst_35 : f32 to vector<2x128xf32>
    %113 = arith.addf %112, %111 : vector<2x128xf32>
    %cst_36 = arith.constant 1.000000e+00 : f32
    %114 = vector.broadcast %cst_36 : f32 to vector<2x128xf32>
    %115 = arith.divf %114, %113 : vector<2x128xf32>
    %116 = vector.extract_strided_slice %105 {offsets = [0, 128], sizes = [2, 128], strides = [1, 1]} : vector<2x384xf32> to vector<2x128xf32>
    %117 = vector.extract_strided_slice %103 {offsets = [0, 128], sizes = [2, 128], strides = [1, 1]} : vector<2x384xf32> to vector<2x128xf32>
    %118 = arith.addf %116, %117 : vector<2x128xf32>
    %cst_37 = arith.constant 0.000000e+00 : f32
    %119 = vector.broadcast %cst_37 : f32 to vector<2x128xf32>
    %120 = arith.subf %119, %118 : vector<2x128xf32>
    %121 = math.exp %120 : vector<2x128xf32>
    %cst_38 = arith.constant 1.000000e+00 : f32
    %122 = vector.broadcast %cst_38 : f32 to vector<2x128xf32>
    %123 = arith.addf %122, %121 : vector<2x128xf32>
    %cst_39 = arith.constant 1.000000e+00 : f32
    %124 = vector.broadcast %cst_39 : f32 to vector<2x128xf32>
    %125 = arith.divf %124, %123 : vector<2x128xf32>
    %126 = vector.extract_strided_slice %105 {offsets = [0, 256], sizes = [2, 128], strides = [1, 1]} : vector<2x384xf32> to vector<2x128xf32>
    %127 = vector.extract_strided_slice %103 {offsets = [0, 256], sizes = [2, 128], strides = [1, 1]} : vector<2x384xf32> to vector<2x128xf32>
    %128 = arith.mulf %115, %127 : vector<2x128xf32>
    %129 = arith.addf %126, %128 : vector<2x128xf32>
    %130 = math.tanh %129 : vector<2x128xf32>
    %cst_40 = arith.constant 1.000000e+00 : f32
    %131 = vector.broadcast %cst_40 : f32 to vector<2x128xf32>
    %132 = arith.subf %131, %125 : vector<2x128xf32>
    %133 = arith.mulf %132, %130 : vector<2x128xf32>
    %134 = arith.mulf %125, %93 : vector<2x128xf32>
    %135 = arith.addf %133, %134 : vector<2x128xf32>
    %136 = vector.extract_strided_slice %135 {offsets = [0, 0], sizes = [2, 64], strides = [1, 1]} : vector<2x128xf32> to vector<2x64xf32>
    %c1 = arith.constant 1 : index
    %c0_41 = arith.constant 0 : index
    %c0_42 = arith.constant 0 : index
    %137 = vector.load %arg21[%c1, %c0_41, %c0_42] : memref<8x2x64xf32, #tpu.memory_space<vmem>>, vector<1x2x64xf32>
    %138 = vector.shape_cast %137 : vector<1x2x64xf32> to vector<2x64xf32>
    %139 = vector.shape_cast %136 : vector<2x64xf32> to vector<1x2x64xf32>
    tpu.vector_store %arg21[%c1, %c0_41, %c0_42], %139 {strides = array<i32>} : memref<8x2x64xf32, #tpu.memory_space<vmem>>, vector<1x2x64xf32>,
    %140 = vector.extract_strided_slice %135 {offsets = [0, 64], sizes = [2, 64], strides = [1, 1]} : vector<2x128xf32> to vector<2x64xf32>
    %c1_43 = arith.constant 1 : index
    %c0_44 = arith.constant 0 : index
    %c0_45 = arith.constant 0 : index
    %141 = vector.load %arg22[%c1_43, %c0_44, %c0_45] : memref<4x2x64xf32, #tpu.memory_space<vmem>>, vector<1x2x64xf32>
    %142 = vector.shape_cast %141 : vector<1x2x64xf32> to vector<2x64xf32>
    %143 = vector.shape_cast %140 : vector<2x64xf32> to vector<1x2x64xf32>
    tpu.vector_store %arg22[%c1_43, %c0_44, %c0_45], %143 {strides = array<i32>} : memref<4x2x64xf32, #tpu.memory_space<vmem>>, vector<1x2x64xf32>,
    %cst_46 = arith.constant dense<0.000000e+00> : vector<2x384xf32>
    %144 = tpu.matmul %135, %55, %cst_46 {dimension_numbers = #tpu.dot_dimension_numbers<[1], [0], [0], [1], [0, 0, 1, 1], [], []>} : vector<2x128xf32>, vector<128x384xf32>, vector<2x384xf32> -> vector<2x384xf32>
    %145 = arith.addf %144, %58 : vector<2x384xf32>
    %146 = vector.extract_strided_slice %54 {offsets = [2, 0, 0], sizes = [1, 2, 384], strides = [1, 1, 1]} : vector<4x2x384xf32> to vector<1x2x384xf32>
    %147 = vector.shape_cast %146 : vector<1x2x384xf32> to vector<2x384xf32>
    %148 = vector.extract_strided_slice %147 {offsets = [0, 0], sizes = [2, 128], strides = [1, 1]} : vector<2x384xf32> to vector<2x128xf32>
    %149 = vector.extract_strided_slice %145 {offsets = [0, 0], sizes = [2, 128], strides = [1, 1]} : vector<2x384xf32> to vector<2x128xf32>
    %150 = arith.addf %148, %149 : vector<2x128xf32>
    %cst_47 = arith.constant 0.000000e+00 : f32
    %151 = vector.broadcast %cst_47 : f32 to vector<2x128xf32>
    %152 = arith.subf %151, %150 : vector<2x128xf32>
    %153 = math.exp %152 : vector<2x128xf32>
    %cst_48 = arith.constant 1.000000e+00 : f32
    %154 = vector.broadcast %cst_48 : f32 to vector<2x128xf32>
    %155 = arith.addf %154, %153 : vector<2x128xf32>
    %cst_49 = arith.constant 1.000000e+00 : f32
    %156 = vector.broadcast %cst_49 : f32 to vector<2x128xf32>
    %157 = arith.divf %156, %155 : vector<2x128xf32>
    %158 = vector.extract_strided_slice %147 {offsets = [0, 128], sizes = [2, 128], strides = [1, 1]} : vector<2x384xf32> to vector<2x128xf32>
    %159 = vector.extract_strided_slice %145 {offsets = [0, 128], sizes = [2, 128], strides = [1, 1]} : vector<2x384xf32> to vector<2x128xf32>
    %160 = arith.addf %158, %159 : vector<2x128xf32>
    %cst_50 = arith.constant 0.000000e+00 : f32
    %161 = vector.broadcast %cst_50 : f32 to vector<2x128xf32>
    %162 = arith.subf %161, %160 : vector<2x128xf32>
    %163 = math.exp %162 : vector<2x128xf32>
    %cst_51 = arith.constant 1.000000e+00 : f32
    %164 = vector.broadcast %cst_51 : f32 to vector<2x128xf32>
    %165 = arith.addf %164, %163 : vector<2x128xf32>
    %cst_52 = arith.constant 1.000000e+00 : f32
    %166 = vector.broadcast %cst_52 : f32 to vector<2x128xf32>
    %167 = arith.divf %166, %165 : vector<2x128xf32>
    %168 = vector.extract_strided_slice %147 {offsets = [0, 256], sizes = [2, 128], strides = [1, 1]} : vector<2x384xf32> to vector<2x128xf32>
    %169 = vector.extract_strided_slice %145 {offsets = [0, 256], sizes = [2, 128], strides = [1, 1]} : vector<2x384xf32> to vector<2x128xf32>
    %170 = arith.mulf %157, %169 : vector<2x128xf32>
    %171 = arith.addf %168, %170 : vector<2x128xf32>
    %172 = math.tanh %171 : vector<2x128xf32>
    %cst_53 = arith.constant 1.000000e+00 : f32
    %173 = vector.broadcast %cst_53 : f32 to vector<2x128xf32>
    %174 = arith.subf %173, %167 : vector<2x128xf32>
    %175 = arith.mulf %174, %172 : vector<2x128xf32>
    %176 = arith.mulf %167, %135 : vector<2x128xf32>
    %177 = arith.addf %175, %176 : vector<2x128xf32>
    %178 = vector.extract_strided_slice %177 {offsets = [0, 0], sizes = [2, 64], strides = [1, 1]} : vector<2x128xf32> to vector<2x64xf32>
    %c2 = arith.constant 2 : index
    %c0_54 = arith.constant 0 : index
    %c0_55 = arith.constant 0 : index
    %179 = vector.load %arg21[%c2, %c0_54, %c0_55] : memref<8x2x64xf32, #tpu.memory_space<vmem>>, vector<1x2x64xf32>
    %180 = vector.shape_cast %179 : vector<1x2x64xf32> to vector<2x64xf32>
    %181 = vector.shape_cast %178 : vector<2x64xf32> to vector<1x2x64xf32>
    tpu.vector_store %arg21[%c2, %c0_54, %c0_55], %181 {strides = array<i32>} : memref<8x2x64xf32, #tpu.memory_space<vmem>>, vector<1x2x64xf32>,
    %182 = vector.extract_strided_slice %177 {offsets = [0, 64], sizes = [2, 64], strides = [1, 1]} : vector<2x128xf32> to vector<2x64xf32>
    %c2_56 = arith.constant 2 : index
    %c0_57 = arith.constant 0 : index
    %c0_58 = arith.constant 0 : index
    %183 = vector.load %arg22[%c2_56, %c0_57, %c0_58] : memref<4x2x64xf32, #tpu.memory_space<vmem>>, vector<1x2x64xf32>
    %184 = vector.shape_cast %183 : vector<1x2x64xf32> to vector<2x64xf32>
    %185 = vector.shape_cast %182 : vector<2x64xf32> to vector<1x2x64xf32>
    tpu.vector_store %arg22[%c2_56, %c0_57, %c0_58], %185 {strides = array<i32>} : memref<4x2x64xf32, #tpu.memory_space<vmem>>, vector<1x2x64xf32>,
    %cst_59 = arith.constant dense<0.000000e+00> : vector<2x384xf32>
    %186 = tpu.matmul %177, %55, %cst_59 {dimension_numbers = #tpu.dot_dimension_numbers<[1], [0], [0], [1], [0, 0, 1, 1], [], []>} : vector<2x128xf32>, vector<128x384xf32>, vector<2x384xf32> -> vector<2x384xf32>
    %187 = arith.addf %186, %58 : vector<2x384xf32>
    %188 = vector.extract_strided_slice %54 {offsets = [3, 0, 0], sizes = [1, 2, 384], strides = [1, 1, 1]} : vector<4x2x384xf32> to vector<1x2x384xf32>
    %189 = vector.shape_cast %188 : vector<1x2x384xf32> to vector<2x384xf32>
    %190 = vector.extract_strided_slice %189 {offsets = [0, 0], sizes = [2, 128], strides = [1, 1]} : vector<2x384xf32> to vector<2x128xf32>
    %191 = vector.extract_strided_slice %187 {offsets = [0, 0], sizes = [2, 128], strides = [1, 1]} : vector<2x384xf32> to vector<2x128xf32>
    %192 = arith.addf %190, %191 : vector<2x128xf32>
    %cst_60 = arith.constant 0.000000e+00 : f32
    %193 = vector.broadcast %cst_60 : f32 to vector<2x128xf32>
    %194 = arith.subf %193, %192 : vector<2x128xf32>
    %195 = math.exp %194 : vector<2x128xf32>
    %cst_61 = arith.constant 1.000000e+00 : f32
    %196 = vector.broadcast %cst_61 : f32 to vector<2x128xf32>
    %197 = arith.addf %196, %195 : vector<2x128xf32>
    %cst_62 = arith.constant 1.000000e+00 : f32
    %198 = vector.broadcast %cst_62 : f32 to vector<2x128xf32>
    %199 = arith.divf %198, %197 : vector<2x128xf32>
    %200 = vector.extract_strided_slice %189 {offsets = [0, 128], sizes = [2, 128], strides = [1, 1]} : vector<2x384xf32> to vector<2x128xf32>
    %201 = vector.extract_strided_slice %187 {offsets = [0, 128], sizes = [2, 128], strides = [1, 1]} : vector<2x384xf32> to vector<2x128xf32>
    %202 = arith.addf %200, %201 : vector<2x128xf32>
    %cst_63 = arith.constant 0.000000e+00 : f32
    %203 = vector.broadcast %cst_63 : f32 to vector<2x128xf32>
    %204 = arith.subf %203, %202 : vector<2x128xf32>
    %205 = math.exp %204 : vector<2x128xf32>
    %cst_64 = arith.constant 1.000000e+00 : f32
    %206 = vector.broadcast %cst_64 : f32 to vector<2x128xf32>
    %207 = arith.addf %206, %205 : vector<2x128xf32>
    %cst_65 = arith.constant 1.000000e+00 : f32
    %208 = vector.broadcast %cst_65 : f32 to vector<2x128xf32>
    %209 = arith.divf %208, %207 : vector<2x128xf32>
    %210 = vector.extract_strided_slice %189 {offsets = [0, 256], sizes = [2, 128], strides = [1, 1]} : vector<2x384xf32> to vector<2x128xf32>
    %211 = vector.extract_strided_slice %187 {offsets = [0, 256], sizes = [2, 128], strides = [1, 1]} : vector<2x384xf32> to vector<2x128xf32>
    %212 = arith.mulf %199, %211 : vector<2x128xf32>
    %213 = arith.addf %210, %212 : vector<2x128xf32>
    %214 = math.tanh %213 : vector<2x128xf32>
    %cst_66 = arith.constant 1.000000e+00 : f32
    %215 = vector.broadcast %cst_66 : f32 to vector<2x128xf32>
    %216 = arith.subf %215, %209 : vector<2x128xf32>
    %217 = arith.mulf %216, %214 : vector<2x128xf32>
    %218 = arith.mulf %209, %177 : vector<2x128xf32>
    %219 = arith.addf %217, %218 : vector<2x128xf32>
    %220 = vector.extract_strided_slice %219 {offsets = [0, 0], sizes = [2, 64], strides = [1, 1]} : vector<2x128xf32> to vector<2x64xf32>
    %c3 = arith.constant 3 : index
    %c0_67 = arith.constant 0 : index
    %c0_68 = arith.constant 0 : index
    %221 = vector.load %arg21[%c3, %c0_67, %c0_68] : memref<8x2x64xf32, #tpu.memory_space<vmem>>, vector<1x2x64xf32>
    %222 = vector.shape_cast %221 : vector<1x2x64xf32> to vector<2x64xf32>
    %223 = vector.shape_cast %220 : vector<2x64xf32> to vector<1x2x64xf32>
    tpu.vector_store %arg21[%c3, %c0_67, %c0_68], %223 {strides = array<i32>} : memref<8x2x64xf32, #tpu.memory_space<vmem>>, vector<1x2x64xf32>,
    %224 = vector.extract_strided_slice %219 {offsets = [0, 64], sizes = [2, 64], strides = [1, 1]} : vector<2x128xf32> to vector<2x64xf32>
    %c3_69 = arith.constant 3 : index
    %c0_70 = arith.constant 0 : index
    %c0_71 = arith.constant 0 : index
    %225 = vector.load %arg22[%c3_69, %c0_70, %c0_71] : memref<4x2x64xf32, #tpu.memory_space<vmem>>, vector<1x2x64xf32>
    %226 = vector.shape_cast %225 : vector<1x2x64xf32> to vector<2x64xf32>
    %227 = vector.shape_cast %224 : vector<2x64xf32> to vector<1x2x64xf32>
    tpu.vector_store %arg22[%c3_69, %c0_70, %c0_71], %227 {strides = array<i32>} : memref<4x2x64xf32, #tpu.memory_space<vmem>>, vector<1x2x64xf32>,
    %c0_72 = arith.constant 0 : index
    %c0_73 = arith.constant 0 : index
    %228 = vector.load %arg6[%c0_72, %c0_73] : memref<64x192xf32, #tpu.memory_space<vmem>>, vector<64x192xf32>
    %c0_74 = arith.constant 0 : index
    %c0_75 = arith.constant 0 : index
    %229 = vector.load %arg7[%c0_74, %c0_75] : memref<1x192xf32, #tpu.memory_space<vmem>>, vector<1x192xf32>
    %230 = vector.shape_cast %229 : vector<1x192xf32> to vector<1x192xf32>
    %231 = vector.broadcast %230 : vector<1x192xf32> to vector<2x192xf32>
    %232 = vector.extract_strided_slice %219 {offsets = [0, 0], sizes = [2, 64], strides = [1, 1]} : vector<2x128xf32> to vector<2x64xf32>
    %cst_76 = arith.constant dense<0.000000e+00> : vector<2x192xf32>
    %233 = tpu.matmul %232, %228, %cst_76 {dimension_numbers = #tpu.dot_dimension_numbers<[1], [0], [0], [1], [0, 0, 1, 1], [], []>} : vector<2x64xf32>, vector<64x192xf32>, vector<2x192xf32> -> vector<2x192xf32>
    %234 = arith.addf %233, %231 : vector<2x192xf32>
    %235 = vector.extract_strided_slice %25 {offsets = [4, 0, 0], sizes = [1, 2, 192], strides = [1, 1, 1]} : vector<8x2x192xf32> to vector<1x2x192xf32>
    %236 = vector.shape_cast %235 : vector<1x2x192xf32> to vector<2x192xf32>
    %237 = vector.extract_strided_slice %236 {offsets = [0, 0], sizes = [2, 64], strides = [1, 1]} : vector<2x192xf32> to vector<2x64xf32>
    %238 = vector.extract_strided_slice %234 {offsets = [0, 0], sizes = [2, 64], strides = [1, 1]} : vector<2x192xf32> to vector<2x64xf32>
    %239 = arith.addf %237, %238 : vector<2x64xf32>
    %cst_77 = arith.constant 0.000000e+00 : f32
    %240 = vector.broadcast %cst_77 : f32 to vector<2x64xf32>
    %241 = arith.subf %240, %239 : vector<2x64xf32>
    %242 = math.exp %241 : vector<2x64xf32>
    %cst_78 = arith.constant 1.000000e+00 : f32
    %243 = vector.broadcast %cst_78 : f32 to vector<2x64xf32>
    %244 = arith.addf %243, %242 : vector<2x64xf32>
    %cst_79 = arith.constant 1.000000e+00 : f32
    %245 = vector.broadcast %cst_79 : f32 to vector<2x64xf32>
    %246 = arith.divf %245, %244 : vector<2x64xf32>
    %247 = vector.extract_strided_slice %236 {offsets = [0, 64], sizes = [2, 64], strides = [1, 1]} : vector<2x192xf32> to vector<2x64xf32>
    %248 = vector.extract_strided_slice %234 {offsets = [0, 64], sizes = [2, 64], strides = [1, 1]} : vector<2x192xf32> to vector<2x64xf32>
    %249 = arith.addf %247, %248 : vector<2x64xf32>
    %cst_80 = arith.constant 0.000000e+00 : f32
    %250 = vector.broadcast %cst_80 : f32 to vector<2x64xf32>
    %251 = arith.subf %250, %249 : vector<2x64xf32>
    %252 = math.exp %251 : vector<2x64xf32>
    %cst_81 = arith.constant 1.000000e+00 : f32
    %253 = vector.broadcast %cst_81 : f32 to vector<2x64xf32>
    %254 = arith.addf %253, %252 : vector<2x64xf32>
    %cst_82 = arith.constant 1.000000e+00 : f32
    %255 = vector.broadcast %cst_82 : f32 to vector<2x64xf32>
    %256 = arith.divf %255, %254 : vector<2x64xf32>
    %257 = vector.extract_strided_slice %236 {offsets = [0, 128], sizes = [2, 64], strides = [1, 1]} : vector<2x192xf32> to vector<2x64xf32>
    %258 = vector.extract_strided_slice %234 {offsets = [0, 128], sizes = [2, 64], strides = [1, 1]} : vector<2x192xf32> to vector<2x64xf32>
    %259 = arith.mulf %246, %258 : vector<2x64xf32>
    %260 = arith.addf %257, %259 : vector<2x64xf32>
    %261 = math.tanh %260 : vector<2x64xf32>
    %cst_83 = arith.constant 1.000000e+00 : f32
    %262 = vector.broadcast %cst_83 : f32 to vector<2x64xf32>
    %263 = arith.subf %262, %256 : vector<2x64xf32>
    %264 = arith.mulf %263, %261 : vector<2x64xf32>
    %265 = arith.mulf %256, %232 : vector<2x64xf32>
    %266 = arith.addf %264, %265 : vector<2x64xf32>
    %c4 = arith.constant 4 : index
    %c0_84 = arith.constant 0 : index
    %c0_85 = arith.constant 0 : index
    %267 = vector.load %arg21[%c4, %c0_84, %c0_85] : memref<8x2x64xf32, #tpu.memory_space<vmem>>, vector<1x2x64xf32>
    %268 = vector.shape_cast %267 : vector<1x2x64xf32> to vector<2x64xf32>
    %269 = vector.shape_cast %266 : vector<2x64xf32> to vector<1x2x64xf32>
    tpu.vector_store %arg21[%c4, %c0_84, %c0_85], %269 {strides = array<i32>} : memref<8x2x64xf32, #tpu.memory_space<vmem>>, vector<1x2x64xf32>,
    %cst_86 = arith.constant dense<0.000000e+00> : vector<2x192xf32>
    %270 = tpu.matmul %266, %228, %cst_86 {dimension_numbers = #tpu.dot_dimension_numbers<[1], [0], [0], [1], [0, 0, 1, 1], [], []>} : vector<2x64xf32>, vector<64x192xf32>, vector<2x192xf32> -> vector<2x192xf32>
    %271 = arith.addf %270, %231 : vector<2x192xf32>
    %272 = vector.extract_strided_slice %25 {offsets = [5, 0, 0], sizes = [1, 2, 192], strides = [1, 1, 1]} : vector<8x2x192xf32> to vector<1x2x192xf32>
    %273 = vector.shape_cast %272 : vector<1x2x192xf32> to vector<2x192xf32>
    %274 = vector.extract_strided_slice %273 {offsets = [0, 0], sizes = [2, 64], strides = [1, 1]} : vector<2x192xf32> to vector<2x64xf32>
    %275 = vector.extract_strided_slice %271 {offsets = [0, 0], sizes = [2, 64], strides = [1, 1]} : vector<2x192xf32> to vector<2x64xf32>
    %276 = arith.addf %274, %275 : vector<2x64xf32>
    %cst_87 = arith.constant 0.000000e+00 : f32
    %277 = vector.broadcast %cst_87 : f32 to vector<2x64xf32>
    %278 = arith.subf %277, %276 : vector<2x64xf32>
    %279 = math.exp %278 : vector<2x64xf32>
    %cst_88 = arith.constant 1.000000e+00 : f32
    %280 = vector.broadcast %cst_88 : f32 to vector<2x64xf32>
    %281 = arith.addf %280, %279 : vector<2x64xf32>
    %cst_89 = arith.constant 1.000000e+00 : f32
    %282 = vector.broadcast %cst_89 : f32 to vector<2x64xf32>
    %283 = arith.divf %282, %281 : vector<2x64xf32>
    %284 = vector.extract_strided_slice %273 {offsets = [0, 64], sizes = [2, 64], strides = [1, 1]} : vector<2x192xf32> to vector<2x64xf32>
    %285 = vector.extract_strided_slice %271 {offsets = [0, 64], sizes = [2, 64], strides = [1, 1]} : vector<2x192xf32> to vector<2x64xf32>
    %286 = arith.addf %284, %285 : vector<2x64xf32>
    %cst_90 = arith.constant 0.000000e+00 : f32
    %287 = vector.broadcast %cst_90 : f32 to vector<2x64xf32>
    %288 = arith.subf %287, %286 : vector<2x64xf32>
    %289 = math.exp %288 : vector<2x64xf32>
    %cst_91 = arith.constant 1.000000e+00 : f32
    %290 = vector.broadcast %cst_91 : f32 to vector<2x64xf32>
    %291 = arith.addf %290, %289 : vector<2x64xf32>
    %cst_92 = arith.constant 1.000000e+00 : f32
    %292 = vector.broadcast %cst_92 : f32 to vector<2x64xf32>
    %293 = arith.divf %292, %291 : vector<2x64xf32>
    %294 = vector.extract_strided_slice %273 {offsets = [0, 128], sizes = [2, 64], strides = [1, 1]} : vector<2x192xf32> to vector<2x64xf32>
    %295 = vector.extract_strided_slice %271 {offsets = [0, 128], sizes = [2, 64], strides = [1, 1]} : vector<2x192xf32> to vector<2x64xf32>
    %296 = arith.mulf %283, %295 : vector<2x64xf32>
    %297 = arith.addf %294, %296 : vector<2x64xf32>
    %298 = math.tanh %297 : vector<2x64xf32>
    %cst_93 = arith.constant 1.000000e+00 : f32
    %299 = vector.broadcast %cst_93 : f32 to vector<2x64xf32>
    %300 = arith.subf %299, %293 : vector<2x64xf32>
    %301 = arith.mulf %300, %298 : vector<2x64xf32>
    %302 = arith.mulf %293, %266 : vector<2x64xf32>
    %303 = arith.addf %301, %302 : vector<2x64xf32>
    %c5 = arith.constant 5 : index
    %c0_94 = arith.constant 0 : index
    %c0_95 = arith.constant 0 : index
    %304 = vector.load %arg21[%c5, %c0_94, %c0_95] : memref<8x2x64xf32, #tpu.memory_space<vmem>>, vector<1x2x64xf32>
    %305 = vector.shape_cast %304 : vector<1x2x64xf32> to vector<2x64xf32>
    %306 = vector.shape_cast %303 : vector<2x64xf32> to vector<1x2x64xf32>
    tpu.vector_store %arg21[%c5, %c0_94, %c0_95], %306 {strides = array<i32>} : memref<8x2x64xf32, #tpu.memory_space<vmem>>, vector<1x2x64xf32>,
    %cst_96 = arith.constant dense<0.000000e+00> : vector<2x192xf32>
    %307 = tpu.matmul %303, %228, %cst_96 {dimension_numbers = #tpu.dot_dimension_numbers<[1], [0], [0], [1], [0, 0, 1, 1], [], []>} : vector<2x64xf32>, vector<64x192xf32>, vector<2x192xf32> -> vector<2x192xf32>
    %308 = arith.addf %307, %231 : vector<2x192xf32>
    %309 = vector.extract_strided_slice %25 {offsets = [6, 0, 0], sizes = [1, 2, 192], strides = [1, 1, 1]} : vector<8x2x192xf32> to vector<1x2x192xf32>
    %310 = vector.shape_cast %309 : vector<1x2x192xf32> to vector<2x192xf32>
    %311 = vector.extract_strided_slice %310 {offsets = [0, 0], sizes = [2, 64], strides = [1, 1]} : vector<2x192xf32> to vector<2x64xf32>
    %312 = vector.extract_strided_slice %308 {offsets = [0, 0], sizes = [2, 64], strides = [1, 1]} : vector<2x192xf32> to vector<2x64xf32>
    %313 = arith.addf %311, %312 : vector<2x64xf32>
    %cst_97 = arith.constant 0.000000e+00 : f32
    %314 = vector.broadcast %cst_97 : f32 to vector<2x64xf32>
    %315 = arith.subf %314, %313 : vector<2x64xf32>
    %316 = math.exp %315 : vector<2x64xf32>
    %cst_98 = arith.constant 1.000000e+00 : f32
    %317 = vector.broadcast %cst_98 : f32 to vector<2x64xf32>
    %318 = arith.addf %317, %316 : vector<2x64xf32>
    %cst_99 = arith.constant 1.000000e+00 : f32
    %319 = vector.broadcast %cst_99 : f32 to vector<2x64xf32>
    %320 = arith.divf %319, %318 : vector<2x64xf32>
    %321 = vector.extract_strided_slice %310 {offsets = [0, 64], sizes = [2, 64], strides = [1, 1]} : vector<2x192xf32> to vector<2x64xf32>
    %322 = vector.extract_strided_slice %308 {offsets = [0, 64], sizes = [2, 64], strides = [1, 1]} : vector<2x192xf32> to vector<2x64xf32>
    %323 = arith.addf %321, %322 : vector<2x64xf32>
    %cst_100 = arith.constant 0.000000e+00 : f32
    %324 = vector.broadcast %cst_100 : f32 to vector<2x64xf32>
    %325 = arith.subf %324, %323 : vector<2x64xf32>
    %326 = math.exp %325 : vector<2x64xf32>
    %cst_101 = arith.constant 1.000000e+00 : f32
    %327 = vector.broadcast %cst_101 : f32 to vector<2x64xf32>
    %328 = arith.addf %327, %326 : vector<2x64xf32>
    %cst_102 = arith.constant 1.000000e+00 : f32
    %329 = vector.broadcast %cst_102 : f32 to vector<2x64xf32>
    %330 = arith.divf %329, %328 : vector<2x64xf32>
    %331 = vector.extract_strided_slice %310 {offsets = [0, 128], sizes = [2, 64], strides = [1, 1]} : vector<2x192xf32> to vector<2x64xf32>
    %332 = vector.extract_strided_slice %308 {offsets = [0, 128], sizes = [2, 64], strides = [1, 1]} : vector<2x192xf32> to vector<2x64xf32>
    %333 = arith.mulf %320, %332 : vector<2x64xf32>
    %334 = arith.addf %331, %333 : vector<2x64xf32>
    %335 = math.tanh %334 : vector<2x64xf32>
    %cst_103 = arith.constant 1.000000e+00 : f32
    %336 = vector.broadcast %cst_103 : f32 to vector<2x64xf32>
    %337 = arith.subf %336, %330 : vector<2x64xf32>
    %338 = arith.mulf %337, %335 : vector<2x64xf32>
    %339 = arith.mulf %330, %303 : vector<2x64xf32>
    %340 = arith.addf %338, %339 : vector<2x64xf32>
    %c6 = arith.constant 6 : index
    %c0_104 = arith.constant 0 : index
    %c0_105 = arith.constant 0 : index
    %341 = vector.load %arg21[%c6, %c0_104, %c0_105] : memref<8x2x64xf32, #tpu.memory_space<vmem>>, vector<1x2x64xf32>
    %342 = vector.shape_cast %341 : vector<1x2x64xf32> to vector<2x64xf32>
    %343 = vector.shape_cast %340 : vector<2x64xf32> to vector<1x2x64xf32>
    tpu.vector_store %arg21[%c6, %c0_104, %c0_105], %343 {strides = array<i32>} : memref<8x2x64xf32, #tpu.memory_space<vmem>>, vector<1x2x64xf32>,
    %cst_106 = arith.constant dense<0.000000e+00> : vector<2x192xf32>
    %344 = tpu.matmul %340, %228, %cst_106 {dimension_numbers = #tpu.dot_dimension_numbers<[1], [0], [0], [1], [0, 0, 1, 1], [], []>} : vector<2x64xf32>, vector<64x192xf32>, vector<2x192xf32> -> vector<2x192xf32>
    %345 = arith.addf %344, %231 : vector<2x192xf32>
    %346 = vector.extract_strided_slice %25 {offsets = [7, 0, 0], sizes = [1, 2, 192], strides = [1, 1, 1]} : vector<8x2x192xf32> to vector<1x2x192xf32>
    %347 = vector.shape_cast %346 : vector<1x2x192xf32> to vector<2x192xf32>
    %348 = vector.extract_strided_slice %347 {offsets = [0, 0], sizes = [2, 64], strides = [1, 1]} : vector<2x192xf32> to vector<2x64xf32>
    %349 = vector.extract_strided_slice %345 {offsets = [0, 0], sizes = [2, 64], strides = [1, 1]} : vector<2x192xf32> to vector<2x64xf32>
    %350 = arith.addf %348, %349 : vector<2x64xf32>
    %cst_107 = arith.constant 0.000000e+00 : f32
    %351 = vector.broadcast %cst_107 : f32 to vector<2x64xf32>
    %352 = arith.subf %351, %350 : vector<2x64xf32>
    %353 = math.exp %352 : vector<2x64xf32>
    %cst_108 = arith.constant 1.000000e+00 : f32
    %354 = vector.broadcast %cst_108 : f32 to vector<2x64xf32>
    %355 = arith.addf %354, %353 : vector<2x64xf32>
    %cst_109 = arith.constant 1.000000e+00 : f32
    %356 = vector.broadcast %cst_109 : f32 to vector<2x64xf32>
    %357 = arith.divf %356, %355 : vector<2x64xf32>
    %358 = vector.extract_strided_slice %347 {offsets = [0, 64], sizes = [2, 64], strides = [1, 1]} : vector<2x192xf32> to vector<2x64xf32>
    %359 = vector.extract_strided_slice %345 {offsets = [0, 64], sizes = [2, 64], strides = [1, 1]} : vector<2x192xf32> to vector<2x64xf32>
    %360 = arith.addf %358, %359 : vector<2x64xf32>
    %cst_110 = arith.constant 0.000000e+00 : f32
    %361 = vector.broadcast %cst_110 : f32 to vector<2x64xf32>
    %362 = arith.subf %361, %360 : vector<2x64xf32>
    %363 = math.exp %362 : vector<2x64xf32>
    %cst_111 = arith.constant 1.000000e+00 : f32
    %364 = vector.broadcast %cst_111 : f32 to vector<2x64xf32>
    %365 = arith.addf %364, %363 : vector<2x64xf32>
    %cst_112 = arith.constant 1.000000e+00 : f32
    %366 = vector.broadcast %cst_112 : f32 to vector<2x64xf32>
    %367 = arith.divf %366, %365 : vector<2x64xf32>
    %368 = vector.extract_strided_slice %347 {offsets = [0, 128], sizes = [2, 64], strides = [1, 1]} : vector<2x192xf32> to vector<2x64xf32>
    %369 = vector.extract_strided_slice %345 {offsets = [0, 128], sizes = [2, 64], strides = [1, 1]} : vector<2x192xf32> to vector<2x64xf32>
    %370 = arith.mulf %357, %369 : vector<2x64xf32>
    %371 = arith.addf %368, %370 : vector<2x64xf32>
    %372 = math.tanh %371 : vector<2x64xf32>
    %cst_113 = arith.constant 1.000000e+00 : f32
    %373 = vector.broadcast %cst_113 : f32 to vector<2x64xf32>
    %374 = arith.subf %373, %367 : vector<2x64xf32>
    %375 = arith.mulf %374, %372 : vector<2x64xf32>
    %376 = arith.mulf %367, %340 : vector<2x64xf32>
    %377 = arith.addf %375, %376 : vector<2x64xf32>
    %c7 = arith.constant 7 : index
    %c0_114 = arith.constant 0 : index
    %c0_115 = arith.constant 0 : index
    %378 = vector.load %arg21[%c7, %c0_114, %c0_115] : memref<8x2x64xf32, #tpu.memory_space<vmem>>, vector<1x2x64xf32>
    %379 = vector.shape_cast %378 : vector<1x2x64xf32> to vector<2x64xf32>
    %380 = vector.shape_cast %377 : vector<2x64xf32> to vector<1x2x64xf32>
    tpu.vector_store %arg21[%c7, %c0_114, %c0_115], %380 {strides = array<i32>} : memref<8x2x64xf32, #tpu.memory_space<vmem>>, vector<1x2x64xf32>,
    %c0_116 = arith.constant 0 : index
    %c0_117 = arith.constant 0 : index
    %c0_118 = arith.constant 0 : index
    %381 = vector.load %arg21[%c0_116, %c0_117, %c0_118] : memref<8x2x64xf32, #tpu.memory_space<vmem>>, vector<8x2x64xf32>
    %c0_119 = arith.constant 0 : index
    %c0_120 = arith.constant 0 : index
    %c0_121 = arith.constant 0 : index
    %382 = vector.load %arg22[%c0_119, %c0_120, %c0_121] : memref<4x2x64xf32, #tpu.memory_space<vmem>>, vector<4x2x64xf32>
    %383 = vector.extract_strided_slice %381 {offsets = [0, 0, 0], sizes = [8, 2, 32], strides = [1, 1, 1]} : vector<8x2x64xf32> to vector<8x2x32xf32>
    %384 = vector.extract_strided_slice %381 {offsets = [0, 0, 32], sizes = [8, 2, 32], strides = [1, 1, 1]} : vector<8x2x64xf32> to vector<8x2x32xf32>
    %385 = vector.extract_strided_slice %384 {offsets = [7, 0, 0], sizes = [1, 2, 32], strides = [1, 1, 1]} : vector<8x2x32xf32> to vector<1x2x32xf32>
    %386 = vector.extract_strided_slice %384 {offsets = [6, 0, 0], sizes = [1, 2, 32], strides = [1, 1, 1]} : vector<8x2x32xf32> to vector<1x2x32xf32>
    %387 = vector.extract_strided_slice %384 {offsets = [5, 0, 0], sizes = [1, 2, 32], strides = [1, 1, 1]} : vector<8x2x32xf32> to vector<1x2x32xf32>
    %388 = vector.extract_strided_slice %384 {offsets = [4, 0, 0], sizes = [1, 2, 32], strides = [1, 1, 1]} : vector<8x2x32xf32> to vector<1x2x32xf32>
    %389 = vector.extract_strided_slice %384 {offsets = [3, 0, 0], sizes = [1, 2, 32], strides = [1, 1, 1]} : vector<8x2x32xf32> to vector<1x2x32xf32>
    %390 = vector.extract_strided_slice %384 {offsets = [2, 0, 0], sizes = [1, 2, 32], strides = [1, 1, 1]} : vector<8x2x32xf32> to vector<1x2x32xf32>
    %391 = vector.extract_strided_slice %384 {offsets = [1, 0, 0], sizes = [1, 2, 32], strides = [1, 1, 1]} : vector<8x2x32xf32> to vector<1x2x32xf32>
    %392 = vector.extract_strided_slice %384 {offsets = [0, 0, 0], sizes = [1, 2, 32], strides = [1, 1, 1]} : vector<8x2x32xf32> to vector<1x2x32xf32>
    %393 = tpu.concatenate %385, %386, %387, %388, %389, %390, %391, %392 in 0 : vector<1x2x32xf32>, vector<1x2x32xf32>, vector<1x2x32xf32>, vector<1x2x32xf32>, vector<1x2x32xf32>, vector<1x2x32xf32>, vector<1x2x32xf32>, vector<1x2x32xf32> -> vector<8x2x32xf32>
    %394 = tpu.concatenate %383, %393 in 2 : vector<8x2x32xf32>, vector<8x2x32xf32> -> vector<8x2x64xf32>
    %395 = vector.extract_strided_slice %382 {offsets = [0, 0, 0], sizes = [4, 2, 32], strides = [1, 1, 1]} : vector<4x2x64xf32> to vector<4x2x32xf32>
    %396 = vector.extract_strided_slice %382 {offsets = [0, 0, 32], sizes = [4, 2, 32], strides = [1, 1, 1]} : vector<4x2x64xf32> to vector<4x2x32xf32>
    %397 = vector.extract_strided_slice %396 {offsets = [3, 0, 0], sizes = [1, 2, 32], strides = [1, 1, 1]} : vector<4x2x32xf32> to vector<1x2x32xf32>
    %398 = vector.extract_strided_slice %396 {offsets = [2, 0, 0], sizes = [1, 2, 32], strides = [1, 1, 1]} : vector<4x2x32xf32> to vector<1x2x32xf32>
    %399 = vector.extract_strided_slice %396 {offsets = [1, 0, 0], sizes = [1, 2, 32], strides = [1, 1, 1]} : vector<4x2x32xf32> to vector<1x2x32xf32>
    %400 = vector.extract_strided_slice %396 {offsets = [0, 0, 0], sizes = [1, 2, 32], strides = [1, 1, 1]} : vector<4x2x32xf32> to vector<1x2x32xf32>
    %401 = tpu.concatenate %397, %398, %399, %400 in 0 : vector<1x2x32xf32>, vector<1x2x32xf32>, vector<1x2x32xf32>, vector<1x2x32xf32> -> vector<4x2x32xf32>
    %402 = tpu.concatenate %395, %401 in 2 : vector<4x2x32xf32>, vector<4x2x32xf32> -> vector<4x2x64xf32>
    %c0_122 = arith.constant 0 : index
    %c0_123 = arith.constant 0 : index
    %403 = vector.load %arg2[%c0_122, %c0_123] : memref<8x2xf32, #tpu.memory_space<vmem>>, vector<8x2xf32>
    %404 = vector.shape_cast %403 : vector<8x2xf32> to vector<8x2x1xf32>
    %405 = vector.broadcast %404 : vector<8x2x1xf32> to vector<8x2x64xf32>
    %406 = arith.mulf %394, %405 : vector<8x2x64xf32>
    %cst_124 = arith.constant dense<0.000000e+00> : vector<2x64xf32>
    %407 = vector.multi_reduction <add>, %406, %cst_124 [0] : vector<8x2x64xf32> to vector<2x64xf32>
    %cst_125 = arith.constant dense<0.000000e+00> : vector<2x1xf32>
    %408 = vector.multi_reduction <add>, %404, %cst_125 [0] : vector<8x2x1xf32> to vector<2x1xf32>
    %cst_126 = arith.constant 9.99999971E-10 : f32
    %409 = vector.broadcast %cst_126 : f32 to vector<2x1xf32>
    %410 = arith.maximumf %408, %409 : vector<2x1xf32>
    %411 = tpu.reciprocal %410 {approx = true} : vector<2x1xf32> -> vector<2x1xf32>
    %412 = vector.broadcast %411 : vector<2x1xf32> to vector<2x64xf32>
    %413 = arith.mulf %407, %412 : vector<2x64xf32>
    %c0_127 = arith.constant 0 : index
    %c0_128 = arith.constant 0 : index
    %414 = vector.load %arg3[%c0_127, %c0_128] : memref<4x2xf32, #tpu.memory_space<vmem>>, vector<4x2xf32>
    %415 = vector.shape_cast %414 : vector<4x2xf32> to vector<4x2x1xf32>
    %416 = vector.broadcast %415 : vector<4x2x1xf32> to vector<4x2x64xf32>
    %417 = arith.mulf %402, %416 : vector<4x2x64xf32>
    %cst_129 = arith.constant dense<0.000000e+00> : vector<2x64xf32>
    %418 = vector.multi_reduction <add>, %417, %cst_129 [0] : vector<4x2x64xf32> to vector<2x64xf32>
    %cst_130 = arith.constant dense<0.000000e+00> : vector<2x1xf32>
    %419 = vector.multi_reduction <add>, %415, %cst_130 [0] : vector<4x2x1xf32> to vector<2x1xf32>
    %cst_131 = arith.constant 9.99999971E-10 : f32
    %420 = vector.broadcast %cst_131 : f32 to vector<2x1xf32>
    %421 = arith.maximumf %419, %420 : vector<2x1xf32>
    %422 = tpu.reciprocal %421 {approx = true} : vector<2x1xf32> -> vector<2x1xf32>
    %423 = vector.broadcast %422 : vector<2x1xf32> to vector<2x64xf32>
    %424 = arith.mulf %418, %423 : vector<2x64xf32>
    %c0_132 = arith.constant 0 : index
    %c0_133 = arith.constant 0 : index
    %425 = vector.load %arg14[%c0_132, %c0_133] : memref<64x64xf32, #tpu.memory_space<vmem>>, vector<64x64xf32>
    %c0_134 = arith.constant 0 : index
    %c0_135 = arith.constant 0 : index
    %426 = vector.load %arg15[%c0_134, %c0_135] : memref<1x64xf32, #tpu.memory_space<vmem>>, vector<1x64xf32>
    %427 = vector.shape_cast %394 : vector<8x2x64xf32> to vector<16x64xf32>
    %cst_136 = arith.constant dense<0.000000e+00> : vector<16x64xf32>
    %428 = tpu.matmul %427, %425, %cst_136 {dimension_numbers = #tpu.dot_dimension_numbers<[1], [0], [0], [1], [0, 0, 1, 1], [], []>} : vector<16x64xf32>, vector<64x64xf32>, vector<16x64xf32> -> vector<16x64xf32>
    %429 = vector.shape_cast %428 : vector<16x64xf32> to vector<8x2x64xf32>
    %430 = vector.shape_cast %426 : vector<1x64xf32> to vector<1x1x64xf32>
    %431 = vector.broadcast %430 : vector<1x1x64xf32> to vector<8x2x64xf32>
    %432 = arith.addf %429, %431 : vector<8x2x64xf32>
    %433 = math.tanh %432 : vector<8x2x64xf32>
    %434 = vector.shape_cast %424 : vector<2x64xf32> to vector<1x2x64xf32>
    %435 = vector.broadcast %434 : vector<1x2x64xf32> to vector<8x2x64xf32>
    %436 = arith.mulf %433, %435 : vector<8x2x64xf32>
    %cst_137 = arith.constant dense<0.000000e+00> : vector<8x2xf32>
    %437 = vector.multi_reduction <add>, %436, %cst_137 [2] : vector<8x2x64xf32> to vector<8x2xf32>
    %438 = vector.shape_cast %437 : vector<8x2xf32> to vector<8x2x1xf32>
    %cst_138 = arith.constant dense<0xFF800000> : vector<2x1xf32>
    %439 = vector.multi_reduction <maximumf>, %438, %cst_138 [0] : vector<8x2x1xf32> to vector<2x1xf32>
    %440 = vector.shape_cast %439 : vector<2x1xf32> to vector<1x2x1xf32>
    %441 = vector.broadcast %440 : vector<1x2x1xf32> to vector<8x2x1xf32>
    %442 = arith.subf %438, %441 : vector<8x2x1xf32>
    %443 = math.exp %442 : vector<8x2x1xf32>
    %cst_139 = arith.constant dense<0.000000e+00> : vector<2x1xf32>
    %444 = vector.multi_reduction <add>, %443, %cst_139 [0] : vector<8x2x1xf32> to vector<2x1xf32>
    %445 = vector.shape_cast %444 : vector<2x1xf32> to vector<1x2x1xf32>
    %446 = vector.broadcast %445 : vector<1x2x1xf32> to vector<8x2x1xf32>
    %447 = arith.divf %443, %446 : vector<8x2x1xf32>
    %448 = vector.broadcast %447 : vector<8x2x1xf32> to vector<8x2x64xf32>
    %449 = arith.mulf %448, %394 : vector<8x2x64xf32>
    %cst_140 = arith.constant dense<0.000000e+00> : vector<2x64xf32>
    %450 = vector.multi_reduction <add>, %449, %cst_140 [0] : vector<8x2x64xf32> to vector<2x64xf32>
    %c0_141 = arith.constant 0 : index
    %c0_142 = arith.constant 0 : index
    %451 = vector.load %arg16[%c0_141, %c0_142] : memref<64x64xf32, #tpu.memory_space<vmem>>, vector<64x64xf32>
    %c0_143 = arith.constant 0 : index
    %c0_144 = arith.constant 0 : index
    %452 = vector.load %arg17[%c0_143, %c0_144] : memref<1x64xf32, #tpu.memory_space<vmem>>, vector<1x64xf32>
    %453 = vector.shape_cast %402 : vector<4x2x64xf32> to vector<8x64xf32>
    %cst_145 = arith.constant dense<0.000000e+00> : vector<8x64xf32>
    %454 = tpu.matmul %453, %451, %cst_145 {dimension_numbers = #tpu.dot_dimension_numbers<[1], [0], [0], [1], [0, 0, 1, 1], [], []>} : vector<8x64xf32>, vector<64x64xf32>, vector<8x64xf32> -> vector<8x64xf32>
    %455 = vector.shape_cast %454 : vector<8x64xf32> to vector<4x2x64xf32>
    %456 = vector.shape_cast %452 : vector<1x64xf32> to vector<1x1x64xf32>
    %457 = vector.broadcast %456 : vector<1x1x64xf32> to vector<4x2x64xf32>
    %458 = arith.addf %455, %457 : vector<4x2x64xf32>
    %459 = math.tanh %458 : vector<4x2x64xf32>
    %460 = vector.shape_cast %413 : vector<2x64xf32> to vector<1x2x64xf32>
    %461 = vector.broadcast %460 : vector<1x2x64xf32> to vector<4x2x64xf32>
    %462 = arith.mulf %459, %461 : vector<4x2x64xf32>
    %cst_146 = arith.constant dense<0.000000e+00> : vector<4x2xf32>
    %463 = vector.multi_reduction <add>, %462, %cst_146 [2] : vector<4x2x64xf32> to vector<4x2xf32>
    %464 = vector.shape_cast %463 : vector<4x2xf32> to vector<4x2x1xf32>
    %cst_147 = arith.constant dense<0xFF800000> : vector<2x1xf32>
    %465 = vector.multi_reduction <maximumf>, %464, %cst_147 [0] : vector<4x2x1xf32> to vector<2x1xf32>
    %466 = vector.shape_cast %465 : vector<2x1xf32> to vector<1x2x1xf32>
    %467 = vector.broadcast %466 : vector<1x2x1xf32> to vector<4x2x1xf32>
    %468 = arith.subf %464, %467 : vector<4x2x1xf32>
    %469 = math.exp %468 : vector<4x2x1xf32>
    %cst_148 = arith.constant dense<0.000000e+00> : vector<2x1xf32>
    %470 = vector.multi_reduction <add>, %469, %cst_148 [0] : vector<4x2x1xf32> to vector<2x1xf32>
    %471 = vector.shape_cast %470 : vector<2x1xf32> to vector<1x2x1xf32>
    %472 = vector.broadcast %471 : vector<1x2x1xf32> to vector<4x2x1xf32>
    %473 = arith.divf %469, %472 : vector<4x2x1xf32>
    %474 = vector.broadcast %473 : vector<4x2x1xf32> to vector<4x2x64xf32>
    %475 = arith.mulf %474, %402 : vector<4x2x64xf32>
    %cst_149 = arith.constant dense<0.000000e+00> : vector<2x64xf32>
    %476 = vector.multi_reduction <add>, %475, %cst_149 [0] : vector<4x2x64xf32> to vector<2x64xf32>
    %477 = tpu.concatenate %450, %476 in 1 : vector<2x64xf32>, vector<2x64xf32> -> vector<2x128xf32>
    %c0_150 = arith.constant 0 : index
    %c0_151 = arith.constant 0 : index
    %478 = vector.load %arg18[%c0_150, %c0_151] : memref<128x3xf32, #tpu.memory_space<vmem>>, vector<128x3xf32>
    %cst_152 = arith.constant dense<0.000000e+00> : vector<2x3xf32>
    %479 = tpu.matmul %477, %478, %cst_152 {dimension_numbers = #tpu.dot_dimension_numbers<[1], [0], [0], [1], [0, 0, 1, 1], [], []>} : vector<2x128xf32>, vector<128x3xf32>, vector<2x3xf32> -> vector<2x3xf32>
    %c0_153 = arith.constant 0 : index
    %c0_154 = arith.constant 0 : index
    %480 = vector.load %arg19[%c0_153, %c0_154] : memref<1x3xf32, #tpu.memory_space<vmem>>, vector<1x3xf32>
    %481 = vector.broadcast %480 : vector<1x3xf32> to vector<2x3xf32>
    %482 = arith.addf %479, %481 : vector<2x3xf32>
    %c0_155 = arith.constant 0 : index
    %c0_156 = arith.constant 0 : index
    %483 = vector.load %arg20[%c0_155, %c0_156] : memref<2x3xf32, #tpu.memory_space<vmem>>, vector<2x3xf32>
    tpu.vector_store %arg20[%c0_155, %c0_156], %482 {strides = array<i32>} : memref<2x3xf32, #tpu.memory_space<vmem>>, vector<2x3xf32>,
    return
  }
}

</mosaic_0001>

<bundles_post_ra>
// kernel: ian_forward.1
= control target key start
LH: loop header
LB: loop body
LE: loop exit
PB: predicated region body
PF: predicated region fallthrough
CT: control target
= control target key end

     0   :  { %s4018_s0 = inlined_call_operand.vmem [shape: f32[8,2,32], index: 0, kind: input, shape index: {}]   ;;  %s4019_s1 = inlined_call_operand.vmem [shape: f32[4,2,32], index: 1, kind: input, shape index: {}]   ;;  %s4020_s2 = inlined_call_operand.vmem [shape: f32[8,2], index: 2, kind: input, shape index: {}]   ;;  %s4021_s3 = inlined_call_operand.vmem [shape: f32[4,2], index: 3, kind: input, shape index: {}]   ;;  %s4022_s4 = inlined_call_operand.vmem [shape: f32[32,192], index: 4, kind: input, shape index: {}]   ;;  %s4023_s5 = inlined_call_operand.vmem [shape: f32[1,192], index: 5, kind: input, shape index: {}]   ;;  %s4024_s6 = inlined_call_operand.vmem [shape: f32[64,192], index: 6, kind: input, shape index: {}]   ;;  %s4025_s7 = inlined_call_operand.vmem [shape: f32[1,192], index: 7, kind: input, shape index: {}]   ;;  %s4026_s8 = inlined_call_operand.hbm [shape: f32[32,192], index: 8, kind: input, shape index: {}]   ;;  %s4027_s9 = inlined_call_operand.vmem [shape: f32[1,192], index: 9, kind: input, shape index: {}]   ;;  %s4028_s10 = inlined_call_operand.hbm [shape: f32[64,192], index: 10, kind: input, shape index: {}]   ;;  %s4029_s11 = inlined_call_operand.vmem [shape: f32[1,192], index: 11, kind: input, shape index: {}]   ;;  %s4030_s12 = inlined_call_operand.vmem [shape: f32[128,384], index: 12, kind: input, shape index: {}]   ;;  %s4031_s13 = inlined_call_operand.vmem [shape: f32[1,384], index: 13, kind: input, shape index: {}]   ;;  %s4032_s14 = inlined_call_operand.hbm [shape: f32[64,64], index: 14, kind: input, shape index: {}]   ;;  %s4033_s15 = inlined_call_operand.vmem [shape: f32[1,64], index: 15, kind: input, shape index: {}]   ;;  %s4034_s16 = inlined_call_operand.hbm [shape: f32[64,64], index: 16, kind: input, shape index: {}]   ;;  %s4035_s17 = inlined_call_operand.vmem [shape: f32[1,64], index: 17, kind: input, shape index: {}]   ;;  %s4036_s18 = inlined_call_operand.vmem [shape: f32[128,3], index: 18, kind: input, shape index: {}]   ;;  %s4037_s19 = inlined_call_operand.vmem [shape: f32[1,3], index: 19, kind: input, shape index: {}]   ;;  %s4038_s20 = inlined_call_operand.hbm [shape: f32[2,3], index: 20, kind: output, shape index: {}]  }
   0x1   :  { %4052 = sst [smem:[#allocation63_spill]] %s4018_s0 }
   0x2   :  { %4053 = sst [smem:[#allocation64_spill]] %s4019_s1 }
   0x3   :  { %4054 = sst [smem:[#allocation65_spill]] %s4020_s2 }
   0x4   :  { %4055 = sst [smem:[#allocation66_spill]] %s4021_s3 }
   0x5   :  { %4056 = sst [smem:[#allocation67_spill]] %s4022_s4 }
   0x6   :  { %25 = vsyncpa [#allocation5], 0 }
   0x7   :  { %26 = vsyncpa [#allocation8], 0 }
   0x8   :  { %27 = vsyncpa [#allocation11], 0 }
   0x9   :  { %28 = vsyncpa [#allocation6], 0  ;;  %s64_s22 = sshll.u32 %s4028_s10, 4  ;;  %s2473_s23 = smov [#allocation7]   ;;  %s65_s22 = int_to_ptr.hbm [resolvable:$true] %s64_s22 }
   0xa   :  { %s66_s24 = sshll.u32 %s2473_s23, 4  ;;  %s49_s3 = sshll.u32 %s4026_s8, 4  ;;  %s67_s24 = int_to_ptr.vmem [resolvable:$true] %s66_s24  ;;  %s50_s3 = int_to_ptr.hbm [resolvable:$true] %s49_s3 }
   0xb   :  { %s2474_s26 = smov 256   ;;  %s2475_s27 = smov 16  }
   0xc   :  { %72 = dma.hbm_to_vmem [thread:$0]  %s65_s22, 2048, %s67_s24, [#allocation8], %s2474_s26, %s2474_s26, %s2475_s27  }
   0xd   :  { %s2476_s28 = smov [#allocation4]   ;;  %s83_s30 = sshll.u32 %s4032_s14, 4  ;;  %s84_s30 = int_to_ptr.hbm [resolvable:$true] %s83_s30 }
   0xe   :  { %s51_s4 = sshll.u32 %s2476_s28, 4  ;;  %s2477_s10 = smov [#allocation9]   ;;  %s52_s4 = int_to_ptr.vmem [resolvable:$true] %s51_s4 }
   0xf   :  { %57 = dma.hbm_to_vmem [thread:$0]  %s50_s3, 1024, %s52_s4, [#allocation5], %s2474_s26, %s2474_s26, %s2475_s27  }
  0x10   :  { %s85_s0 = sshll.u32 %s2477_s10, 4  ;;  %s98_s8 = sshll.u32 %s4034_s16, 4  ;;  %s86_s0 = int_to_ptr.vmem [resolvable:$true] %s85_s0  ;;  %s99_s8 = int_to_ptr.hbm [resolvable:$true] %s98_s8 }
  0x11   :  { %s2478_s23 = smov 128   ;;  %s2479_s2 = smov 8  }
  0x12   :  { %91 = dma.hbm_to_vmem [thread:$0]  %s84_s30, 1024, %s86_s0, [#allocation8], %s2478_s23, %s2478_s23, %s2479_s2  }
  0x13   :  { %s2480_s22 = smov [#allocation10]  }
  0x14   :  { %s100_s24 = sshll.u32 %s2480_s22, 4  ;;  %s101_s24 = int_to_ptr.vmem [resolvable:$true] %s100_s24 }
  0x15   :  { %106 = dma.hbm_to_vmem [thread:$0]  %s99_s8, 1024, %s101_s24, [#allocation11], %s2478_s23, %s2478_s23, %s2479_s2  }
  0x16   :  { %2465 = dma.done.wait [#allocation5], 1024  }
  0x17   :  { %2466 = vsyncadd [#allocation5], 4294966272 }
  0x18   :  { %2467 = dma.done.wait [#allocation8], 3072  }
  0x19   :  { %2468 = vsyncadd [#allocation8], 4294964224 }
  0x1a   :  { %2469 = dma.done.wait [#allocation11], 1024  }
  0x1b   :  { %2470 = vsyncadd [#allocation11], 4294966272  ;;  %s4057_s3 = sld [smem:[#allocation67_spill]]  ;;  %vm176_vm0 = vcmask 261120   ;;  %v145_v20 = vld [vmem:[%s4023_s5] sm:$0x3] }
  0x1c   :  { %s4058_s8 = sld [smem:[#allocation63_spill]]  ;;  %v148_v21 = vperm.slane %v145_v20, 1  ;;  %v147_v22 = vperm.slane %v145_v20, 0  ;;  %vm238_vm1 = vcmask 1045508   ;;  %vm241_vm2 = vcmask 1045504   ;;  %s2481_s5 = smov 32  }
  0x1d   :  { %vm235_vm3 = vcmask 1043458   ;;  %vm233_vm4 = vcmask 1041408   ;;  %s4094_s24 = sld [smem:[#allocation64_spill]]  ;;  %vm456_vm5 = vcmask 523264   ;;  %vm465_vm6 = vcmask 785408   ;;  %s2485_s10 = smov [#allocation12]  }
  0x1e   :  { %vm904_vm15 = vcmask 517120   ;;  %s4139_s26 = sld [smem:[#allocation65_spill]]  ;;  %s2175_s0 = sshll.u32 %s2485_s10, 4  ;;  %s2176_s0 = int_to_ptr.vmem [resolvable:$true] %s2175_s0 }
  0x1f   :  { %s4140_s28 = sld [smem:[#allocation66_spill]]  ;;  %s2177_s1 = sshll.u32 %s4038_s20, 4  ;;  %s2178_s1 = int_to_ptr.hbm [resolvable:$true] %s2177_s1 }
  0x21   :  { %v144_v0 = vld [vmem:[%s4057_s3 + $0x38] sm:$0xff]  ;;  %v143_v1 = vld [vmem:[%s4057_s3 + $0x30] sm:$0xff]  ;;  %v142_v2 = vld [vmem:[%s4057_s3 + $0x28] sm:$0xff] }
  0x22   :  { %216 = vmatpush.msra.mxu1 %v144_v0  ;;  %193 = vmatpush.msra.mxu0 %v143_v1  ;;  %v141_v3 = vld [vmem:[%s4057_s3 + $0x20] sm:$0xff]  ;;  %v140_v4 = vld [vmem:[%s4057_s3 + $0x18] sm:$0xff]  ;;  %v139_v5 = vld [vmem:[%s4057_s3 + $0x10] sm:$0xff] }
  0x23   :  { %v129_v6 = vld [vmem:[%s4058_s8] sm:$0x3]  ;;  %v130_v7 = vld [vmem:[%s4058_s8 + $0x2] sm:$0x3]  ;;  %v131_v8 = vld [vmem:[%s4058_s8 + $0x4] sm:$0x3] }
  0x24   :  { %217 = vmatpush.msra.mxu1 %v142_v2  ;;  %194 = vmatpush.msra.mxu0 %v141_v3  ;;  %v132_v9 = vld [vmem:[%s4058_s8 + $0x6] sm:$0x3]  ;;  %159 = vst [vmem:[#allocation1] ss:$4 sm:$0xff] %v129_v6  ;;  %v138_v10 = vld [vmem:[%s4057_s3 + $0x8] sm:$0xff] }
  0x25   :  { %161 = vst [vmem:[#allocation1 + $0x1] ss:$4 sm:$0xff] %v130_v7  ;;  %v137_v11 = vld [vmem:[%s4057_s3] sm:$0xff]  ;;  %v133_v12 = vld [vmem:[%s4058_s8 + $0x8] sm:$0x3] }
  0x26   :  { %218 = vmatpush.msra.mxu1 %v140_v4  ;;  %195 = vmatpush.msra.mxu0 %v139_v5  ;;  %163 = vst [vmem:[#allocation1 + $0x2] ss:$4 sm:$0xff] %v131_v8  ;;  %v134_v13 = vld [vmem:[%s4058_s8 + $0xa] sm:$0x3]  ;;  %v135_v14 = vld [vmem:[%s4058_s8 + $0xc] sm:$0x3] }
  0x27   :  { %165 = vst [vmem:[#allocation1 + $0x3] ss:$4 sm:$0xff] %v132_v9  ;;  %v136_v15 = vld [vmem:[%s4058_s8 + $0xe] sm:$0x3]  ;;  %s2482_s8 = smov 96  }
  0x28   :  { %219 = vmatpush.msra.mxu1 %v138_v10  ;;  %196 = vmatpush.msra.mxu0 %v137_v11  ;;  %167 = vst [vmem:[#allocation1 + $0x20] ss:$4 sm:$0xff] %v133_v12 }
  0x29   :  { %169 = vst [vmem:[#allocation1 + $0x21] ss:$4 sm:$0xff] %v134_v13  ;;  %v493_v13 = vld [vmem:[#allocation4 + $0x38] sm:$0xff] }
  0x2a   :  { %171 = vst [vmem:[#allocation1 + $0x22] ss:$4 sm:$0xff] %v135_v14  ;;  %546 = vmatpush.msra.mxu3 %v493_v13  ;;  %v492_v14 = vld [vmem:[#allocation4 + $0x30] sm:$0xff] }
  0x2b   :  { %173 = vst [vmem:[#allocation1 + $0x23] ss:$4 sm:$0xff] %v136_v15  ;;  %v491_v15 = vld [vmem:[#allocation4 + $0x28] sm:$0xff]  ;;  %526 = vmatpush.msra.mxu2 %v492_v14 }
  0x2c   :  { %547 = vmatpush.msra.mxu3 %v491_v15 }
  0x2e   :  { %v174_v16 = vld.sshfl [vmem:[#allocation1] sm:$0xff pattern:$0x73625140] }
  0x2f   :  { %2191 = vmatmul.msk.f32.vlgmr.msra.gmra.mxu1 %vm176_vm0, %v174_v16  ;;  %2189 = vmatmul.msk.f32.vlgmr.msra.gmra.mxu0 %vm176_vm0, %v174_v16  ;;  %v490_v16 = vld [vmem:[#allocation4 + $0x20] sm:$0xff] }
  0x30   :  { %527 = vmatpush.msra.mxu2 %v490_v16 }
  0x32   :  { %v175_v17 = vld.sshfl [vmem:[#allocation1 + $0x20] sm:$0xff pattern:$0x73625140] }
  0x37   :  { %2192 = vmatmul.msk.f32.gmra.mxu1 %vm176_vm0, %v175_v17  ;;  %2190 = vmatmul.msk.f32.gmra.mxu0 %vm176_vm0, %v175_v17  ;;  %v489_v17 = vld [vmem:[#allocation4 + $0x18] sm:$0xff] }
  0x38   :  { %548 = vmatpush.msra.mxu3 %v489_v17 }
  0xac   :  { %v221_v18 = vpop.f32.mrf.mxu1  ;;  %v198_v19 = vpop.f32.mrf.mxu0 }
  0xad   :  { %v222_v32 = vadd.f32 %v221_v18, %v148_v21  ;;  %v199_v36 = vadd.f32 %v198_v19, %v147_v22  ;;  %v488_v18 = vld [vmem:[#allocation4 + $0x10] sm:$0xff]  ;;  %v487_v19 = vld [vmem:[#allocation4 + $0x8] sm:$0xff] }
  0xae   :  { %528 = vmatpush.msra.mxu2 %v488_v18  ;;  %549 = vmatpush.msra.mxu3 %v487_v19 }
  0xaf   :  { %v231_v35 = vrot.slane %v222_v32, 6  ;;  %v484_v32 = vld [vmem:[%s4094_s24 + $0x4] sm:$0x3] }
  0xb1   :  { %v242_v40 = vsel %vm241_vm2, %v231_v35, %v199_v36  ;;  %v239_v41 = vsel %vm238_vm1, %v199_v36, %v231_v35  ;;  %v236_v46 = vsel %vm235_vm3, %v199_v36, %v231_v35  ;;  %v2696_v49 = vsel %vm233_vm4, %v199_v36, %v231_v35  ;;  %v494_v36 = vld [vmem:[%s4027_s9] sm:$0x3]  ;;  %s2483_s9 = smov 64  }
  0xb2   :  { %v2680_v42 = vrot.slane %v242_v40, 6  ;;  %v2682_v43 = vrot.slane %v239_v41, 4  ;;  %v2691_v47 = vrot.slane %v236_v46, 2  ;;  %v497_v40 = vperm.slane %v494_v36, 1 }
  0xb3   :  { %v496_v41 = vperm.slane %v494_v36, 0 }
  0xb4   :  { %v224_v23 = vpop.f32.mrf.mxu1  ;;  %v201_v24 = vpop.f32.mrf.mxu0  ;;  %4063 = vst [vmem:[#allocation21_spill] sm:$0xff] %v2680_v42 }
  0xb5   :  { %v225_v25 = vadd.f32 %v224_v23, %v148_v21  ;;  %v202_v26 = vadd.f32 %v201_v24, %v147_v22  ;;  %4064 = vst [vmem:[#allocation22_spill] sm:$0xff] %v2682_v43  ;;  %v486_v22 = vld [vmem:[#allocation4] sm:$0xff] }
  0xb6   :  { %529 = vmatpush.msra.mxu2 %v486_v22 }
  0xb7   :  { %v232_v27 = vrot.slane %v225_v25, 6 }
  0xb9   :  { %v247_v28 = vsel %vm238_vm1, %v202_v26, %v232_v27  ;;  %v249_v29 = vsel %vm241_vm2, %v232_v27, %v202_v26  ;;  %v245_v33 = vsel %vm235_vm3, %v202_v26, %v232_v27  ;;  %v2672_v38 = vsel %vm233_vm4, %v202_v26, %v232_v27  ;;  %v482_v27 = vld [vmem:[%s4094_s24] sm:$0x3] }
  0xba   :  { %v2660_v30 = vrot.slane %v247_v28, 4  ;;  %v2662_v31 = vrot.slane %v249_v29, 6  ;;  %v2667_v34 = vrot.slane %v245_v33, 2  ;;  %4062 = vst [vmem:[#allocation20_spill] sm:$0xff] %v2672_v38  ;;  %v483_v28 = vld [vmem:[%s4094_s24 + $0x2] sm:$0x3] }
  0xbb   :  { %v485_v33 = vld [vmem:[%s4094_s24 + $0x6] sm:$0x3] }
  0xbc   :  { %4059 = vst [vmem:[#allocation17_spill] sm:$0xff] %v2660_v30 }
  0xbd   :  { %4060 = vst [vmem:[#allocation18_spill] sm:$0xff] %v2662_v31 }
  0xbe   :  { %259 = vst [vmem:[#allocation1] ss:$4 sm:$0xff] %v2662_v31 }
  0xbf   :  { %262 = vst [vmem:[#allocation1 + $0x20] ss:$4 sm:$0xff] %v2660_v30 }
  0xc0   :  { %4061 = vst [vmem:[#allocation19_spill] sm:$0xff] %v2667_v34 }
  0xc5   :  { %v2669_v37 = vld.sshfl [vmem:[#allocation1] sm:$0xff pattern:$0x73625140] }
  0xc6   :  { %v2674_v39 = vld.sshfl [vmem:[#allocation1 + $0x20] sm:$0xff pattern:$0x73625140]  ;;  %264 = vst [vmem:[#allocation1] ss:$4 sm:$0xff] %v2667_v34 }
  0xc7   :  { %266 = vst [vmem:[#allocation1 + $0x20] ss:$4 sm:$0xff] %v2672_v38 }
  0xcd   :  { %v2684_v44 = vld.sshfl [vmem:[#allocation1] sm:$0xff pattern:$0x73625140] }
  0xce   :  { %4065 = vst [vmem:[#allocation23_spill] sm:$0xff] %v2684_v44  ;;  %v2686_v45 = vld.sshfl [vmem:[#allocation1 + $0x20] sm:$0xff pattern:$0x73625140] }
  0xcf   :  { %4066 = vst [vmem:[#allocation24_spill] sm:$0xff] %v2686_v45  ;;  %v3116_v45 = vld [vmem:[%s4030_s12 + $0x130] sm:$0xff]  ;;  %v3209_v44 = vld [vmem:[%s4030_s12 + $0x40] sm:$0xff] }
  0xd0   :  { %268 = vst [vmem:[#allocation1] ss:$4 sm:$0xff] %v2680_v42 }
  0xd1   :  { %270 = vst [vmem:[#allocation1 + $0x20] ss:$4 sm:$0xff] %v2682_v43 }
  0xd7   :  { %v2693_v48 = vld.sshfl [vmem:[#allocation1] sm:$0xff pattern:$0x73625140] }
  0xd8   :  { %4067 = vst [vmem:[#allocation25_spill] sm:$0xff] %v2693_v48  ;;  %v2698_v50 = vld.sshfl [vmem:[#allocation1 + $0x20] sm:$0xff pattern:$0x73625140]  ;;  %v3056_v48 = vld [vmem:[%s4030_s12 + $0x78] sm:$0xff] }
  0xd9   :  { %4068 = vst [vmem:[#allocation26_spill] sm:$0xff] %v2698_v50  ;;  %v3034_v50 = vld [vmem:[%s4030_s12 + $0xa8] sm:$0xff] }
  0xda   :  { %272 = vst [vmem:[#allocation1] ss:$4 sm:$0xff] %v2691_v47 }
  0xdb   :  { %274 = vst [vmem:[#allocation1 + $0x20] ss:$4 sm:$0xff] %v2696_v49 }
  0xe1   :  { %v2702_v51 = vld.sshfl [vmem:[#allocation1] sm:$0xff pattern:$0x73625140] }
  0xe2   :  { %4069 = vst [vmem:[#allocation27_spill] sm:$0xff] %v2702_v51  ;;  %v2704_v52 = vld.sshfl [vmem:[#allocation1 + $0x20] sm:$0xff pattern:$0x73625140] }
  0xe3   :  { %4070 = vst [vmem:[#allocation28_spill] sm:$0xff] %v2704_v52  ;;  %v2999_v52 = vld [vmem:[%s4030_s12 + $0xf0] sm:$0xff]  ;;  %v3021_v51 = vld [vmem:[%s4030_s12 + $0xc0] sm:$0xff] }
  0xe4   :  { %300 = vst [vmem:[#allocation1] ss:$4 sm:$0xff] %v2696_v49 }
  0xe5   :  { %303 = vst [vmem:[#allocation1 + $0x20] ss:$4 sm:$0xff] %v2691_v47 }
  0xeb   :  { %v301_v53 = vld.sshfl [vmem:[#allocation1] sm:$0xff pattern:$0x73625140] }
  0xec   :  { %v2708_v54 = vld.sshfl [vmem:[#allocation1 + $0x20] sm:$0xff pattern:$0x73625140]  ;;  %305 = vst [vmem:[#allocation1] ss:$4 sm:$0xff] %v2682_v43  ;;  %317 = vrot.lane.b32.xlu2 %v301_v53, %s2481_s5 }
  0xed   :  { %307 = vst [vmem:[#allocation1 + $0x20] ss:$4 sm:$0xff] %v2680_v42 }
  0xf3   :  { %v2713_v55 = vld.sshfl [vmem:[#allocation1] sm:$0xff pattern:$0x73625140] }
  0xf4   :  { %v2715_v56 = vld.sshfl [vmem:[#allocation1 + $0x20] sm:$0xff pattern:$0x73625140]  ;;  %309 = vst [vmem:[#allocation1] ss:$4 sm:$0xff] %v2672_v38 }
  0xf5   :  { %4071 = vst [vmem:[#allocation29_spill] sm:$0xff] %v2715_v56  ;;  %v3165_v56 = vld [vmem:[%s4030_s12 + $0xb8] sm:$0xff] }
  0xf6   :  { %311 = vst [vmem:[#allocation1 + $0x20] ss:$4 sm:$0xff] %v2667_v34 }
  0xfb   :  { %v2719_v57 = vld.sshfl [vmem:[#allocation1] sm:$0xff pattern:$0x73625140] }
  0xfc   :  { %4072 = vst [vmem:[#allocation30_spill] sm:$0xff] %v2719_v57  ;;  %v3092_v57 = vld [vmem:[%s4030_s12 + $0x18] sm:$0xff] }
  0xfd   :  { %v2721_v58 = vld.sshfl [vmem:[#allocation1 + $0x20] sm:$0xff pattern:$0x73625140]  ;;  %313 = vst [vmem:[#allocation1] ss:$4 sm:$0xff] %v2660_v30 }
  0xfe   :  { %4073 = vst [vmem:[#allocation31_spill] sm:$0xff] %v2721_v58  ;;  %v2970_v58 = vld [vmem:[%s4030_s12 + $0x98] sm:$0xff] }
  0xff   :  { %315 = vst [vmem:[#allocation1 + $0x20] ss:$4 sm:$0xff] %v2662_v31 }
 0x104   :  { %v2725_v59 = vld.sshfl [vmem:[#allocation1] sm:$0xff pattern:$0x73625140] }
 0x105   :  { %4074 = vst [vmem:[#allocation32_spill] sm:$0xff] %v2725_v59  ;;  %v2949_v59 = vld [vmem:[%s4030_s12 + $0xc8] sm:$0xff] }
 0x106   :  { %v2727_v60 = vld.sshfl [vmem:[#allocation1 + $0x20] sm:$0xff pattern:$0x73625140]  ;;  %341 = vst [vmem:[#allocation1] ss:$4 sm:$0xff] %v2662_v31 }
 0x107   :  { %4075 = vst [vmem:[#allocation33_spill] sm:$0xff] %v2727_v60 }
 0x108   :  { %344 = vst [vmem:[#allocation1 + $0x20] ss:$4 sm:$0xff] %v2660_v30 }
 0x10d   :  { %v342_v61 = vld.sshfl [vmem:[#allocation1 + $0x8] sm:$0xff pattern:$0x73625140] }
 0x10e   :  { %346 = vst [vmem:[#allocation1] ss:$4 sm:$0xff] %v2667_v34  ;;  %358 = vrot.lane.b32.xlu2 %v342_v61, %s2482_s8 }
 0x10f   :  { %v2731_v62 = vld.sshfl [vmem:[#allocation1 + $0x28] sm:$0xff pattern:$0x73625140] }
 0x110   :  { %348 = vst [vmem:[#allocation1 + $0x20] ss:$4 sm:$0xff] %v2672_v38 }
 0x115   :  { %v2736_v63 = vld.sshfl [vmem:[#allocation1 + $0x8] sm:$0xff pattern:$0x73625140] }
 0x116   :  { %4076 = vst [vmem:[#allocation34_spill] sm:$0xff] %v2736_v63  ;;  %v3201_v63 = vld [vmem:[%s4030_s12 + $0x58] sm:$0xff] }
 0x117   :  { %v2738_v0 = vld.sshfl [vmem:[#allocation1 + $0x28] sm:$0xff pattern:$0x73625140]  ;;  %350 = vst [vmem:[#allocation1] ss:$4 sm:$0xff] %v2680_v42 }
 0x118   :  { %4077 = vst [vmem:[#allocation35_spill] sm:$0xff] %v2738_v0  ;;  %v3107_v0 = vld [vmem:[%s4030_s12 + $0x148] sm:$0xff] }
 0x119   :  { %352 = vst [vmem:[#allocation1 + $0x20] ss:$4 sm:$0xff] %v2682_v43 }
 0x11e   :  { %v2742_v1 = vld.sshfl [vmem:[#allocation1 + $0x8] sm:$0xff pattern:$0x73625140] }
 0x11f   :  { %4078 = vst [vmem:[#allocation36_spill] sm:$0xff] %v2742_v1  ;;  %v4047_v1 = vmov 0.0  }
 0x120   :  { %v2744_v2 = vld.sshfl [vmem:[#allocation1 + $0x28] sm:$0xff pattern:$0x73625140]  ;;  %354 = vst [vmem:[#allocation1] ss:$4 sm:$0xff] %v2691_v47 }
 0x121   :  { %4079 = vst [vmem:[#allocation37_spill] sm:$0xff] %v2744_v2 }
 0x122   :  { %356 = vst [vmem:[#allocation1 + $0x20] ss:$4 sm:$0xff] %v2696_v49 }
 0x127   :  { %v2748_v3 = vld.sshfl [vmem:[#allocation1 + $0x8] sm:$0xff pattern:$0x73625140] }
 0x128   :  { %4080 = vst [vmem:[#allocation38_spill] sm:$0xff] %v2748_v3  ;;  %v2933_v3 = vld [vmem:[%s4030_s12 + $0x108] sm:$0xff] }
 0x129   :  { %v2750_v4 = vld.sshfl [vmem:[#allocation1 + $0x28] sm:$0xff pattern:$0x73625140]  ;;  %382 = vst [vmem:[#allocation1] ss:$4 sm:$0xff] %v2696_v49 }
 0x12a   :  { %4081 = vst [vmem:[#allocation39_spill] sm:$0xff] %v2750_v4  ;;  %v2915_v4 = vld [vmem:[%s4030_s12 + $0x120] sm:$0xff] }
 0x12b   :  { %385 = vst [vmem:[#allocation1 + $0x20] ss:$4 sm:$0xff] %v2691_v47 }
 0x130   :  { %v2754_v5 = vld.sshfl [vmem:[#allocation1] sm:$0xff pattern:$0x73625140] }
 0x131   :  { %387 = vst [vmem:[#allocation1] ss:$4 sm:$0xff] %v2682_v43 }
 0x132   :  { %v2756_v6 = vld.sshfl [vmem:[#allocation1 + $0x20] sm:$0xff pattern:$0x73625140] }
 0x133   :  { %389 = vst [vmem:[#allocation1 + $0x20] ss:$4 sm:$0xff] %v2680_v42 }
 0x138   :  { %v2760_v7 = vld.sshfl [vmem:[#allocation1] sm:$0xff pattern:$0x73625140] }
 0x139   :  { %4082 = vst [vmem:[#allocation40_spill] sm:$0xff] %v2760_v7  ;;  %v3179_v7 = vld [vmem:[%s4030_s12 + $0x88] sm:$0xff] }
 0x13a   :  { %v2762_v8 = vld.sshfl [vmem:[#allocation1 + $0x20] sm:$0xff pattern:$0x73625140]  ;;  %391 = vst [vmem:[#allocation1] ss:$4 sm:$0xff] %v2672_v38 }
 0x13b   :  { %4083 = vst [vmem:[#allocation41_spill] sm:$0xff] %v2762_v8  ;;  %v3097_v8 = vld [vmem:[%s4030_s12 + $0x160] sm:$0xff] }
 0x13c   :  { %393 = vst [vmem:[#allocation1 + $0x20] ss:$4 sm:$0xff] %v2667_v34 }
 0x141   :  { %v2766_v9 = vld.sshfl [vmem:[#allocation1] sm:$0xff pattern:$0x73625140] }
 0x142   :  { %4084 = vst [vmem:[#allocation42_spill] sm:$0xff] %v2766_v9  ;;  %v3047_v9 = vld [vmem:[%s4030_s12 + $0x90] sm:$0xff] }
 0x143   :  { %v2768_v10 = vld.sshfl [vmem:[#allocation1 + $0x20] sm:$0xff pattern:$0x73625140]  ;;  %395 = vst [vmem:[#allocation1] ss:$4 sm:$0xff] %v2660_v30 }
 0x144   :  { %4085 = vst [vmem:[#allocation43_spill] sm:$0xff] %v2768_v10  ;;  %v3026_v10 = vld [vmem:[%s4030_s12 + $0x20] sm:$0xff] }
 0x145   :  { %397 = vst [vmem:[#allocation1 + $0x20] ss:$4 sm:$0xff] %v2662_v31 }
 0x14a   :  { %v2772_v11 = vld.sshfl [vmem:[#allocation1] sm:$0xff pattern:$0x73625140] }
 0x14b   :  { %4086 = vst [vmem:[#allocation44_spill] sm:$0xff] %v2772_v11  ;;  %v3004_v11 = vld [vmem:[%s4030_s12 + $0x50] sm:$0xff] }
 0x14c   :  { %v2774_v12 = vld.sshfl [vmem:[#allocation1 + $0x20] sm:$0xff pattern:$0x73625140]  ;;  %423 = vst [vmem:[#allocation1] ss:$4 sm:$0xff] %v2662_v31  ;;  %v2910_v31 = vld [vmem:[%s4030_s12 + $0x110] sm:$0xff] }
 0x14d   :  { %4087 = vst [vmem:[#allocation45_spill] sm:$0xff] %v2774_v12 }
 0x14e   :  { %426 = vst [vmem:[#allocation1 + $0x20] ss:$4 sm:$0xff] %v2660_v30  ;;  %v2928_v30 = vld [vmem:[%s4030_s12 + $0xf8] sm:$0xff] }
 0x153   :  { %v2778_v20 = vld.sshfl [vmem:[#allocation1 + $0x8] sm:$0xff pattern:$0x73625140] }
 0x154   :  { %4088 = vst [vmem:[#allocation46_spill] sm:$0xff] %v2778_v20 }
 0x155   :  { %v2780_v21 = vld.sshfl [vmem:[#allocation1 + $0x28] sm:$0xff pattern:$0x73625140]  ;;  %428 = vst [vmem:[#allocation1] ss:$4 sm:$0xff] %v2667_v34 }
 0x156   :  { %4089 = vst [vmem:[#allocation47_spill] sm:$0xff] %v2780_v21  ;;  %v3152_v21 = vld [vmem:[%s4030_s12 + $0xd0] sm:$0xff] }
 0x157   :  { %430 = vst [vmem:[#allocation1 + $0x20] ss:$4 sm:$0xff] %v2672_v38  ;;  %v2982_v38 = vld [vmem:[%s4030_s12 + $0x68] sm:$0xff] }
 0x15c   :  { %v2784_v23 = vld.sshfl [vmem:[#allocation1 + $0x8] sm:$0xff pattern:$0x73625140] }
 0x15d   :  { %4090 = vst [vmem:[#allocation48_spill] sm:$0xff] %v2784_v23  ;;  %v3084_v23 = vld [vmem:[%s4030_s12 + $0x178] sm:$0xff] }
 0x15e   :  { %v2786_v24 = vld.sshfl [vmem:[#allocation1 + $0x28] sm:$0xff pattern:$0x73625140]  ;;  %432 = vst [vmem:[#allocation1] ss:$4 sm:$0xff] %v2680_v42  ;;  %v3063_v42 = vld [vmem:[%s4030_s12 + $0x60] sm:$0xff]  ;;  %837 = vmatpush.msrb.mxu2 %v3084_v23 }
 0x15f   :  { %4091 = vst [vmem:[#allocation49_spill] sm:$0xff] %v2786_v24  ;;  %v3039_v24 = vld [vmem:[%s4030_s12 + $0x8] sm:$0xff] }
 0x160   :  { %434 = vst [vmem:[#allocation1 + $0x20] ss:$4 sm:$0xff] %v2682_v43  ;;  %838 = vmatpush.msrb.mxu2 %v3097_v8  ;;  %v3134_v43 = vld [vmem:[%s4030_s12 + $0x100] sm:$0xff] }
 0x162   :  { %839 = vmatpush.msrb.mxu2 %v3107_v0 }
 0x164   :  { %840 = vmatpush.msrb.mxu2 %v3116_v45 }
 0x165   :  { %v2790_v25 = vld.sshfl [vmem:[#allocation1 + $0x8] sm:$0xff pattern:$0x73625140] }
 0x166   :  { %4092 = vst [vmem:[#allocation50_spill] sm:$0xff] %v2790_v25  ;;  %v2976_v25 = vld [vmem:[%s4030_s12 + $0x80] sm:$0xff] }
 0x167   :  { %v2792_v26 = vld.sshfl [vmem:[#allocation1 + $0x28] sm:$0xff pattern:$0x73625140]  ;;  %436 = vst [vmem:[#allocation1] ss:$4 sm:$0xff] %v2691_v47 }
 0x168   :  { %4093 = vst [vmem:[#allocation51_spill] sm:$0xff] %v2792_v26  ;;  %v2956_v26 = vld [vmem:[%s4030_s12 + $0xb0] sm:$0xff] }
 0x169   :  { %438 = vst [vmem:[#allocation1 + $0x20] ss:$4 sm:$0xff] %v2696_v49 }
 0x16e   :  { %v2802_v29 = vld.sshfl [vmem:[#allocation1 + $0x8] sm:$0xff pattern:$0x73625140] }
 0x16f   :  { %4095 = vst [vmem:[#allocation52_spill] sm:$0xff] %v2802_v29 }
 0x170   :  { %504 = vst [vmem:[#allocation1] ss:$4 sm:$0xff] %v482_v27  ;;  %v2821_v19 = vld.sshfl [vmem:[#allocation1 + $0x28] sm:$0xff pattern:$0x73625140] }
 0x171   :  { %506 = vst [vmem:[#allocation1 + $0x1] ss:$4 sm:$0xff] %v483_v28 }
 0x172   :  { %508 = vst [vmem:[#allocation1 + $0x2] ss:$4 sm:$0xff] %v484_v32 }
 0x173   :  { %510 = vst [vmem:[#allocation1 + $0x3] ss:$4 sm:$0xff] %v485_v33 }
 0x174   :  { %4098 = vst [vmem:[#allocation55_spill] sm:$0xff] %v2821_v19  ;;  %v2902_v19 = vld [vmem:[%s4030_s12 + $0x138] sm:$0xff] }
 0x17a   :  { %v511_v35 = vld.sshfl [vmem:[#allocation1] sm:$0xff pattern:$0x73625140] }
 0x17b   :  { %2194 = vmatmul.msk.f32.vlgmr.msra.gmra.mxu3 %vm176_vm0, %v511_v35  ;;  %2193 = vmatmul.msk.f32.vlgmr.msra.gmra.mxu2 %vm176_vm0, %v511_v35 }
 0x1fe   :  { %v551_v46 = vpop.f32.mrf.mxu3  ;;  %v531_v53 = vpop.f32.mrf.mxu2 }
 0x1ff   :  { %v552_v61 = vadd.f32 %v551_v46, %v497_v40  ;;  %v532_v13 = vadd.f32 %v531_v53, %v496_v41 }
 0x201   :  { %v556_v14 = vrot.slane %v552_v61, 6 }
 0x203   :  { %v560_v15 = vsel %vm238_vm1, %v532_v13, %v556_v14  ;;  %v562_v16 = vsel %vm241_vm2, %v556_v14, %v532_v13  ;;  %v558_v22 = vsel %vm235_vm3, %v532_v13, %v556_v14  ;;  %v2827_v27 = vsel %vm233_vm4, %v532_v13, %v556_v14 }
 0x204   :  { %v2817_v17 = vrot.slane %v560_v15, 4  ;;  %v2819_v18 = vrot.slane %v562_v16, 6  ;;  %v2829_v28 = vrot.slane %v558_v22, 2  ;;  %v2869_v16 = vld [vmem:[%s4030_s12 + $0x170] sm:$0xff]  ;;  %v2874_v22 = vld [vmem:[%s4030_s12 + $0x158] sm:$0xff] }
 0x205   :  { %817 = vmatpush.msrb.mxu1 %v2869_v16 }
 0x206   :  { %4096 = vst [vmem:[#allocation53_spill] sm:$0xff] %v2817_v17 }
 0x207   :  { %4097 = vst [vmem:[#allocation54_spill] sm:$0xff] %v2819_v18  ;;  %818 = vmatpush.msrb.mxu1 %v2874_v22 }
 0x208   :  { %571 = vst [vmem:[#allocation1 + $0x20] ss:$4 sm:$0xff] %v2817_v17 }
 0x209   :  { %568 = vst [vmem:[#allocation1] ss:$4 sm:$0xff] %v2819_v18 }
 0x20f   :  { %v2831_v32 = vld.sshfl [vmem:[#allocation1 + $0x20] sm:$0xff pattern:$0x73625140] }
 0x210   :  { %575 = vst [vmem:[#allocation1 + $0x20] ss:$4 sm:$0xff] %v2827_v27  ;;  %v569_v33 = vld.sshfl [vmem:[#allocation1] sm:$0xff pattern:$0x73625140] }
 0x211   :  { %577 = vrot.lane.b32.xlu0 %v569_v33, %s2483_s9  ;;  %573 = vst [vmem:[#allocation1] ss:$4 sm:$0xff] %v2829_v28  ;;  %v2880_v33 = vld [vmem:[%s4030_s12 + $0x140] sm:$0xff] }
 0x212   :  { %819 = vmatpush.msrb.mxu1 %v2880_v33 }
 0x217   :  { %v2836_v35 = vld.sshfl [vmem:[#allocation1 + $0x20] sm:$0xff pattern:$0x73625140] }
 0x218   :  { %4099 = vst [vmem:[#allocation56_spill] sm:$0xff] %v2836_v35  ;;  %v2839_v36 = vld.sshfl [vmem:[#allocation1] sm:$0xff pattern:$0x73625140]  ;;  %v3126_v35 = vld [vmem:[%s4030_s12 + $0x118] sm:$0xff] }
 0x219   :  { %592 = vst [vmem:[#allocation1 + $0x20] ss:$4 sm:$0xff] %v2829_v28  ;;  %841 = vmatpush.msrb.mxu2 %v3126_v35 }
 0x21a   :  { %4100 = vst [vmem:[#allocation57_spill] sm:$0xff] %v2839_v36  ;;  %v3224_v36 = vld [vmem:[%s4030_s12 + $0x10] sm:$0xff] }
 0x21b   :  { %589 = vst [vmem:[#allocation1] ss:$4 sm:$0xff] %v2827_v27  ;;  %842 = vmatpush.msrb.mxu2 %v3134_v43 }
 0x220   :  { %v2842_v40 = vld.sshfl [vmem:[#allocation1 + $0x20] sm:$0xff pattern:$0x73625140] }
 0x221   :  { %596 = vst [vmem:[#allocation1 + $0x20] ss:$4 sm:$0xff] %v2819_v18 }
 0x222   :  { %v590_v41 = vld.sshfl [vmem:[#allocation1] sm:$0xff pattern:$0x73625140] }
 0x223   :  { %598 = vrot.lane.b32.xlu0 %v590_v41, %s2481_s5  ;;  %594 = vst [vmem:[#allocation1] ss:$4 sm:$0xff] %v2817_v17  ;;  %v2892_v41 = vld [vmem:[%s4030_s12 + $0x150] sm:$0xff] }
 0x228   :  { %v2847_v46 = vld.sshfl [vmem:[#allocation1 + $0x20] sm:$0xff pattern:$0x73625140] }
 0x229   :  { %4101 = vst [vmem:[#allocation58_spill] sm:$0xff] %v2847_v46  ;;  %v3174_v46 = vld [vmem:[%s4030_s12 + $0xa0] sm:$0xff] }
 0x22a   :  { %v2849_v53 = vld.sshfl [vmem:[#allocation1] sm:$0xff pattern:$0x73625140]  ;;  %613 = vst [vmem:[#allocation1 + $0x20] ss:$4 sm:$0xff] %v2817_v17 }
 0x22b   :  { %610 = vst [vmem:[#allocation1] ss:$4 sm:$0xff] %v2819_v18 }
 0x231   :  { %v2853_v61 = vld.sshfl [vmem:[#allocation1 + $0x28] sm:$0xff pattern:$0x73625140] }
 0x232   :  { %v611_v13 = vld.sshfl [vmem:[#allocation1 + $0x8] sm:$0xff pattern:$0x73625140]  ;;  %617 = vst [vmem:[#allocation1 + $0x20] ss:$4 sm:$0xff] %v2827_v27 }
 0x233   :  { %619 = vrot.lane.b32.xlu1 %v611_v13, %s2482_s8  ;;  %615 = vst [vmem:[#allocation1] ss:$4 sm:$0xff] %v2829_v28  ;;  %v2897_v13 = vld [vmem:[%s4030_s12 + $0x128] sm:$0xff] }
 0x234   :  { %820 = vmatpush.msrb.mxu1 %v2897_v13 }
 0x236   :  { %821 = vmatpush.msrb.mxu1 %v2910_v31 }
 0x238   :  { %822 = vmatpush.msrb.mxu1 %v2928_v30 }
 0x239   :  { %v2858_v14 = vld.sshfl [vmem:[#allocation1 + $0x28] sm:$0xff pattern:$0x73625140] }
 0x23a   :  { %4102 = vst [vmem:[#allocation59_spill] sm:$0xff] %v2858_v14  ;;  %v2860_v15 = vld.sshfl [vmem:[#allocation1 + $0x8] sm:$0xff pattern:$0x73625140]  ;;  %v4106_v14 = vmov 0.0  }
 0x23b   :  { %4103 = vst [vmem:[#allocation60_spill] sm:$0xff] %v2860_v15  ;;  %276 = vrot.lane.b32.xlu1 %v2669_v37, %s2483_s9  ;;  %v2885_v37 = vld [vmem:[%s4030_s12 + $0x168] sm:$0xff] }
 0x23c   :  { %634 = vst [vmem:[#allocation1 + $0x20] ss:$4 sm:$0xff] %v2829_v28  ;;  %797 = vmatpush.msrb.mxu0 %v2885_v37  ;;  %911 = vmatpush.msrb.mxu3 %v2885_v37  ;;  %v3219_v15 = vld [vmem:[%s4030_s12 + $0x28] sm:$0xff] }
 0x23d   :  { %631 = vst [vmem:[#allocation1] ss:$4 sm:$0xff] %v2827_v27 }
 0x23e   :  { %798 = vmatpush.msrb.mxu0 %v2892_v41  ;;  %912 = vmatpush.msrb.mxu3 %v2892_v41 }
 0x240   :  { %799 = vmatpush.msrb.mxu0 %v2902_v19  ;;  %913 = vmatpush.msrb.mxu3 %v2902_v19 }
 0x242   :  { %800 = vmatpush.msrb.mxu0 %v2915_v4  ;;  %914 = vmatpush.msrb.mxu3 %v2915_v4 }
 0x243   :  { %v2917_v60 = vld.sshfl [vmem:[#allocation1 + $0x20] sm:$0xff pattern:$0x73625140] }
 0x244   :  { %v632_v29 = vld.sshfl [vmem:[#allocation1] sm:$0xff pattern:$0x73625140]  ;;  %638 = vst [vmem:[#allocation1 + $0x20] ss:$4 sm:$0xff] %v2819_v18  ;;  %801 = vmatpush.msrb.mxu0 %v2933_v3  ;;  %915 = vmatpush.msrb.mxu3 %v2933_v3 }
 0x245   :  { %640 = vrot.lane.b32.xlu0 %v632_v29, %s2483_s9  ;;  %636 = vst [vmem:[#allocation1] ss:$4 sm:$0xff] %v2817_v17  ;;  %v2941_v29 = vld [vmem:[%s4030_s12 + $0xe0] sm:$0xff] }
 0x246   :  { %823 = vmatpush.msrb.mxu1 %v2941_v29  ;;  %802 = vmatpush.msrb.mxu0 %v2999_v52 }
 0x247   :  { %916 = vmatpush.msrb.mxu3 %v2999_v52 }
 0x248   :  { %824 = vmatpush.msrb.mxu1 %v2949_v59 }
 0x24a   :  { %825 = vmatpush.msrb.mxu1 %v2956_v26 }
 0x24b   :  { %v2958_v34 = vld.sshfl [vmem:[#allocation1 + $0x20] sm:$0xff pattern:$0x73625140] }
 0x24c   :  { %4104 = vst [vmem:[#allocation61_spill] sm:$0xff] %v2958_v34  ;;  %v2960_v2 = vld.sshfl [vmem:[#allocation1] sm:$0xff pattern:$0x73625140]  ;;  %826 = vmatpush.msrb.mxu1 %v2970_v58 }
 0x24d   :  { %4105 = vst [vmem:[#allocation62_spill] sm:$0xff] %v2960_v2  ;;  %399 = vrot.lane.b32.xlu0 %v2754_v5, %s2483_s9  ;;  %v3102_v34 = vld [vmem:[%s4030_s12] sm:$0xff]  ;;  %v3188_v2 = vld [vmem:[%s4030_s12 + $0x70] sm:$0xff] }
 0x24e   :  { %655 = vst [vmem:[#allocation1 + $0x20] ss:$4 sm:$0xff] %v2817_v17  ;;  %827 = vmatpush.msrb.mxu1 %v2976_v25  ;;  %v3143_v17 = vld [vmem:[%s4030_s12 + $0xe8] sm:$0xff] }
 0x24f   :  { %652 = vst [vmem:[#allocation1] ss:$4 sm:$0xff] %v2819_v18  ;;  %v3079_v18 = vld [vmem:[%s4030_s12 + $0x30] sm:$0xff]  ;;  %843 = vmatpush.msrb.mxu2 %v3143_v17 }
 0x250   :  { %828 = vmatpush.msrb.mxu1 %v2982_v38 }
 0x251   :  { %844 = vmatpush.msrb.mxu2 %v3152_v21 }
 0x252   :  { %829 = vmatpush.msrb.mxu1 %v3004_v11 }
 0x253   :  { %845 = vmatpush.msrb.mxu2 %v3165_v56 }
 0x255   :  { %v2985_v5 = vld.sshfl [vmem:[#allocation1 + $0x28] sm:$0xff pattern:$0x73625140]  ;;  %600 = vrot.lane.b32.xlu0 %v2842_v40, %s2481_s5  ;;  %v3011_v40 = vld [vmem:[%s4030_s12 + $0xd8] sm:$0xff]  ;;  %846 = vmatpush.msrb.mxu2 %v3174_v46 }
 0x256   :  { %v2988_v12 = vld.sshfl [vmem:[#allocation1 + $0x8] sm:$0xff pattern:$0x73625140]  ;;  %659 = vst [vmem:[#allocation1 + $0x20] ss:$4 sm:$0xff] %v2827_v27  ;;  %803 = vmatpush.msrb.mxu0 %v3011_v40  ;;  %917 = vmatpush.msrb.mxu3 %v3011_v40 }
 0x257   :  { %657 = vst [vmem:[#allocation1] ss:$4 sm:$0xff] %v2829_v28  ;;  %847 = vmatpush.msrb.mxu2 %v3179_v7 }
 0x258   :  { %804 = vmatpush.msrb.mxu0 %v3021_v51  ;;  %918 = vmatpush.msrb.mxu3 %v3021_v51 }
 0x259   :  { %848 = vmatpush.msrb.mxu2 %v3188_v2 }
 0x25a   :  { %805 = vmatpush.msrb.mxu0 %v3034_v50  ;;  %919 = vmatpush.msrb.mxu3 %v3034_v50 }
 0x25b   :  { %849 = vmatpush.msrb.mxu2 %v3201_v63 }
 0x25c   :  { %806 = vmatpush.msrb.mxu0 %v3047_v9  ;;  %920 = vmatpush.msrb.mxu3 %v3047_v9 }
 0x25d   :  { %319 = vrot.lane.b32.xlu0 %v2708_v54, %s2481_s5  ;;  %v3016_v54 = vld [vmem:[%s4030_s12 + $0x38] sm:$0xff]  ;;  %850 = vmatpush.msrb.mxu2 %v3209_v44 }
 0x25e   :  { %830 = vmatpush.msrb.mxu1 %v3016_v54  ;;  %807 = vmatpush.msrb.mxu0 %v3056_v48 }
 0x25f   :  { %921 = vmatpush.msrb.mxu3 %v3056_v48  ;;  %851 = vmatpush.msrb.mxu2 %v3219_v15 }
 0x260   :  { %831 = vmatpush.msrb.mxu1 %v3026_v10  ;;  %808 = vmatpush.msrb.mxu0 %v3063_v42 }
 0x261   :  { %922 = vmatpush.msrb.mxu3 %v3063_v42  ;;  %852 = vmatpush.msrb.mxu2 %v3224_v36 }
 0x262   :  { %832 = vmatpush.msrb.mxu1 %v3039_v24  ;;  %853 = vmatmul.f32.vlgmr.msrb.gmra.mxu2 %v4106_v14 }
 0x263   :  { %833 = vmatmul.f32.vlgmr.msrb.gmra.mxu1 %v4047_v1  ;;  %v3070_v1 = vld [vmem:[%s4030_s12 + $0x48] sm:$0xff]  ;;  %1026 = vmatpush.msra.mxu2 %v2885_v37 }
 0x264   :  { %809 = vmatpush.msrb.mxu0 %v3070_v1  ;;  %923 = vmatpush.msrb.mxu3 %v3070_v1 }
 0x265   :  { %951 = vmatpush.msra.mxu1 %v3084_v23  ;;  %1027 = vmatpush.msra.mxu2 %v2892_v41 }
 0x266   :  { %810 = vmatpush.msrb.mxu0 %v3079_v18  ;;  %924 = vmatpush.msrb.mxu3 %v3079_v18 }
 0x267   :  { %952 = vmatpush.msra.mxu1 %v3097_v8  ;;  %1028 = vmatpush.msra.mxu2 %v2902_v19 }
 0x268   :  { %811 = vmatpush.msrb.mxu0 %v3092_v57  ;;  %925 = vmatpush.msrb.mxu3 %v3092_v57 }
 0x269   :  { %953 = vmatpush.msra.mxu1 %v3107_v0  ;;  %1029 = vmatpush.msra.mxu2 %v2915_v4 }
 0x26a   :  { %812 = vmatpush.msrb.mxu0 %v3102_v34  ;;  %926 = vmatpush.msrb.mxu3 %v3102_v34 }
 0x26b   :  { %813 = vmatmul.f32.vlgmr.msrb.gmra.mxu0 %v4106_v14  ;;  %954 = vmatpush.msra.mxu1 %v3116_v45 }
 0x26c   :  { %931 = vmatpush.msra.mxu0 %v2869_v16  ;;  %1046 = vmatpush.msra.mxu3 %v2869_v16 }
 0x26d   :  { %955 = vmatpush.msra.mxu1 %v3126_v35  ;;  %1030 = vmatpush.msra.mxu2 %v2933_v3 }
 0x26e   :  { %932 = vmatpush.msra.mxu0 %v2874_v22  ;;  %1047 = vmatpush.msra.mxu3 %v2874_v22 }
 0x26f   :  { %956 = vmatpush.msra.mxu1 %v3134_v43  ;;  %1031 = vmatpush.msra.mxu2 %v2999_v52 }
 0x270   :  { %933 = vmatpush.msra.mxu0 %v2880_v33  ;;  %1048 = vmatpush.msra.mxu3 %v2880_v33 }
 0x271   :  { %957 = vmatpush.msra.mxu1 %v3143_v17  ;;  %1032 = vmatpush.msra.mxu2 %v3011_v40 }
 0x272   :  { %934 = vmatpush.msra.mxu0 %v2897_v13  ;;  %1049 = vmatpush.msra.mxu3 %v2897_v13 }
 0x273   :  { %958 = vmatpush.msra.mxu1 %v3152_v21  ;;  %1033 = vmatpush.msra.mxu2 %v3021_v51 }
 0x274   :  { %935 = vmatpush.msra.mxu0 %v2910_v31  ;;  %1050 = vmatpush.msra.mxu3 %v2910_v31 }
 0x275   :  { %959 = vmatpush.msra.mxu1 %v3165_v56  ;;  %1034 = vmatpush.msra.mxu2 %v3034_v50 }
 0x276   :  { %936 = vmatpush.msra.mxu0 %v2928_v30  ;;  %1051 = vmatpush.msra.mxu3 %v2928_v30 }
 0x277   :  { %960 = vmatpush.msra.mxu1 %v3174_v46  ;;  %1035 = vmatpush.msra.mxu2 %v3047_v9 }
 0x278   :  { %937 = vmatpush.msra.mxu0 %v2941_v29  ;;  %1052 = vmatpush.msra.mxu3 %v2941_v29 }
 0x279   :  { %961 = vmatpush.msra.mxu1 %v3179_v7  ;;  %1036 = vmatpush.msra.mxu2 %v3056_v48 }
 0x27a   :  { %938 = vmatpush.msra.mxu0 %v2949_v59  ;;  %1053 = vmatpush.msra.mxu3 %v2949_v59 }
 0x27b   :  { %962 = vmatpush.msra.mxu1 %v3188_v2  ;;  %1037 = vmatpush.msra.mxu2 %v3063_v42 }
 0x27c   :  { %939 = vmatpush.msra.mxu0 %v2956_v26  ;;  %1054 = vmatpush.msra.mxu3 %v2956_v26 }
 0x27d   :  { %963 = vmatpush.msra.mxu1 %v3201_v63  ;;  %1038 = vmatpush.msra.mxu2 %v3070_v1 }
 0x27e   :  { %940 = vmatpush.msra.mxu0 %v2970_v58  ;;  %1055 = vmatpush.msra.mxu3 %v2970_v58 }
 0x27f   :  { %964 = vmatpush.msra.mxu1 %v3209_v44  ;;  %1039 = vmatpush.msra.mxu2 %v3079_v18 }
 0x280   :  { %941 = vmatpush.msra.mxu0 %v2976_v25  ;;  %1056 = vmatpush.msra.mxu3 %v2976_v25 }
 0x281   :  { %965 = vmatpush.msra.mxu1 %v3219_v15  ;;  %1040 = vmatpush.msra.mxu2 %v3092_v57 }
 0x282   :  { %942 = vmatpush.msra.mxu0 %v2982_v38  ;;  %1057 = vmatpush.msra.mxu3 %v2982_v38 }
 0x283   :  { %966 = vmatpush.msra.mxu1 %v3224_v36  ;;  %v578_v20 = vpop.permute.xlu0 %577  ;;  %1041 = vmatpush.msra.mxu2 %v3102_v34 }
 0x284   :  { %943 = vmatpush.msra.mxu0 %v3004_v11  ;;  %1058 = vmatpush.msra.mxu3 %v3004_v11 }
 0x285   :  { %1141 = vmatpush.msrb.mxu1 %v2885_v37  ;;  %1161 = vmatpush.msrb.mxu2 %v2869_v16 }
 0x286   :  { %944 = vmatpush.msra.mxu0 %v3016_v54  ;;  %1059 = vmatpush.msra.mxu3 %v3016_v54 }
 0x287   :  { %1142 = vmatpush.msrb.mxu1 %v2892_v41  ;;  %1162 = vmatpush.msrb.mxu2 %v2874_v22 }
 0x288   :  { %945 = vmatpush.msra.mxu0 %v3026_v10  ;;  %1060 = vmatpush.msra.mxu3 %v3026_v10 }
 0x289   :  { %1143 = vmatpush.msrb.mxu1 %v2902_v19  ;;  %1163 = vmatpush.msrb.mxu2 %v2880_v33 }
 0x28a   :  { %946 = vmatpush.msra.mxu0 %v3039_v24  ;;  %1061 = vmatpush.msra.mxu3 %v3039_v24 }
 0x28b   :  { %1144 = vmatpush.msrb.mxu1 %v2915_v4  ;;  %v665_v4 = vsel %vm176_vm0, %v2827_v27, %v578_v20  ;;  %1164 = vmatpush.msrb.mxu2 %v2897_v13 }
 0x28c   :  { %1066 = vmatpush.msrb.mxu0 %v3084_v23 }
 0x28d   :  { %1145 = vmatpush.msrb.mxu1 %v2933_v3  ;;  %1165 = vmatpush.msrb.mxu2 %v2910_v31 }
 0x28e   :  { %1067 = vmatpush.msrb.mxu0 %v3097_v8 }
 0x28f   :  { %1146 = vmatpush.msrb.mxu1 %v2999_v52  ;;  %v318_v52 = vpop.permute.xlu2 %317  ;;  %1166 = vmatpush.msrb.mxu2 %v2928_v30  ;;  %v789_v30 = vld [vmem:[%s4031_s13] sm:$0x7] }
 0x290   :  { %1068 = vmatpush.msrb.mxu0 %v3107_v0  ;;  %v3343_v31 = vperm.slane %v789_v30, 1 }
 0x291   :  { %1147 = vmatpush.msrb.mxu1 %v3011_v40  ;;  %1167 = vmatpush.msrb.mxu2 %v2941_v29 }
 0x292   :  { %1069 = vmatpush.msrb.mxu0 %v3116_v45 }
 0x293   :  { %1148 = vmatpush.msrb.mxu1 %v3021_v51  ;;  %1168 = vmatpush.msrb.mxu2 %v2949_v59  ;;  %v3348_v59 = vperm.slane %v789_v30, 0 }
 0x294   :  { %1070 = vmatpush.msrb.mxu0 %v3126_v35 }
 0x295   :  { %v599_v19 = vpop.permute.xlu0 %598  ;;  %1149 = vmatpush.msrb.mxu1 %v3034_v50  ;;  %1169 = vmatpush.msrb.mxu2 %v2956_v26 }
 0x296   :  { %v669_v3 = vsel %vm456_vm5, %v665_v4, %v599_v19  ;;  %1071 = vmatpush.msrb.mxu0 %v3134_v43 }
 0x297   :  { %1150 = vmatpush.msrb.mxu1 %v3047_v9  ;;  %v359_v50 = vpop.permute.xlu2 %358  ;;  %1170 = vmatpush.msrb.mxu2 %v2970_v58 }
 0x298   :  { %1072 = vmatpush.msrb.mxu0 %v3143_v17 }
 0x299   :  { %1151 = vmatpush.msrb.mxu1 %v3056_v48  ;;  %1171 = vmatpush.msrb.mxu2 %v2976_v25 }
 0x29a   :  { %1073 = vmatpush.msrb.mxu0 %v3152_v21 }
 0x29b   :  { %1152 = vmatpush.msrb.mxu1 %v3063_v42  ;;  %1172 = vmatpush.msrb.mxu2 %v2982_v38 }
 0x29c   :  { %1074 = vmatpush.msrb.mxu0 %v3165_v56 }
 0x29d   :  { %1153 = vmatpush.msrb.mxu1 %v3070_v1  ;;  %1173 = vmatpush.msrb.mxu2 %v3004_v11 }
 0x29e   :  { %1075 = vmatpush.msrb.mxu0 %v3174_v46 }
 0x29f   :  { %1154 = vmatpush.msrb.mxu1 %v3079_v18  ;;  %1174 = vmatpush.msrb.mxu2 %v3016_v54 }
 0x2a0   :  { %1076 = vmatpush.msrb.mxu0 %v3179_v7 }
 0x2a1   :  { %1155 = vmatpush.msrb.mxu1 %v3092_v57  ;;  %1175 = vmatpush.msrb.mxu2 %v3026_v10 }
 0x2a2   :  { %1077 = vmatpush.msrb.mxu0 %v3188_v2 }
 0x2a3   :  { %1156 = vmatpush.msrb.mxu1 %v3102_v34  ;;  %1176 = vmatpush.msrb.mxu2 %v3039_v24 }
 0x2a4   :  { %1078 = vmatpush.msrb.mxu0 %v3201_v63 }
 0x2a5   :  { %v620_v14 = vpop.permute.xlu1 %619 }
 0x2a6   :  { %v3269_v37 = vsel %vm465_vm6, %v669_v3, %v620_v14  ;;  %1079 = vmatpush.msrb.mxu0 %v3209_v44  ;;  %v3360_v14 = vperm.slane %v789_v30, 2 }
 0x2a7   :  { %685 = vrot.lane.b32.xlu1 %v3269_v37, %s2483_s9 }
 0x2a8   :  { %1080 = vmatpush.msrb.mxu0 %v3219_v15 }
 0x2aa   :  { %1081 = vmatpush.msrb.mxu0 %v3224_v36 }
 0x2ad   :  { %v277_v51 = vpop.permute.xlu1 %276 }
 0x2ae   :  { %v448_v20 = vsel %vm176_vm0, %v2696_v49, %v277_v51 }
 0x2af   :  { %v457_v27 = vsel %vm456_vm5, %v448_v20, %v318_v52 }
 0x2b0   :  { %v466_v9 = vsel %vm465_vm6, %v457_v27, %v359_v50 }
 0x2b1   :  { %701 = vrot.lane.b32.xlu2 %v466_v9, %s2483_s9 }
 0x2b7   :  { %v641_v42 = vpop.permute.xlu0 %640 }
 0x2b8   :  { %v677_v48 = vsel %vm176_vm0, %v641_v42, %v2988_v12 }
 0x2b9   :  { %717 = vrot.lane.b32.xlu1 %v677_v48, %s2483_s9  ;;  %579 = vrot.lane.b32.xlu2 %v2831_v32, %s2483_s9 }
 0x2bf   :  { %v400_v18 = vpop.permute.xlu0 %399 }
 0x2c1   :  { %621 = vrot.lane.b32.xlu1 %v2853_v61, %s2482_s8  ;;  %278 = vrot.lane.b32.xlu2 %v2674_v39, %s2483_s9 }
 0x2c7   :  { %v601_v33 = vpop.permute.xlu0 %600 }
 0x2c9   :  { %360 = vrot.lane.b32.xlu1 %v2731_v62, %s2482_s8  ;;  %642 = vrot.lane.b32.xlu2 %v2917_v60, %s2483_s9 }
 0x2d1   :  { %401 = vrot.lane.b32.xlu2 %v2756_v6, %s2483_s9 }
 0x2d9   :  { %602 = vrot.lane.b32.xlu2 %v2849_v53, %s2481_s5 }
 0x2e0   :  { %v834_v34 = vpop.f32.mrf.mxu1 }
 0x2e1   :  { %321 = vrot.lane.b32.xlu2 %v2713_v55, %s2481_s5  ;;  %v835_v38 = vadd.f32 %v834_v34, %v3343_v31  ;;  %v320_v34 = vpop.permute.xlu0 %319 }
 0x2e5   :  { %v854_v52 = vpop.f32.mrf.mxu2 }
 0x2e6   :  { %v855_v42 = vadd.f32 %v854_v52, %v3360_v14 }
 0x2e8   :  { %v814_v62 = vpop.f32.mrf.mxu0 }
 0x2e9   :  { %v815_v55 = vadd.f32 %v814_v62, %v3348_v59  ;;  %v4107_v62 = vld [vmem:[#allocation46_spill] sm:$0xff] }
 0x30b   :  { %v702_v39 = vpop.permute.xlu2 %701 }
 0x30c   :  { %v733_v49 = vsel %vm456_vm5, %v702_v39, %v3269_v37 }
 0x30d   :  { %v877_v57 = vadd.f32 %v835_v38, %v733_v49 }
 0x30f   :  { %v878_v58 = vsub.f32 0.0, %v877_v57 }
 0x311   :  { %v879_v60 = vmul.f32 1.442695, %v878_v58 }
 0x313   :  { %2225 = vpow2.f32 %v879_v60  ;;  %v580_v26 = vpop.permute.xlu2 %579 }
 0x314   :  { %v666_v13 = vsel %vm176_vm0, %v2829_v28, %v580_v26 }
 0x315   :  { %v670_v54 = vsel %vm456_vm5, %v666_v13, %v601_v33  ;;  %v4112_v13 = vld [vmem:[#allocation62_spill] sm:$0xff] }
 0x319   :  { %v686_v1 = vpop.permute.xlu1 %685  ;;  %v2226_v12 = vpop.eup %2225 }
 0x31a   :  { %v729_v6 = vsel %vm456_vm5, %v466_v9, %v686_v1  ;;  %v881_v25 = vadd.f32 1.0, %v2226_v12 }
 0x31b   :  { %v857_v10 = vadd.f32 %v815_v55, %v729_v6  ;;  %v279_v22 = vpop.permute.xlu2 %278  ;;  %v474_v55 = vsel %vm176_vm0, %v400_v18, %v4107_v62  ;;  %v4108_v18 = vld [vmem:[#allocation57_spill] sm:$0xff]  ;;  %v4121_v62 = vld [vmem:[#allocation24_spill] sm:$0xff] }
 0x31c   :  { %v449_v27 = vsel %vm176_vm0, %v2691_v47, %v279_v22  ;;  %v893_v1 = vand.u32 2147483648, %v881_v25  ;;  %vm887_vm12 = vweird.f32 %v881_v25 }
 0x31d   :  { %v858_v11 = vsub.f32 0.0, %v857_v10  ;;  %v458_v49 = vsel %vm456_vm5, %v449_v27, %v320_v34 }
 0x31e   :  { %v894_v26 = vor.u32 1.1754944e-38, %v893_v1 }
 0x31f   :  { %v859_v24 = vmul.f32 1.442695, %v858_v11  ;;  %v891_v11 = vand.u32 2147483647, %v881_v25 }
 0x321   :  { %2227 = vpow2.f32 %v859_v24  ;;  %vm892_vm14 = vcmp.eq.f32.partialorder %v891_v11, 8.507059e+37  ;;  %v4123_v11 = vld [vmem:[#allocation61_spill] sm:$0xff] }
 0x322   :  { %2229 = vrcp.f32 %v881_v25 }
 0x323   :  { %v643_v9 = vpop.permute.xlu2 %642 }
 0x324   :  { %v678_v47 = vsel %vm176_vm0, %v643_v9, %v2985_v5 }
 0x327   :  { %v2228_v32 = vpop.eup %2227 }
 0x328   :  { %v861_v53 = vadd.f32 1.0, %v2228_v32  ;;  %v2230_v16 = vpop.eup %2229  ;;  %v4109_v32 = vld [vmem:[#allocation60_spill] sm:$0xff] }
 0x329   :  { %v883_v41 = vmul.f32 %v2230_v16, %v881_v25  ;;  %vm888_vm11 = vweird.f32 %v2230_v16 }
 0x32a   :  { %2231 = vrcp.f32 %v861_v53  ;;  %v873_v51 = vand.u32 2147483648, %v861_v53  ;;  %v871_v28 = vand.u32 2147483647, %v861_v53  ;;  %vm867_vm8 = vweird.f32 %v861_v53  ;;  %vm889_vm13 = vmor %vm887_vm12, %vm888_vm11 }
 0x32b   :  { %v718_v61 = vpop.permute.xlu1 %717  ;;  %v884_v4 = vsub.f32 1.0, %v883_v41 }
 0x32c   :  { %v874_v38 = vor.u32 1.1754944e-38, %v873_v51  ;;  %vm872_vm10 = vcmp.eq.f32.partialorder %v871_v28, 8.507059e+37  ;;  %v737_v10 = vsel %vm456_vm5, %v474_v55, %v718_v61  ;;  %v4110_v61 = vld [vmem:[#allocation23_spill] sm:$0xff]  ;;  %v658_v28 = vld.sshfl [vmem:[#allocation1 + $0x8] sm:$0xff pattern:$0x73625140] }
 0x32d   :  { %v885_v50 = vmul.f32 %v2230_v16, %v884_v4 }
 0x32f   :  { %v886_v58 = vadd.f32 %v2230_v16, %v885_v50 }
 0x330   :  { %v2232_v29 = vpop.eup %2231 }
 0x331   :  { %v863_v19 = vmul.f32 %v2232_v29, %v861_v53  ;;  %vm868_vm7 = vweird.f32 %v2232_v29  ;;  %v890_v24 = vsel %vm889_vm13, %v2230_v16, %v886_v58  ;;  %v4111_v16 = vld [vmem:[#allocation34_spill] sm:$0xff]  ;;  %v4120_v58 = vld [vmem:[#allocation59_spill] sm:$0xff] }
 0x332   :  { %vm869_vm9 = vmor %vm867_vm8, %vm868_vm7  ;;  %v895_v5 = vsel %vm892_vm14, %v894_v26, %v890_v24  ;;  %v4124_v26 = vld [vmem:[#allocation41_spill] sm:$0xff] }
 0x333   :  { %v622_v40 = vpop.permute.xlu1 %621  ;;  %v864_v37 = vsub.f32 1.0, %v863_v19  ;;  %v900_v53 = vsub.f32 1.0, %v895_v5  ;;  %v902_v41 = vmul.f32 0.0, %v895_v5  ;;  %v4118_v19 = vld [vmem:[#allocation22_spill] sm:$0xff] }
 0x334   :  { %v3356_v3 = vsel %vm465_vm6, %v670_v54, %v622_v40 }
 0x335   :  { %687 = vrot.lane.b32.xlu0 %v3356_v3, %s2483_s9  ;;  %v865_v20 = vmul.f32 %v2232_v29, %v864_v37 }
 0x337   :  { %v866_v48 = vadd.f32 %v2232_v29, %v865_v20 }
 0x339   :  { %v870_v30 = vsel %vm869_vm9, %v2232_v29, %v866_v48  ;;  %v4113_v29 = vld [vmem:[#allocation40_spill] sm:$0xff] }
 0x33a   :  { %v875_v57 = vsel %vm872_vm10, %v874_v38, %v870_v30  ;;  %v4119_v48 = vld [vmem:[#allocation56_spill] sm:$0xff] }
 0x33b   :  { %v361_v39 = vpop.permute.xlu1 %360  ;;  %v897_v6 = vmul.f32 %v875_v57, %v855_v42 }
 0x33c   :  { %v3367_v60 = vsel %vm465_vm6, %v458_v49, %v361_v39 }
 0x33d   :  { %703 = vrot.lane.b32.xlu1 %v3367_v60, %s2483_s9  ;;  %719 = vrot.lane.b32.xlu0 %v678_v47, %s2483_s9  ;;  %v898_v12 = vadd.f32 %v897_v6, %v737_v10  ;;  %v4122_v10 = vld [vmem:[#allocation35_spill] sm:$0xff] }
 0x33f   :  { %2233 = vtanh.f32 %v898_v12 }
 0x345   :  { %581 = vrot.lane.b32.xlu1 %v4108_v18, %s2483_s9  ;;  %623 = vrot.lane.b32.xlu0 %v4109_v32, %s2482_s8  ;;  %v2234_v22 = vpop.eup %2233 }
 0x346   :  { %v901_v33 = vmul.f32 %v2234_v22, %v900_v53 }
 0x348   :  { %v3382_v25 = vadd.f32 %v902_v41, %v901_v33  ;;  %v4125_v41 = vld [vmem:[#allocation30_spill] sm:$0xff] }
 0x34a   :  { %905 = vst.msk [vmem:[#allocation2] sm:$0x3] %vm904_vm15, %v3382_v25  ;;  %927 = vmatmul.f32.vlgmr.msrb.gmra.mxu3 %v3382_v25  ;;  %947 = vmatmul.f32.vlgmr.msra.gmra.mxu0 %v3382_v25 }
 0x34b   :  { %967 = vmatmul.f32.vlgmr.msra.gmra.mxu1 %v3382_v25  ;;  %1181 = vmatpush.msrb.mxu3 %v3084_v23 }
 0x34d   :  { %280 = vrot.lane.b32.xlu1 %v4110_v61, %s2483_s9  ;;  %362 = vrot.lane.b32.xlu0 %v4111_v16, %s2482_s8 }
 0x34e   :  { %1182 = vmatpush.msrb.mxu3 %v3097_v8  ;;  %v4116_v8 = vld [vmem:[#allocation47_spill] sm:$0xff] }
 0x350   :  { %1183 = vmatpush.msrb.mxu3 %v3107_v0  ;;  %v402_v0 = vpop.permute.xlu2 %401 }
 0x352   :  { %1184 = vmatpush.msrb.mxu3 %v3116_v45  ;;  %v4114_v45 = vld [vmem:[#allocation58_spill] sm:$0xff] }
 0x354   :  { %1185 = vmatpush.msrb.mxu3 %v3126_v35  ;;  %v4117_v35 = vld [vmem:[#allocation53_spill] sm:$0xff] }
 0x355   :  { %644 = vrot.lane.b32.xlu1 %v4112_v13, %s2483_s9 }
 0x356   :  { %1186 = vmatpush.msrb.mxu3 %v3134_v43  ;;  %v4115_v43 = vld [vmem:[#allocation29_spill] sm:$0xff] }
 0x358   :  { %1187 = vmatpush.msrb.mxu3 %v3143_v17 }
 0x35a   :  { %1188 = vmatpush.msrb.mxu3 %v3152_v21 }
 0x35c   :  { %1189 = vmatpush.msrb.mxu3 %v3165_v56 }
 0x35d   :  { %403 = vrot.lane.b32.xlu1 %v4113_v29, %s2483_s9 }
 0x35e   :  { %1190 = vmatpush.msrb.mxu3 %v3174_v46 }
 0x360   :  { %1191 = vmatpush.msrb.mxu3 %v3179_v7  ;;  %v475_v7 = vsel %vm176_vm0, %v402_v0, %v4116_v8 }
 0x362   :  { %1192 = vmatpush.msrb.mxu3 %v3188_v2 }
 0x364   :  { %1193 = vmatpush.msrb.mxu3 %v3201_v63  ;;  %v603_v63 = vpop.permute.xlu2 %602 }
 0x365   :  { %604 = vrot.lane.b32.xlu1 %v4114_v45, %s2481_s5 }
 0x366   :  { %1194 = vmatpush.msrb.mxu3 %v3209_v44 }
 0x368   :  { %1195 = vmatpush.msrb.mxu3 %v3219_v15 }
 0x36a   :  { %1196 = vmatpush.msrb.mxu3 %v3224_v36 }
 0x36c   :  { %v322_v54 = vpop.permute.xlu2 %321 }
 0x36d   :  { %323 = vrot.lane.b32.xlu1 %v4115_v43, %s2481_s5 }
 0x3a7   :  { %v688_v56 = vpop.permute.xlu0 %687 }
 0x3a8   :  { %v730_v57 = vsel %vm456_vm5, %v3367_v60, %v688_v56 }
 0x3af   :  { %v704_v2 = vpop.permute.xlu1 %703  ;;  %v720_v21 = vpop.permute.xlu0 %719 }
 0x3b0   :  { %v3420_v23 = vsel %vm456_vm5, %v475_v7, %v720_v21  ;;  %v734_v42 = vsel %vm456_vm5, %v704_v2, %v3356_v3 }
 0x3b7   :  { %v582_v17 = vpop.permute.xlu1 %581  ;;  %v624_v44 = vpop.permute.xlu0 %623 }
 0x3b8   :  { %v667_v46 = vsel %vm176_vm0, %v4117_v35, %v582_v17 }
 0x3b9   :  { %v671_v36 = vsel %vm456_vm5, %v667_v46, %v603_v63 }
 0x3ba   :  { %v3426_v15 = vsel %vm465_vm6, %v671_v36, %v624_v44 }
 0x3bb   :  { %689 = vrot.lane.b32.xlu2 %v3426_v15, %s2483_s9 }
 0x3bf   :  { %v281_v40 = vpop.permute.xlu1 %280  ;;  %v363_v37 = vpop.permute.xlu0 %362 }
 0x3c0   :  { %v450_v4 = vsel %vm176_vm0, %v4118_v19, %v281_v40 }
 0x3c1   :  { %v459_v52 = vsel %vm456_vm5, %v450_v4, %v322_v54 }
 0x3c2   :  { %v3434_v51 = vsel %vm465_vm6, %v459_v52, %v363_v37  ;;  %v4126_v52 = vld [vmem:[#allocation48_spill] sm:$0xff] }
 0x3c3   :  { %705 = vrot.lane.b32.xlu0 %v3434_v51, %s2483_s9 }
 0x3c7   :  { %v645_v20 = vpop.permute.xlu1 %644  ;;  %v948_v27 = vpop.f32.mrf.mxu0 }
 0x3c8   :  { %v679_v50 = vsel %vm176_vm0, %v645_v20, %v658_v28  ;;  %v949_v9 = vadd.f32 %v948_v27, %v3343_v31  ;;  %v968_v29 = vpop.f32.mrf.mxu1 }
 0x3c9   :  { %721 = vrot.lane.b32.xlu2 %v679_v50, %s2483_s9  ;;  %v969_v56 = vadd.f32 %v968_v29, %v3360_v14 }
 0x3ca   :  { %v991_v34 = vadd.f32 %v949_v9, %v734_v42 }
 0x3cb   :  { %583 = vrot.lane.b32.xlu0 %v4119_v48, %s2483_s9 }
 0x3cc   :  { %v992_v38 = vsub.f32 0.0, %v991_v34  ;;  %v4127_v34 = vld [vmem:[#allocation54_spill] sm:$0xff] }
 0x3cd   :  { %v928_v30 = vpop.f32.mrf.mxu3 }
 0x3ce   :  { %v993_v39 = vmul.f32 1.442695, %v992_v38  ;;  %v929_v49 = vadd.f32 %v928_v30, %v3348_v59 }
 0x3cf   :  { %v404_v37 = vpop.permute.xlu1 %403 }
 0x3d0   :  { %2235 = vpow2.f32 %v993_v39  ;;  %v971_v47 = vadd.f32 %v929_v49, %v730_v57  ;;  %v476_v20 = vsel %vm176_vm0, %v404_v37, %v4126_v52 }
 0x3d1   :  { %625 = vrot.lane.b32.xlu2 %v4120_v58, %s2482_s8  ;;  %v4128_v58 = vld [vmem:[#allocation21_spill] sm:$0xff] }
 0x3d2   :  { %v972_v3 = vsub.f32 0.0, %v971_v47 }
 0x3d3   :  { %282 = vrot.lane.b32.xlu0 %v4121_v62, %s2483_s9 }
 0x3d4   :  { %v973_v55 = vmul.f32 1.442695, %v972_v3 }
 0x3d6   :  { %v2236_v1 = vpop.eup %2235  ;;  %2237 = vpow2.f32 %v973_v55 }
 0x3d7   :  { %v995_v6 = vadd.f32 1.0, %v2236_v1  ;;  %v605_v9 = vpop.permute.xlu1 %604 }
 0x3d9   :  { %364 = vrot.lane.b32.xlu2 %v4122_v10, %s2482_s8  ;;  %2239 = vrcp.f32 %v995_v6  ;;  %v1007_v2 = vand.u32 2147483648, %v995_v6  ;;  %vm1001_vm9 = vweird.f32 %v995_v6  ;;  %v1005_v63 = vand.u32 2147483647, %v995_v6 }
 0x3db   :  { %646 = vrot.lane.b32.xlu0 %v4123_v11, %s2483_s9  ;;  %v1008_v35 = vor.u32 1.1754944e-38, %v1007_v2  ;;  %vm1006_vm11 = vcmp.eq.f32.partialorder %v1005_v63, 8.507059e+37  ;;  %v4129_v11 = vld [vmem:[#allocation25_spill] sm:$0xff] }
 0x3dc   :  { %v2238_v60 = vpop.eup %2237 }
 0x3dd   :  { %v975_v12 = vadd.f32 1.0, %v2238_v60  ;;  %v4130_v60 = vld [vmem:[#allocation36_spill] sm:$0xff] }
 0x3df   :  { %2241 = vrcp.f32 %v975_v12  ;;  %v2240_v24 = vpop.eup %2239  ;;  %v987_v33 = vand.u32 2147483648, %v975_v12  ;;  %v985_v16 = vand.u32 2147483647, %v975_v12  ;;  %vm981_vm2 = vweird.f32 %v975_v12  ;;  %v324_v57 = vpop.permute.xlu1 %323 }
 0x3e0   :  { %v997_v5 = vmul.f32 %v2240_v24, %v995_v6  ;;  %vm1002_vm8 = vweird.f32 %v2240_v24  ;;  %v660_v6 = vld.sshfl [vmem:[#allocation1 + $0x28] sm:$0xff pattern:$0x73625140] }
 0x3e1   :  { %v988_v43 = vor.u32 1.1754944e-38, %v987_v33  ;;  %vm986_vm7 = vcmp.eq.f32.partialorder %v985_v16, 8.507059e+37  ;;  %vm1003_vm10 = vmor %vm1001_vm9, %vm1002_vm8 }
 0x3e2   :  { %v998_v53 = vsub.f32 1.0, %v997_v5 }
 0x3e3   :  { %405 = vrot.lane.b32.xlu0 %v4124_v26, %s2483_s9 }
 0x3e4   :  { %v999_v13 = vmul.f32 %v2240_v24, %v998_v53 }
 0x3e5   :  { %v2242_v18 = vpop.eup %2241 }
 0x3e6   :  { %v977_v32 = vmul.f32 %v2242_v18, %v975_v12  ;;  %vm982_vm1 = vweird.f32 %v2242_v18  ;;  %v1000_v8 = vadd.f32 %v2240_v24, %v999_v13  ;;  %v4131_v12 = vld [vmem:[#allocation42_spill] sm:$0xff] }
 0x3e7   :  { %vm983_vm3 = vmor %vm981_vm2, %vm982_vm1 }
 0x3e8   :  { %v978_v22 = vsub.f32 1.0, %v977_v32  ;;  %v1004_v44 = vsel %vm1003_vm10, %v2240_v24, %v1000_v8 }
 0x3e9   :  { %v1009_v46 = vsel %vm1006_vm11, %v1008_v35, %v1004_v44 }
 0x3ea   :  { %v979_v61 = vmul.f32 %v2242_v18, %v978_v22  ;;  %v1014_v36 = vsub.f32 1.0, %v1009_v46  ;;  %v1016_v19 = vmul.f32 %v1009_v46, %v3382_v25 }
 0x3eb   :  { %325 = vrot.lane.b32.xlu0 %v4125_v41, %s2481_s5 }
 0x3ec   :  { %v980_v45 = vadd.f32 %v2242_v18, %v979_v61 }
 0x3ee   :  { %v984_v0 = vsel %vm983_vm3, %v2242_v18, %v980_v45 }
 0x3ef   :  { %v989_v7 = vsel %vm986_vm7, %v988_v43, %v984_v0 }
 0x3f0   :  { %v1011_v21 = vmul.f32 %v989_v7, %v969_v56 }
 0x3f2   :  { %v1012_v17 = vadd.f32 %v1011_v21, %v3420_v23 }
 0x3f4   :  { %2243 = vtanh.f32 %v1012_v17 }
 0x3fa   :  { %v2244_v40 = vpop.eup %2243 }
 0x3fb   :  { %v1015_v54 = vmul.f32 %v2244_v40, %v1014_v36 }
 0x3fd   :  { %v3463_v4 = vadd.f32 %v1016_v19, %v1015_v54 }
 0x3ff   :  { %1019 = vst.msk [vmem:[#allocation2 + $0x2] sm:$0x3] %vm904_vm15, %v3463_v4  ;;  %1042 = vmatmul.f32.vlgmr.msra.gmra.mxu2 %v3463_v4  ;;  %1062 = vmatmul.f32.vlgmr.msra.gmra.mxu3 %v3463_v4 }
 0x400   :  { %1082 = vmatmul.f32.vlgmr.msrb.gmra.mxu0 %v3463_v4 }
 0x415   :  { %v690_v23 = vpop.permute.xlu2 %689 }
 0x416   :  { %v731_v32 = vsel %vm456_vm5, %v3434_v51, %v690_v23 }
 0x423   :  { %v722_v28 = vpop.permute.xlu2 %721 }
 0x424   :  { %v3473_v50 = vsel %vm456_vm5, %v476_v20, %v722_v28 }
 0x42b   :  { %v626_v42 = vpop.permute.xlu2 %625 }
 0x433   :  { %v365_v62 = vpop.permute.xlu2 %364 }
 0x435   :  { %v706_v27 = vpop.permute.xlu0 %705 }
 0x436   :  { %v735_v53 = vsel %vm456_vm5, %v706_v27, %v3426_v15 }
 0x43d   :  { %v584_v48 = vpop.permute.xlu0 %583 }
 0x43e   :  { %v668_v38 = vsel %vm176_vm0, %v4127_v34, %v584_v48 }
 0x43f   :  { %v672_v30 = vsel %vm456_vm5, %v668_v38, %v605_v9 }
 0x440   :  { %v3479_v39 = vsel %vm465_vm6, %v672_v30, %v626_v42 }
 0x441   :  { %691 = vrot.lane.b32.xlu1 %v3479_v39, %s2483_s9 }
 0x445   :  { %v283_v49 = vpop.permute.xlu0 %282 }
 0x446   :  { %v451_v47 = vsel %vm176_vm0, %v4128_v58, %v283_v49 }
 0x447   :  { %v460_v3 = vsel %vm456_vm5, %v451_v47, %v324_v57 }
 0x448   :  { %v3487_v55 = vsel %vm465_vm6, %v460_v3, %v365_v62  ;;  %v1270_v3 = vld [vmem:[%s4024_s6 + $0x70] sm:$0xff] }
 0x449   :  { %707 = vrot.lane.b32.xlu2 %v3487_v55, %s2483_s9  ;;  %1288 = vmatpush.msra.mxu0 %v1270_v3 }
 0x44a   :  { %1367 = vmatpush.msra.mxu3 %v1270_v3  ;;  %1525 = vmatpush.msra.mxu2 %v1270_v3 }
 0x44d   :  { %v647_v1 = vpop.permute.xlu0 %646 }
 0x44e   :  { %v680_v10 = vsel %vm176_vm0, %v647_v1, %v660_v6  ;;  %v3524_v1 = vld [vmem:[%s4024_s6 + $0x78] sm:$0xff] }
 0x44f   :  { %723 = vrot.lane.b32.xlu1 %v680_v10, %s2483_s9  ;;  %1308 = vmatpush.msra.mxu1 %v3524_v1 }
 0x451   :  { %284 = vrot.lane.b32.xlu2 %v4129_v11, %s2483_s9 }
 0x457   :  { %366 = vrot.lane.b32.xlu1 %v4130_v60, %s2482_s8 }
 0x459   :  { %407 = vrot.lane.b32.xlu2 %v4131_v12, %s2483_s9 }
 0x47d   :  { %v1083_v44 = vpop.f32.mrf.mxu0 }
 0x47e   :  { %v1084_v40 = vadd.f32 %v1083_v44, %v3360_v14 }
 0x482   :  { %v1043_v24 = vpop.f32.mrf.mxu2  ;;  %v1063_v26 = vpop.f32.mrf.mxu3 }
 0x483   :  { %v1044_v5 = vadd.f32 %v1043_v24, %v3348_v59  ;;  %v1064_v18 = vadd.f32 %v1063_v26, %v3343_v31  ;;  %v1266_v24 = vld [vmem:[%s4024_s6 + $0x50] sm:$0xff]  ;;  %v3543_v26 = vld [vmem:[%s4024_s6 + $0x58] sm:$0xff] }
 0x485   :  { %v1086_v22 = vadd.f32 %v1044_v5, %v731_v32  ;;  %v1106_v33 = vadd.f32 %v1064_v18, %v735_v53  ;;  %v1264_v5 = vld [vmem:[%s4024_s6 + $0x40] sm:$0xff]  ;;  %v1262_v53 = vld [vmem:[%s4024_s6 + $0x30] sm:$0xff] }
 0x487   :  { %v1087_v41 = vsub.f32 0.0, %v1086_v22  ;;  %v1107_v61 = vsub.f32 0.0, %v1106_v33  ;;  %v3562_v22 = vld [vmem:[%s4024_s6 + $0x38] sm:$0xff]  ;;  %v1260_v33 = vld [vmem:[%s4024_s6 + $0x20] sm:$0xff] }
 0x489   :  { %v1088_v16 = vmul.f32 1.442695, %v1087_v41  ;;  %v1108_v13 = vmul.f32 1.442695, %v1107_v61  ;;  %v3571_v41 = vld [vmem:[%s4024_s6 + $0x28] sm:$0xff] }
 0x48b   :  { %2245 = vpow2.f32 %v1088_v16  ;;  %v1258_v16 = vld [vmem:[%s4024_s6 + $0x10] sm:$0xff] }
 0x48c   :  { %2247 = vpow2.f32 %v1108_v13  ;;  %v3580_v13 = vld [vmem:[%s4024_s6 + $0x18] sm:$0xff] }
 0x491   :  { %v2246_v29 = vpop.eup %2245 }
 0x492   :  { %v2248_v45 = vpop.eup %2247  ;;  %v1090_v43 = vadd.f32 1.0, %v2246_v29 }
 0x493   :  { %v1110_v56 = vadd.f32 1.0, %v2248_v45  ;;  %v1256_v45 = vld [vmem:[%s4024_s6] sm:$0xff] }
 0x494   :  { %2249 = vrcp.f32 %v1090_v43  ;;  %v1102_v15 = vand.u32 2147483648, %v1090_v43  ;;  %v1100_v17 = vand.u32 2147483647, %v1090_v43  ;;  %vm1096_vm13 = vweird.f32 %v1090_v43 }
 0x495   :  { %2251 = vrcp.f32 %v1110_v56  ;;  %v1122_v52 = vand.u32 2147483648, %v1110_v56  ;;  %vm1116_vm3 = vweird.f32 %v1110_v56  ;;  %v1120_v20 = vand.u32 2147483647, %v1110_v56 }
 0x496   :  { %v1103_v36 = vor.u32 1.1754944e-38, %v1102_v15  ;;  %vm1101_vm1 = vcmp.eq.f32.partialorder %v1100_v17, 8.507059e+37 }
 0x497   :  { %v1123_v9 = vor.u32 1.1754944e-38, %v1122_v52  ;;  %vm1121_vm8 = vcmp.eq.f32.partialorder %v1120_v20, 8.507059e+37  ;;  %v4132_v52 = vld [vmem:[#allocation49_spill] sm:$0xff] }
 0x49a   :  { %v2250_v0 = vpop.eup %2249 }
 0x49b   :  { %v2252_v8 = vpop.eup %2251  ;;  %v1092_v51 = vmul.f32 %v2250_v0, %v1090_v43  ;;  %vm1097_vm12 = vweird.f32 %v2250_v0  ;;  %v3589_v43 = vld [vmem:[%s4024_s6 + $0x8] sm:$0xff] }
 0x49c   :  { %v1112_v7 = vmul.f32 %v2252_v8, %v1110_v56  ;;  %vm1098_vm14 = vmor %vm1096_vm13, %vm1097_vm12  ;;  %vm1117_vm2 = vweird.f32 %v2252_v8 }
 0x49d   :  { %v1093_v2 = vsub.f32 1.0, %v1092_v51  ;;  %vm1118_vm7 = vmor %vm1116_vm3, %vm1117_vm2 }
 0x49e   :  { %v1113_v21 = vsub.f32 1.0, %v1112_v7 }
 0x49f   :  { %v1094_v63 = vmul.f32 %v2250_v0, %v1093_v2 }
 0x4a0   :  { %v1114_v35 = vmul.f32 %v2252_v8, %v1113_v21 }
 0x4a1   :  { %v1095_v46 = vadd.f32 %v2250_v0, %v1094_v63 }
 0x4a2   :  { %v1115_v23 = vadd.f32 %v2252_v8, %v1114_v35  ;;  %v406_v35 = vpop.permute.xlu0 %405 }
 0x4a3   :  { %v1099_v54 = vsel %vm1098_vm14, %v2250_v0, %v1095_v46  ;;  %v708_v6 = vpop.permute.xlu2 %707  ;;  %v477_v20 = vsel %vm176_vm0, %v406_v35, %v4132_v52 }
 0x4a4   :  { %v1104_v19 = vsel %vm1101_vm1, %v1103_v36, %v1099_v54  ;;  %v1119_v27 = vsel %vm1118_vm7, %v2252_v8, %v1115_v23  ;;  %v736_v18 = vsel %vm456_vm5, %v708_v6, %v3479_v39 }
 0x4a5   :  { %v1126_v37 = vmul.f32 %v1104_v19, %v1084_v40  ;;  %v1124_v42 = vsel %vm1121_vm8, %v1123_v9, %v1119_v27 }
 0x4a6   :  { %v1129_v48 = vsub.f32 1.0, %v1124_v42  ;;  %v1131_v30 = vmul.f32 %v1124_v42, %v3463_v4 }
 0x4a7   :  { %v1127_v28 = vadd.f32 %v1126_v37, %v3473_v50 }
 0x4a9   :  { %2253 = vtanh.f32 %v1127_v28 }
 0x4af   :  { %v2254_v34 = vpop.eup %2253 }
 0x4b0   :  { %v1130_v38 = vmul.f32 %v2254_v34, %v1129_v48 }
 0x4b2   :  { %v3508_v49 = vadd.f32 %v1131_v30, %v1130_v38 }
 0x4b3   :  { %v692_v50 = vpop.permute.xlu1 %691 }
 0x4b4   :  { %1134 = vst.msk [vmem:[#allocation2 + $0x4] sm:$0x3] %vm904_vm15, %v3508_v49  ;;  %1157 = vmatmul.f32.vlgmr.msrb.gmra.mxu1 %v3508_v49  ;;  %1177 = vmatmul.f32.vlgmr.msrb.gmra.mxu2 %v3508_v49  ;;  %v732_v47 = vsel %vm456_vm5, %v3487_v55, %v692_v50  ;;  %v3533_v55 = vld [vmem:[%s4024_s6 + $0x68] sm:$0xff] }
 0x4b5   :  { %1197 = vmatmul.f32.vlgmr.msrb.gmra.mxu3 %v3508_v49  ;;  %1309 = vmatpush.msra.mxu1 %v3533_v55 }
 0x4b7   :  { %1310 = vmatpush.msra.mxu1 %v3543_v26 }
 0x4c1   :  { %v724_v54 = vpop.permute.xlu1 %723 }
 0x4c2   :  { %v740_v48 = vsel %vm456_vm5, %v477_v20, %v724_v54 }
 0x531   :  { %v1158_v57 = vpop.f32.mrf.mxu1 }
 0x532   :  { %v1159_v58 = vadd.f32 %v1158_v57, %v3348_v59  ;;  %v1268_v59 = vld [vmem:[%s4024_s6 + $0x60] sm:$0xff] }
 0x533   :  { %1289 = vmatpush.msra.mxu0 %v1268_v59  ;;  %1368 = vmatpush.msra.mxu3 %v1268_v59 }
 0x534   :  { %v1201_v62 = vadd.f32 %v1159_v58, %v732_v47  ;;  %1526 = vmatpush.msra.mxu2 %v1268_v59 }
 0x535   :  { %1290 = vmatpush.msra.mxu0 %v1266_v24  ;;  %1369 = vmatpush.msra.mxu3 %v1266_v24 }
 0x536   :  { %v1202_v10 = vsub.f32 0.0, %v1201_v62  ;;  %1527 = vmatpush.msra.mxu2 %v1266_v24 }
 0x537   :  { %v1178_v11 = vpop.f32.mrf.mxu2  ;;  %1291 = vmatpush.msra.mxu0 %v1264_v5  ;;  %1370 = vmatpush.msra.mxu3 %v1264_v5 }
 0x538   :  { %v1203_v60 = vmul.f32 1.442695, %v1202_v10  ;;  %v1179_v12 = vadd.f32 %v1178_v11, %v3343_v31  ;;  %v3554_v31 = vld [vmem:[%s4024_s6 + $0x48] sm:$0xff]  ;;  %1528 = vmatpush.msra.mxu2 %v1264_v5  ;;  %v1198_v44 = vpop.f32.mrf.mxu3  ;;  %v1620_v11 = vlaneseq }
 0x539   :  { %1311 = vmatpush.msra.mxu1 %v3554_v31  ;;  %1292 = vmatpush.msra.mxu0 %v1262_v53  ;;  %v1199_v23 = vadd.f32 %v1198_v44, %v3360_v14  ;;  %v4133_v10 = vld [vmem:[#allocation26_spill] sm:$0xff] }
 0x53a   :  { %2255 = vpow2.f32 %v1203_v60  ;;  %v1221_v32 = vadd.f32 %v1179_v12, %v736_v18  ;;  %1371 = vmatpush.msra.mxu3 %v1262_v53  ;;  %1529 = vmatpush.msra.mxu2 %v1262_v53  ;;  %v1621_v60 = vshrl.u32 %v1620_v11, 7  ;;  %v4135_v12 = vld [vmem:[#allocation27_spill] sm:$0xff]  ;;  %v4138_v18 = vld [vmem:[#allocation45_spill] sm:$0xff] }
 0x53b   :  { %1312 = vmatpush.msra.mxu1 %v3562_v22  ;;  %1293 = vmatpush.msra.mxu0 %v1260_v33 }
 0x53c   :  { %v1222_v39 = vsub.f32 0.0, %v1221_v32  ;;  %1372 = vmatpush.msra.mxu3 %v1260_v33  ;;  %1530 = vmatpush.msra.mxu2 %v1260_v33  ;;  %v3635_v32 = vld [vmem:[%s4139_s26] sm:$0xff] }
 0x53d   :  { %1313 = vmatpush.msra.mxu1 %v3571_v41  ;;  %1294 = vmatpush.msra.mxu0 %v1258_v16 }
 0x53e   :  { %v1223_v61 = vmul.f32 1.442695, %v1222_v39  ;;  %1373 = vmatpush.msra.mxu3 %v1258_v16  ;;  %1531 = vmatpush.msra.mxu2 %v1258_v16  ;;  %v1654_v39 = vperm.slane %v3635_v32, 5 }
 0x53f   :  { %1314 = vmatpush.msra.mxu1 %v3580_v13  ;;  %1295 = vmatpush.msra.mxu0 %v1256_v45 }
 0x540   :  { %v2256_v29 = vpop.eup %2255  ;;  %2257 = vpow2.f32 %v1223_v61  ;;  %1374 = vmatpush.msra.mxu3 %v1256_v45  ;;  %1532 = vmatpush.msra.mxu2 %v1256_v45 }
 0x541   :  { %v1205_v56 = vadd.f32 1.0, %v2256_v29  ;;  %1315 = vmatpush.msra.mxu1 %v3589_v43  ;;  %1446 = vmatpush.msrb.mxu0 %v1270_v3 }
 0x542   :  { %1387 = vmatpush.msrb.mxu3 %v3524_v1  ;;  %2219 = vset.pattern.permute.xlu0 %v1621_v60 }
 0x543   :  { %2259 = vrcp.f32 %v1205_v56  ;;  %1466 = vmatpush.msrb.mxu1 %v3524_v1  ;;  %1447 = vmatpush.msrb.mxu0 %v1268_v59  ;;  %v1217_v15 = vand.u32 2147483648, %v1205_v56  ;;  %v1215_v63 = vand.u32 2147483647, %v1205_v56  ;;  %vm1211_vm10 = vweird.f32 %v1205_v56  ;;  %v4134_v59 = vld [vmem:[#allocation43_spill] sm:$0xff] }
 0x544   :  { %1388 = vmatpush.msrb.mxu3 %v3533_v55  ;;  %2220 = vset.pattern.permute.xlu1 %v1621_v60 }
 0x545   :  { %1467 = vmatpush.msrb.mxu1 %v3533_v55  ;;  %1448 = vmatpush.msrb.mxu0 %v1266_v24  ;;  %v1218_v40 = vor.u32 1.1754944e-38, %v1217_v15  ;;  %vm1216_vm12 = vcmp.eq.f32.partialorder %v1215_v63, 8.507059e+37  ;;  %v4136_v24 = vld [vmem:[#allocation44_spill] sm:$0xff] }
 0x546   :  { %v2258_v0 = vpop.eup %2257  ;;  %1389 = vmatpush.msrb.mxu3 %v3543_v26  ;;  %2221 = vset.pattern.permute.xlu2 %v1621_v60 }
 0x547   :  { %v1225_v8 = vadd.f32 1.0, %v2258_v0  ;;  %1468 = vmatpush.msrb.mxu1 %v3543_v26  ;;  %1449 = vmatpush.msrb.mxu0 %v1264_v5  ;;  %v4137_v5 = vld [vmem:[#allocation28_spill] sm:$0xff] }
 0x548   :  { %1390 = vmatpush.msrb.mxu3 %v3554_v31 }
 0x549   :  { %v2260_v51 = vpop.eup %2259  ;;  %2261 = vrcp.f32 %v1225_v8  ;;  %1469 = vmatpush.msrb.mxu1 %v3554_v31  ;;  %1450 = vmatpush.msrb.mxu0 %v1262_v53  ;;  %v1237_v42 = vand.u32 2147483648, %v1225_v8  ;;  %v1235_v34 = vand.u32 2147483647, %v1225_v8  ;;  %vm1231_vm14 = vweird.f32 %v1225_v8 }
 0x54a   :  { %v1207_v7 = vmul.f32 %v2260_v51, %v1205_v56  ;;  %1391 = vmatpush.msrb.mxu3 %v3562_v22  ;;  %vm1212_vm9 = vweird.f32 %v2260_v51  ;;  %v1619_v53 = vperm.slane %v3635_v32, 0  ;;  %v285_v56 = vpop.permute.xlu2 %284 }
 0x54b   :  { %1470 = vmatpush.msrb.mxu1 %v3562_v22  ;;  %1451 = vmatpush.msrb.mxu0 %v1260_v33  ;;  %vm1213_vm11 = vmor %vm1211_vm10, %vm1212_vm9  ;;  %v1238_v50 = vor.u32 1.1754944e-38, %v1237_v42  ;;  %vm1236_vm2 = vcmp.eq.f32.partialorder %v1235_v34, 8.507059e+37  ;;  %v3642_v33 = vld [vmem:[%s4140_s28] sm:$0xf] }
 0x54c   :  { %v1208_v2 = vsub.f32 1.0, %v1207_v7  ;;  %1392 = vmatpush.msrb.mxu3 %v3571_v41  ;;  %v1717_v61 = vperm.slane %v3642_v33, 0 }
 0x54d   :  { %1471 = vmatpush.msrb.mxu1 %v3571_v41  ;;  %1452 = vmatpush.msrb.mxu0 %v1258_v16  ;;  %v326_v16 = vpop.permute.xlu0 %325 }
 0x54e   :  { %v1209_v21 = vmul.f32 %v2260_v51, %v1208_v2  ;;  %1393 = vmatpush.msrb.mxu3 %v3580_v13  ;;  %v367_v2 = vpop.permute.xlu1 %366 }
 0x54f   :  { %v2262_v17 = vpop.eup %2261  ;;  %1472 = vmatpush.msrb.mxu1 %v3580_v13  ;;  %1453 = vmatpush.msrb.mxu0 %v1256_v45  ;;  %v1272_v45 = vld [vmem:[%s4025_s7] sm:$0x3] }
 0x550   :  { %v1227_v46 = vmul.f32 %v2262_v17, %v1225_v8  ;;  %v1210_v36 = vadd.f32 %v2260_v51, %v1209_v21  ;;  %1394 = vmatpush.msrb.mxu3 %v3589_v43  ;;  %vm1232_vm13 = vweird.f32 %v2262_v17  ;;  %v3652_v8 = vperm.slane %v1272_v45, 0 }
 0x551   :  { %1473 = vmatpush.msrb.mxu1 %v3589_v43  ;;  %vm1233_vm1 = vmor %vm1231_vm14, %vm1232_vm13 }
 0x552   :  { %v1228_v19 = vsub.f32 1.0, %v1227_v46  ;;  %v1214_v37 = vsel %vm1213_vm11, %v2260_v51, %v1210_v36  ;;  %v4141_v51 = vld [vmem:[#allocation20_spill] sm:$0xff] }
 0x553   :  { %v1219_v28 = vsel %vm1216_vm12, %v1218_v40, %v1214_v37  ;;  %v452_v7 = vsel %vm176_vm0, %v4141_v51, %v285_v56 }
 0x554   :  { %v1241_v27 = vmul.f32 %v1219_v28, %v1199_v23  ;;  %v1229_v9 = vmul.f32 %v2262_v17, %v1228_v19  ;;  %v461_v21 = vsel %vm456_vm5, %v452_v7, %v326_v16 }
 0x556   :  { %v1242_v38 = vadd.f32 %v1241_v27, %v740_v48  ;;  %v1230_v14 = vadd.f32 %v2262_v17, %v1229_v9  ;;  %v3665_v27 = vperm.slane %v1272_v45, 1 }
 0x558   :  { %2263 = vtanh.f32 %v1242_v38  ;;  %v1234_v30 = vsel %vm1233_vm1, %v2262_v17, %v1230_v14  ;;  %v470_v17 = vsel %vm465_vm6, %v461_v21, %v367_v2 }
 0x559   :  { %v1239_v57 = vsel %vm1236_vm2, %v1238_v50, %v1234_v30  ;;  %v408_v30 = vpop.permute.xlu2 %407 }
 0x55a   :  { %v1244_v58 = vsub.f32 1.0, %v1239_v57  ;;  %v1246_v3 = vmul.f32 %v1239_v57, %v3508_v49 }
 0x55e   :  { %v2264_v47 = vpop.eup %2263 }
 0x55f   :  { %v1245_v62 = vmul.f32 %v2264_v47, %v1244_v58 }
 0x561   :  { %v1247_v6 = vadd.f32 %v1246_v3, %v1245_v62  ;;  %v4142_v3 = vld [vmem:[#allocation50_spill] sm:$0xff] }
 0x563   :  { %1251 = vrot.lane.b32.xlu0 %v1247_v6, %s2483_s9  ;;  %1249 = vst.msk [vmem:[#allocation2 + $0x6] sm:$0x3] %vm904_vm15, %v1247_v6  ;;  %2195 = vmatmul.msk.f32.vlgmr.msra.gmra.mxu0 %vm456_vm5, %v1247_v6 }
 0x564   :  { %2196 = vmatmul.msk.f32.vlgmr.msra.gmra.mxu1 %vm456_vm5, %v1247_v6  ;;  %v478_v6 = vsel %vm176_vm0, %v408_v30, %v4142_v3 }
 0x56b   :  { %286 = vrot.lane.b32.xlu0 %v4133_v10, %s2483_s9 }
 0x573   :  { %409 = vrot.lane.b32.xlu0 %v4134_v59, %s2483_s9 }
 0x57b   :  { %288 = vrot.lane.b32.xlu0 %v4135_v12, %s2483_s9  ;;  %v4143_v12 = vld [vmem:[#allocation31_spill] sm:$0xff] }
 0x583   :  { %411 = vrot.lane.b32.xlu0 %v4136_v24, %s2483_s9 }
 0x58b   :  { %290 = vrot.lane.b32.xlu0 %v4137_v5, %s2483_s9 }
 0x593   :  { %413 = vrot.lane.b32.xlu0 %v4138_v18, %s2483_s9 }
 0x59b   :  { %907 = vrot.lane.b32.xlu0 %v3382_v25, %s2483_s9  ;;  %v1738_v25 = vperm.slane %v3642_v33, 3 }
 0x5a3   :  { %1624 = vperm.xlu0 %2219, %v1619_v53  }
 0x5ab   :  { %1659 = vperm.xlu0 %2219, %v1654_v39   ;;  %v4144_v39 = vld [vmem:[#allocation37_spill] sm:$0xff] }
 0x5b3   :  { %1722 = vperm.xlu0 %2219, %v1717_v61  }
 0x5bb   :  { %1743 = vperm.xlu0 %2219, %v1738_v25   ;;  %v1597_v25 = vld [vmem:[#allocation2 + $0x6] sm:$0x3] }
 0x5d5   :  { %v1252_v29 = vpop.permute.xlu0 %1251 }
 0x5d6   :  { %1255 = vst.msk [vmem:[#allocation3 + $0x6] sm:$0x3] %vm904_vm15, %v1252_v29 }
 0x5dd   :  { %v3650_v0 = vpop.permute.xlu0 %286 }
 0x5e0   :  { %v1297_v15 = vpop.f32.mrf.mxu0 }
 0x5e1   :  { %v1298_v63 = vadd.f32 %v1297_v15, %v3652_v8  ;;  %v1317_v34 = vpop.f32.mrf.mxu1 }
 0x5e2   :  { %v1318_v50 = vadd.f32 %v1317_v34, %v3665_v27 }
 0x5e3   :  { %v1320_v44 = vadd.f32 %v1298_v63, %v470_v17 }
 0x5e5   :  { %v1321_v35 = vsub.f32 0.0, %v1320_v44  ;;  %v3659_v46 = vpop.permute.xlu0 %409 }
 0x5e7   :  { %v1322_v36 = vmul.f32 1.442695, %v1321_v35 }
 0x5e9   :  { %2265 = vpow2.f32 %v1322_v36 }
 0x5ed   :  { %v3661_v40 = vpop.permute.xlu0 %288 }
 0x5ef   :  { %v2266_v54 = vpop.eup %2265 }
 0x5f0   :  { %v1324_v19 = vadd.f32 1.0, %v2266_v54 }
 0x5f2   :  { %2267 = vrcp.f32 %v1324_v19  ;;  %v1336_v28 = vand.u32 2147483648, %v1324_v19  ;;  %v1334_v42 = vand.u32 2147483647, %v1324_v19  ;;  %vm1330_vm7 = vweird.f32 %v1324_v19 }
 0x5f4   :  { %v1337_v14 = vor.u32 1.1754944e-38, %v1336_v28  ;;  %vm1335_vm9 = vcmp.eq.f32.partialorder %v1334_v42, 8.507059e+37 }
 0x5f5   :  { %v3663_v23 = vpop.permute.xlu0 %411 }
 0x5f8   :  { %v2268_v37 = vpop.eup %2267 }
 0x5f9   :  { %v1326_v52 = vmul.f32 %v2268_v37, %v1324_v19  ;;  %vm1331_vm3 = vweird.f32 %v2268_v37 }
 0x5fa   :  { %vm1332_vm8 = vmor %vm1330_vm7, %vm1331_vm3 }
 0x5fb   :  { %v1327_v20 = vsub.f32 1.0, %v1326_v52 }
 0x5fd   :  { %v1328_v9 = vmul.f32 %v2268_v37, %v1327_v20  ;;  %v3667_v48 = vpop.permute.xlu0 %290 }
 0x5ff   :  { %v1329_v38 = vadd.f32 %v2268_v37, %v1328_v9  ;;  %v4146_v9 = vld [vmem:[#allocation51_spill] sm:$0xff] }
 0x600   :  { %v479_v42 = vsel %vm176_vm0, %v3659_v46, %v4146_v9  ;;  %v1596_v46 = vld [vmem:[#allocation2 + $0x4] sm:$0x3] }
 0x601   :  { %v1333_v57 = vsel %vm1332_vm8, %v2268_v37, %v1329_v38 }
 0x602   :  { %v1338_v58 = vsel %vm1335_vm9, %v1337_v14, %v1333_v57  ;;  %v4147_v14 = vld [vmem:[#allocation32_spill] sm:$0xff] }
 0x603   :  { %v1340_v47 = vmul.f32 %v1338_v58, %v1318_v50  ;;  %v1349_v62 = vmul.f32 %v1338_v58, %v1252_v29  ;;  %v1343_v24 = vsub.f32 1.0, %v1338_v58 }
 0x605   :  { %v1341_v10 = vadd.f32 %v1340_v47, %v478_v6  ;;  %v3672_v59 = vpop.permute.xlu0 %413 }
 0x607   :  { %2269 = vtanh.f32 %v1341_v10 }
 0x60d   :  { %v2270_v11 = vpop.eup %2269  ;;  %v908_v60 = vpop.permute.xlu0 %907 }
 0x60e   :  { %910 = vst.msk [vmem:[#allocation3] sm:$0x3] %vm904_vm15, %v908_v60  ;;  %1345 = vrot.lane.b32.xlu1 %v2270_v11, %s2483_s9 }
 0x616   :  { %327 = vrot.lane.b32.xlu1 %v4143_v12, %s2481_s5 }
 0x680   :  { %v1346_v5 = vpop.permute.xlu1 %1345 }
 0x681   :  { %v1348_v18 = vmul.f32 %v1346_v5, %v1343_v24  ;;  %v4149_v24 = vld [vmem:[#allocation17_spill] sm:$0xff] }
 0x682   :  { %v454_v5 = vsel %vm176_vm0, %v4149_v24, %v3661_v40 }
 0x683   :  { %v1350_v53 = vadd.f32 %v1349_v62, %v1348_v18  ;;  %v4148_v62 = vld [vmem:[#allocation38_spill] sm:$0xff] }
 0x685   :  { %1352 = vrot.lane.b32.xlu2 %v1350_v53, %s2483_s9 }
 0x68d   :  { %368 = vrot.lane.b32.xlu2 %v4144_v39, %s2482_s8 }
 0x6df   :  { %v1353_v61 = vpop.permute.xlu2 %1352 }
 0x6e0   :  { %1356 = vst.msk [vmem:[#allocation2 + $0x8] sm:$0x3] %vm904_vm15, %v1353_v61  ;;  %2197 = vmatmul.msk.f32.vlgmr.msra.gmra.mxu3 %vm456_vm5, %v1353_v61 }
 0x6e1   :  { %1545 = vmatpush.msra.mxu3 %v3524_v1  ;;  %v328_v1 = vpop.permute.xlu1 %327 }
 0x6e3   :  { %1546 = vmatpush.msra.mxu3 %v3533_v55 }
 0x6e5   :  { %1547 = vmatpush.msra.mxu3 %v3543_v26  ;;  %v4145_v26 = vld [vmem:[#allocation19_spill] sm:$0xff] }
 0x6e7   :  { %1548 = vmatpush.msra.mxu3 %v3554_v31  ;;  %v1598_v16 = vld [vmem:[#allocation2 + $0x8] sm:$0x3]  ;;  %v369_v55 = vpop.permute.xlu2 %368  ;;  %v453_v31 = vsel %vm176_vm0, %v4145_v26, %v3650_v0 }
 0x6e8   :  { %2198 = vmatmul.msk.f32.vlgmr.msrb.gmra.mxu3 %vm456_vm5, %v1353_v61  ;;  %v3689_v29 = vsel %vm176_vm0, %v1597_v25, %v1598_v16  ;;  %v3692_v45 = vsel %vm176_vm0, %v1598_v16, %v1597_v25  ;;  %v462_v51 = vsel %vm456_vm5, %v453_v31, %v328_v1 }
 0x6e9   :  { %1549 = vmatpush.msra.mxu3 %v3562_v22  ;;  %1789 = vst [vmem:[#allocation1 + $0x3] ss:$4 sm:$0xff] %v3689_v29  ;;  %v471_v7 = vsel %vm465_vm6, %v462_v51, %v369_v55 }
 0x6ea   :  { %1791 = vst [vmem:[#allocation1 + $0x20] ss:$4 sm:$0xff] %v3692_v45 }
 0x6eb   :  { %1550 = vmatpush.msra.mxu3 %v3571_v41 }
 0x6ed   :  { %1551 = vmatpush.msra.mxu3 %v3580_v13 }
 0x6ef   :  { %1552 = vmatpush.msra.mxu3 %v3589_v43 }
 0x763   :  { %v1376_v56 = vpop.f32.mrf.mxu3 }
 0x764   :  { %v1377_v22 = vadd.f32 %v1376_v56, %v3652_v8 }
 0x766   :  { %v1399_v2 = vadd.f32 %v1377_v22, %v471_v7 }
 0x768   :  { %v1400_v15 = vsub.f32 0.0, %v1399_v2 }
 0x76a   :  { %v1401_v41 = vmul.f32 1.442695, %v1400_v15 }
 0x76b   :  { %v1396_v36 = vpop.f32.mrf.mxu3 }
 0x76c   :  { %2271 = vpow2.f32 %v1401_v41  ;;  %v1397_v37 = vadd.f32 %v1396_v36, %v3665_v27  ;;  %v4151_v36 = vld [vmem:[#allocation33_spill] sm:$0xff] }
 0x772   :  { %v2272_v13 = vpop.eup %2271 }
 0x773   :  { %v1403_v21 = vadd.f32 1.0, %v2272_v13 }
 0x775   :  { %2273 = vrcp.f32 %v1403_v21  ;;  %v1415_v44 = vand.u32 2147483648, %v1403_v21  ;;  %v1413_v0 = vand.u32 2147483647, %v1403_v21  ;;  %vm1409_vm11 = vweird.f32 %v1403_v21 }
 0x777   :  { %v1416_v19 = vor.u32 1.1754944e-38, %v1415_v44  ;;  %vm1414_vm13 = vcmp.eq.f32.partialorder %v1413_v0, 8.507059e+37 }
 0x77b   :  { %v2274_v43 = vpop.eup %2273 }
 0x77c   :  { %v1405_v63 = vmul.f32 %v2274_v43, %v1403_v21  ;;  %vm1410_vm10 = vweird.f32 %v2274_v43 }
 0x77d   :  { %vm1411_vm12 = vmor %vm1409_vm11, %vm1410_vm10 }
 0x77e   :  { %v1406_v17 = vsub.f32 1.0, %v1405_v63 }
 0x780   :  { %v1407_v35 = vmul.f32 %v2274_v43, %v1406_v17  ;;  %v4150_v17 = vld [vmem:[#allocation52_spill] sm:$0xff] }
 0x781   :  { %v480_v44 = vsel %vm176_vm0, %v3663_v23, %v4150_v17  ;;  %v1595_v23 = vld [vmem:[#allocation2 + $0x2] sm:$0x3]  ;;  %v1647_v17 = vperm.slane %v3635_v32, 4 }
 0x782   :  { %v1408_v54 = vadd.f32 %v2274_v43, %v1407_v35 }
 0x784   :  { %v1412_v52 = vsel %vm1411_vm12, %v2274_v43, %v1408_v54 }
 0x785   :  { %v1417_v20 = vsel %vm1414_vm13, %v1416_v19, %v1412_v52 }
 0x786   :  { %v1419_v28 = vmul.f32 %v1417_v20, %v1397_v37  ;;  %v1422_v30 = vsub.f32 1.0, %v1417_v20  ;;  %v1428_v57 = vmul.f32 %v1417_v20, %v1350_v53 }
 0x788   :  { %v1420_v34 = vadd.f32 %v1419_v28, %v479_v42  ;;  %v4152_v28 = vld [vmem:[#allocation39_spill] sm:$0xff] }
 0x78a   :  { %2275 = vtanh.f32 %v1420_v34 }
 0x790   :  { %v2276_v38 = vpop.eup %2275 }
 0x791   :  { %1424 = vrot.lane.b32.xlu1 %v2276_v38, %s2483_s9 }
 0x799   :  { %329 = vrot.lane.b32.xlu1 %v4147_v14, %s2481_s5 }
 0x803   :  { %v1425_v50 = vpop.permute.xlu1 %1424 }
 0x804   :  { %v1427_v58 = vmul.f32 %v1425_v50, %v1422_v30  ;;  %v4153_v50 = vld [vmem:[#allocation18_spill] sm:$0xff] }
 0x806   :  { %v1429_v47 = vadd.f32 %v1428_v57, %v1427_v58  ;;  %v455_v57 = vsel %vm176_vm0, %v4153_v50, %v3667_v48 }
 0x808   :  { %1431 = vrot.lane.b32.xlu2 %v1429_v47, %s2483_s9 }
 0x80b   :  { %v330_v60 = vpop.permute.xlu1 %329 }
 0x80c   :  { %v463_v53 = vsel %vm456_vm5, %v454_v5, %v330_v60 }
 0x810   :  { %370 = vrot.lane.b32.xlu2 %v4148_v62, %s2482_s8 }
 0x862   :  { %v1432_v3 = vpop.permute.xlu2 %1431 }
 0x863   :  { %1435 = vst.msk [vmem:[#allocation2 + $0xa] sm:$0x3] %vm904_vm15, %v1432_v3  ;;  %2199 = vmatmul.msk.f32.vlgmr.msrb.gmra.mxu0 %vm456_vm5, %v1432_v3  ;;  %2200 = vmatmul.msk.f32.vlgmr.msrb.gmra.mxu1 %vm456_vm5, %v1432_v3 }
 0x86a   :  { %v1599_v6 = vld [vmem:[#allocation2 + $0xa] sm:$0x3]  ;;  %v371_v12 = vpop.permute.xlu2 %370 }
 0x86b   :  { %v3720_v10 = vsel %vm176_vm0, %v1596_v46, %v1599_v6  ;;  %v3723_v11 = vsel %vm176_vm0, %v1599_v6, %v1596_v46  ;;  %v472_v61 = vsel %vm465_vm6, %v463_v53, %v371_v12 }
 0x86c   :  { %1787 = vst [vmem:[#allocation1 + $0x2] ss:$4 sm:$0xff] %v3720_v10 }
 0x86d   :  { %1793 = vst [vmem:[#allocation1 + $0x21] ss:$4 sm:$0xff] %v3723_v11 }
 0x8e0   :  { %v1455_v18 = vpop.f32.mrf.mxu0  ;;  %v1475_v2 = vpop.f32.mrf.mxu1 }
 0x8e1   :  { %v1456_v39 = vadd.f32 %v1455_v18, %v3652_v8  ;;  %v1476_v13 = vadd.f32 %v1475_v2, %v3665_v27  ;;  %v1661_v2 = vperm.slane %v3635_v32, 6 }
 0x8e3   :  { %v1478_v25 = vadd.f32 %v1456_v39, %v472_v61 }
 0x8e5   :  { %v1479_v16 = vsub.f32 0.0, %v1478_v25 }
 0x8e7   :  { %v1480_v1 = vmul.f32 1.442695, %v1479_v16 }
 0x8e9   :  { %2277 = vpow2.f32 %v1480_v1 }
 0x8ef   :  { %v2278_v55 = vpop.eup %2277 }
 0x8f0   :  { %v1482_v26 = vadd.f32 1.0, %v2278_v55 }
 0x8f2   :  { %2279 = vrcp.f32 %v1482_v26  ;;  %v1494_v22 = vand.u32 2147483648, %v1482_v26  ;;  %v1492_v40 = vand.u32 2147483647, %v1482_v26  ;;  %vm1488_vm1 = vweird.f32 %v1482_v26 }
 0x8f4   :  { %v1495_v41 = vor.u32 1.1754944e-38, %v1494_v22  ;;  %vm1493_vm3 = vcmp.eq.f32.partialorder %v1492_v40, 8.507059e+37  ;;  %v1626_v40 = vperm.slane %v3635_v32, 1 }
 0x8f8   :  { %v2280_v31 = vpop.eup %2279 }
 0x8f9   :  { %v1484_v56 = vmul.f32 %v2280_v31, %v1482_v26  ;;  %vm1489_vm14 = vweird.f32 %v2280_v31 }
 0x8fa   :  { %vm1490_vm2 = vmor %vm1488_vm1, %vm1489_vm14 }
 0x8fb   :  { %v1485_v51 = vsub.f32 1.0, %v1484_v56  ;;  %v4154_v56 = vld [vmem:[#allocation55_spill] sm:$0xff] }
 0x8fd   :  { %v1486_v7 = vmul.f32 %v2280_v31, %v1485_v51  ;;  %v481_v51 = vsel %vm176_vm0, %v3672_v59, %v4154_v56 }
 0x8ff   :  { %v1487_v15 = vadd.f32 %v2280_v31, %v1486_v7 }
 0x901   :  { %v1491_v21 = vsel %vm1490_vm2, %v2280_v31, %v1487_v15  ;;  %v1724_v15 = vperm.slane %v3642_v33, 1 }
 0x902   :  { %v1496_v43 = vsel %vm1493_vm3, %v1495_v41, %v1491_v21 }
 0x903   :  { %v1498_v63 = vmul.f32 %v1496_v43, %v1476_v13  ;;  %v1501_v54 = vsub.f32 1.0, %v1496_v43  ;;  %v1507_v37 = vmul.f32 %v1496_v43, %v1429_v47 }
 0x905   :  { %v1499_v35 = vadd.f32 %v1498_v63, %v480_v44  ;;  %v1633_v63 = vperm.slane %v3635_v32, 2  ;;  %v1668_v44 = vperm.slane %v3635_v32, 7 }
 0x907   :  { %2281 = vtanh.f32 %v1499_v35  ;;  %v1731_v35 = vperm.slane %v3642_v33, 2  ;;  %v1766_v33 = vld [vmem:[#allocation9] sm:$0xff] }
 0x90d   :  { %v2282_v0 = vpop.eup %2281 }
 0x90e   :  { %1503 = vrot.lane.b32.xlu1 %v2282_v0, %s2483_s9  ;;  %v1773_v0 = vld [vmem:[#allocation9 + $0x38] sm:$0xff] }
 0x90f   :  { %1812 = vmatpush.msra.mxu0 %v1773_v0 }
 0x916   :  { %331 = vrot.lane.b32.xlu1 %v4151_v36, %s2481_s5  ;;  %v1772_v36 = vld [vmem:[#allocation9 + $0x30] sm:$0xff] }
 0x917   :  { %1813 = vmatpush.msra.mxu0 %v1772_v36 }
 0x980   :  { %v1504_v19 = vpop.permute.xlu1 %1503 }
 0x981   :  { %v1506_v52 = vmul.f32 %v1504_v19, %v1501_v54  ;;  %v1771_v54 = vld [vmem:[#allocation9 + $0x28] sm:$0xff]  ;;  %v1770_v19 = vld [vmem:[#allocation9 + $0x20] sm:$0xff] }
 0x982   :  { %1814 = vmatpush.msra.mxu0 %v1771_v54 }
 0x983   :  { %v1508_v20 = vadd.f32 %v1507_v37, %v1506_v52  ;;  %v1998_v37 = vld [vmem:[#allocation10 + $0x38] sm:$0xff]  ;;  %v1997_v52 = vld [vmem:[#allocation10 + $0x30] sm:$0xff] }
 0x984   :  { %1815 = vmatpush.msra.mxu0 %v1770_v19  ;;  %2022 = vmatpush.msra.mxu1 %v1998_v37 }
 0x985   :  { %1510 = vrot.lane.b32.xlu2 %v1508_v20, %s2483_s9 }
 0x986   :  { %2023 = vmatpush.msra.mxu1 %v1997_v52 }
 0x988   :  { %v332_v14 = vpop.permute.xlu1 %331 }
 0x989   :  { %v464_v47 = vsel %vm456_vm5, %v455_v57, %v332_v14  ;;  %v1992_v14 = vld [vmem:[#allocation10 + $0x8] sm:$0xff] }
 0x98d   :  { %372 = vrot.lane.b32.xlu2 %v4152_v28, %s2482_s8  ;;  %v1996_v28 = vld [vmem:[#allocation10 + $0x28] sm:$0xff] }
 0x98e   :  { %2024 = vmatpush.msra.mxu1 %v1996_v28 }
 0x9df   :  { %v1511_v9 = vpop.permute.xlu2 %1510 }
 0x9e0   :  { %1514 = vst.msk [vmem:[#allocation2 + $0xc] sm:$0x3] %vm904_vm15, %v1511_v9  ;;  %2201 = vmatmul.msk.f32.vlgmr.msra.gmra.mxu2 %vm456_vm5, %v1511_v9  ;;  %2202 = vmatmul.msk.f32.vlgmr.msra.gmra.mxu3 %vm456_vm5, %v1511_v9  ;;  %v1995_v9 = vld [vmem:[#allocation10 + $0x20] sm:$0xff] }
 0x9e1   :  { %2025 = vmatpush.msra.mxu1 %v1995_v9 }
 0x9e7   :  { %v1600_v42 = vld [vmem:[#allocation2 + $0xc] sm:$0x3]  ;;  %v373_v30 = vpop.permute.xlu2 %372 }
 0x9e8   :  { %v3747_v34 = vsel %vm176_vm0, %v1595_v23, %v1600_v42  ;;  %v3750_v38 = vsel %vm176_vm0, %v1600_v42, %v1595_v23  ;;  %v473_v3 = vsel %vm465_vm6, %v464_v47, %v373_v30  ;;  %v1994_v23 = vld [vmem:[#allocation10 + $0x18] sm:$0xff]  ;;  %v1993_v42 = vld [vmem:[#allocation10 + $0x10] sm:$0xff]  ;;  %v1991_v30 = vld [vmem:[#allocation10] sm:$0xff] }
 0x9e9   :  { %1785 = vst [vmem:[#allocation1 + $0x1] ss:$4 sm:$0xff] %v3747_v34  ;;  %2026 = vmatpush.msra.mxu1 %v1994_v23 }
 0x9ea   :  { %1795 = vst [vmem:[#allocation1 + $0x22] ss:$4 sm:$0xff] %v3750_v38 }
 0x9eb   :  { %2027 = vmatpush.msra.mxu1 %v1993_v42 }
 0x9ed   :  { %2028 = vmatpush.msra.mxu1 %v1992_v14 }
 0x9ef   :  { %2029 = vmatpush.msra.mxu1 %v1991_v30 }
 0xa63   :  { %v1534_v58 = vpop.f32.mrf.mxu2  ;;  %v1554_v25 = vpop.f32.mrf.mxu3 }
 0xa64   :  { %v1535_v62 = vadd.f32 %v1534_v58, %v3652_v8  ;;  %v1555_v1 = vadd.f32 %v1554_v25, %v3665_v27  ;;  %v1640_v27 = vperm.slane %v3635_v32, 3  ;;  %v1767_v32 = vld [vmem:[#allocation9 + $0x8] sm:$0xff] }
 0xa65   :  { %v1594_v58 = vld [vmem:[#allocation2] sm:$0x3] }
 0xa66   :  { %v1557_v46 = vadd.f32 %v1535_v62, %v473_v3 }
 0xa68   :  { %v1558_v6 = vsub.f32 0.0, %v1557_v46  ;;  %v1602_v46 = vld [vmem:[#allocation3] sm:$0x3] }
 0xa6a   :  { %v1559_v60 = vmul.f32 1.442695, %v1558_v6  ;;  %v1605_v6 = vld [vmem:[#allocation3 + $0x6] sm:$0x3] }
 0xa6c   :  { %2283 = vpow2.f32 %v1559_v60 }
 0xa72   :  { %v2284_v12 = vpop.eup %2283 }
 0xa73   :  { %v1561_v24 = vadd.f32 1.0, %v2284_v12 }
 0xa75   :  { %2285 = vrcp.f32 %v1561_v24  ;;  %v1573_v39 = vand.u32 2147483648, %v1561_v24  ;;  %v1571_v48 = vand.u32 2147483647, %v1561_v24  ;;  %vm1567_vm8 = vweird.f32 %v1561_v24 }
 0xa77   :  { %v1574_v8 = vor.u32 1.1754944e-38, %v1573_v39  ;;  %vm1572_vm6 = vcmp.eq.f32.partialorder %v1571_v48, 8.507059e+37  ;;  %v3802_v39 = vsel %vm176_vm0, %v1605_v6, %v1602_v46 }
 0xa7b   :  { %v2286_v5 = vpop.eup %2285 }
 0xa7c   :  { %v1563_v18 = vmul.f32 %v2286_v5, %v1561_v24  ;;  %vm1568_vm7 = vweird.f32 %v2286_v5  ;;  %v3790_v24 = vsel %vm176_vm0, %v1602_v46, %v1605_v6 }
 0xa7d   :  { %vm1569_vm9 = vmor %vm1567_vm8, %vm1568_vm7 }
 0xa7e   :  { %v1564_v53 = vsub.f32 1.0, %v1563_v18 }
 0xa80   :  { %v1565_v61 = vmul.f32 %v2286_v5, %v1564_v53 }
 0xa82   :  { %v1566_v16 = vadd.f32 %v2286_v5, %v1565_v61 }
 0xa84   :  { %v1570_v55 = vsel %vm1569_vm9, %v2286_v5, %v1566_v16 }
 0xa85   :  { %v1575_v26 = vsel %vm1572_vm6, %v1574_v8, %v1570_v55  ;;  %v1625_v8 = vpop.permute.xlu0 %1624 }
 0xa86   :  { %v1577_v31 = vmul.f32 %v1575_v26, %v1555_v1  ;;  %v1580_v59 = vsub.f32 1.0, %v1575_v26  ;;  %v1586_v13 = vmul.f32 %v1575_v26, %v1508_v20  ;;  %v1768_v20 = vld [vmem:[#allocation9 + $0x10] sm:$0xff]  ;;  %v1698_v1 = vsel %vm233_vm4, %v1625_v8, 0.0 }
 0xa88   :  { %v1578_v22 = vadd.f32 %v1577_v31, %v481_v51 }
 0xa8a   :  { %2287 = vtanh.f32 %v1578_v22 }
 0xa8d   :  { %v1660_v22 = vpop.permute.xlu0 %1659 }
 0xa90   :  { %v2288_v7 = vpop.eup %2287 }
 0xa91   :  { %1582 = vrot.lane.b32.xlu1 %v2288_v7, %s2483_s9 }
 0xa99   :  { %1021 = vrot.lane.b32.xlu1 %v3463_v4, %s2483_s9 }
 0xaa1   :  { %1631 = vperm.xlu1 %2220, %v1626_v40  }
 0xaa9   :  { %1645 = vperm.xlu1 %2220, %v1640_v27  }
 0xab1   :  { %1666 = vperm.xlu1 %2220, %v1661_v2  }
 0xab9   :  { %1729 = vperm.xlu1 %2220, %v1724_v15  }
 0xb03   :  { %v1583_v41 = vpop.permute.xlu1 %1582 }
 0xb04   :  { %v1585_v21 = vmul.f32 %v1583_v41, %v1580_v59 }
 0xb06   :  { %v1587_v43 = vadd.f32 %v1586_v13, %v1585_v21  ;;  %v1707_v13 = vsel %vm233_vm4, %v1660_v22, 0.0  ;;  %v1723_v21 = vpop.permute.xlu0 %1722 }
 0xb08   :  { %1589 = vrot.lane.b32.xlu2 %v1587_v43, %s2483_s9 }
 0xb0b   :  { %v1022_v4 = vpop.permute.xlu1 %1021 }
 0xb0c   :  { %1025 = vst.msk [vmem:[#allocation3 + $0x2] sm:$0x3] %vm904_vm15, %v1022_v4  ;;  %v1756_v4 = vsel %vm233_vm4, %v1723_v21, 0.0 }
 0xb0e   :  { %v1744_v42 = vpop.permute.xlu0 %1743 }
 0xb10   :  { %1136 = vrot.lane.b32.xlu2 %v3508_v49, %s2483_s9  ;;  %v1769_v49 = vld [vmem:[#allocation9 + $0x18] sm:$0xff] }
 0xb11   :  { %1816 = vmatpush.msra.mxu0 %v1769_v49 }
 0xb13   :  { %1817 = vmatpush.msra.mxu0 %v1768_v20  ;;  %v1603_v60 = vld [vmem:[#allocation3 + $0x2] sm:$0x3]  ;;  %v1632_v25 = vpop.permute.xlu1 %1631 }
 0xb14   :  { %v1699_v55 = vsel %vm233_vm4, %v1632_v25, 0.0 }
 0xb15   :  { %1818 = vmatpush.msra.mxu0 %v1767_v32  ;;  %v1700_v56 = vadd.f32 %v1699_v55, %v1698_v1 }
 0xb17   :  { %1819 = vmatpush.msra.mxu0 %v1766_v33 }
 0xb18   :  { %1638 = vperm.xlu2 %2221, %v1633_v63  }
 0xb1b   :  { %v1646_v26 = vpop.permute.xlu1 %1645 }
 0xb1c   :  { %v1703_v40 = vsel %vm233_vm4, %v1646_v26, 0.0  ;;  %v1678_v9 = vmul.f32 %v1646_v26, %v3689_v29 }
 0xb20   :  { %1652 = vperm.xlu2 %2221, %v1647_v17   ;;  %v1676_v17 = vmul.f32 %v1632_v25, %v3747_v34 }
 0xb22   :  { %v1684_v37 = vsel %vm904_vm15, %v1676_v17, 0.0 }
 0xb23   :  { %v1667_v27 = vpop.permute.xlu1 %1666 }
 0xb24   :  { %v1709_v36 = vsel %vm233_vm4, %v1667_v27, 0.0 }
 0xb28   :  { %1673 = vperm.xlu2 %2221, %v1668_v44  }
 0xb2b   :  { %v1730_v63 = vpop.permute.xlu1 %1729 }
 0xb30   :  { %1736 = vperm.xlu2 %2221, %v1731_v35   ;;  %v1757_v35 = vsel %vm233_vm4, %v1730_v63, 0.0 }
 0xb31   :  { %v1758_v49 = vadd.f32 %v1757_v35, %v1756_v4 }
 0xb62   :  { %v1590_v50 = vpop.permute.xlu2 %1589 }
 0xb63   :  { %1593 = vst.msk [vmem:[#allocation2 + $0xe] sm:$0x3] %vm904_vm15, %v1590_v50  ;;  %v1761_v50 = vsel %vm233_vm4, %v1744_v42, 0.0 }
 0xb6a   :  { %v1137_v57 = vpop.permute.xlu2 %1136  ;;  %v1601_v47 = vld [vmem:[#allocation2 + $0xe] sm:$0x3] }
 0xb6b   :  { %1140 = vst.msk [vmem:[#allocation3 + $0x4] sm:$0x3] %vm904_vm15, %v1137_v57  ;;  %v3782_v62 = vsel %vm176_vm0, %v1594_v58, %v1601_v47  ;;  %v3785_v3 = vsel %vm176_vm0, %v1601_v47, %v1594_v58  ;;  %v1688_v58 = vsel %vm904_vm15, %v1678_v9, 0.0  ;;  %v1680_v47 = vmul.f32 %v1660_v22, %v3723_v11 }
 0xb6c   :  { %1783 = vst [vmem:[#allocation1] ss:$4 sm:$0xff] %v3782_v62  ;;  %v1675_v43 = vmul.f32 %v1625_v8, %v3782_v62 }
 0xb6d   :  { %1797 = vst [vmem:[#allocation1 + $0x23] ss:$4 sm:$0xff] %v3785_v3  ;;  %v1692_v25 = vsel %vm904_vm15, %v1680_v47, 0.0 }
 0xb6e   :  { %v1683_v19 = vsel %vm904_vm15, %v1675_v43, 0.0 }
 0xb6f   :  { %v1685_v32 = vadd.f32 %v1684_v37, %v1683_v19  ;;  %v1748_v37 = vmul.f32 %v1744_v42, %v3802_v39 }
 0xb72   :  { %v1604_v12 = vld [vmem:[#allocation3 + $0x4] sm:$0x3]  ;;  %v1639_v16 = vpop.permute.xlu2 %1638 }
 0xb73   :  { %v3793_v5 = vsel %vm176_vm0, %v1603_v60, %v1604_v12  ;;  %v3796_v18 = vsel %vm176_vm0, %v1604_v12, %v1603_v60  ;;  %v1798_v53 = vld.sshfl [vmem:[#allocation1] sm:$0xff pattern:$0x73625140]  ;;  %v1701_v51 = vsel %vm233_vm4, %v1639_v16, 0.0  ;;  %v1677_v44 = vmul.f32 %v1639_v16, %v3720_v10 }
 0xb74   :  { %2203 = vmatmul.msk.f32.vlgmr.msra.gmra.mxu0 %vm456_vm5, %v1798_v53  ;;  %2004 = vst [vmem:[#allocation1] ss:$4 sm:$0xff] %v3790_v24  ;;  %v1799_v61 = vld.sshfl [vmem:[#allocation1 + $0x20] sm:$0xff pattern:$0x73625140]  ;;  %v1702_v7 = vadd.f32 %v1701_v51, %v1700_v56  ;;  %v1681_v16 = vmul.f32 %v1667_v27, %v3750_v38  ;;  %v1746_v8 = vmul.f32 %v1730_v63, %v3793_v5 }
 0xb75   :  { %2006 = vst [vmem:[#allocation1 + $0x1] ss:$4 sm:$0xff] %v3793_v5  ;;  %v1686_v52 = vsel %vm904_vm15, %v1677_v44, 0.0  ;;  %v2223_v53 = vld [vmem:[%s4035_s17] ss:$0 sm:$0xff] }
 0xb76   :  { %2008 = vst [vmem:[#allocation1 + $0x2] ss:$4 sm:$0xff] %v3796_v18  ;;  %v1704_v15 = vadd.f32 %v1703_v40, %v1702_v7  ;;  %v1687_v14 = vadd.f32 %v1686_v52, %v1685_v32  ;;  %v1745_v7 = vmul.f32 %v1723_v21, %v3790_v24  ;;  %v1750_v43 = vsel %vm904_vm15, %v1746_v8, 0.0 }
 0xb77   :  { %2010 = vst [vmem:[#allocation1 + $0x3] ss:$4 sm:$0xff] %v3802_v39 }
 0xb78   :  { %v1689_v6 = vadd.f32 %v1688_v58, %v1687_v14  ;;  %v1749_v35 = vsel %vm904_vm15, %v1745_v7, 0.0 }
 0xb7a   :  { %v1653_v31 = vpop.permute.xlu2 %1652 }
 0xb7b   :  { %v1705_v59 = vsel %vm233_vm4, %v1653_v31, 0.0  ;;  %v1679_v23 = vmul.f32 %v1653_v31, %v3692_v45  ;;  %v3841_v31 = vld [vmem:[%s4033_s15] ss:$0 sm:$0xff] }
 0xb7c   :  { %2204 = vmatmul.msk.f32.gmra.mxu0 %vm456_vm5, %v1799_v61  ;;  %v1706_v41 = vadd.f32 %v1705_v59, %v1704_v15 }
 0xb7d   :  { %v1690_v46 = vsel %vm904_vm15, %v1679_v23, 0.0 }
 0xb7e   :  { %v2011_v48 = vld.sshfl [vmem:[#allocation1] sm:$0xff pattern:$0x73625140]  ;;  %v1708_v0 = vadd.f32 %v1707_v13, %v1706_v41  ;;  %v1691_v61 = vadd.f32 %v1690_v46, %v1689_v6  ;;  %v1694_v13 = vsel %vm904_vm15, %v1681_v16, 0.0 }
 0xb7f   :  { %2205 = vmatmul.msk.f32.vlgmr.msra.gmra.mxu1 %vm456_vm5, %v2011_v48 }
 0xb80   :  { %v1710_v20 = vadd.f32 %v1709_v36, %v1708_v0  ;;  %v1693_v40 = vadd.f32 %v1692_v25, %v1691_v61 }
 0xb82   :  { %v1674_v2 = vpop.permute.xlu2 %1673  ;;  %v1695_v17 = vadd.f32 %v1694_v13, %v1693_v40 }
 0xb83   :  { %v1711_v33 = vsel %vm233_vm4, %v1674_v2, 0.0  ;;  %v1682_v1 = vmul.f32 %v1674_v2, %v3785_v3 }
 0xb84   :  { %v1712_v57 = vadd.f32 %v1711_v33, %v1710_v20 }
 0xb85   :  { %v1696_v4 = vsel %vm904_vm15, %v1682_v1, 0.0 }
 0xb86   :  { %v1713_v12 = vmax.f32 %v1712_v57, 1e-09  ;;  %v1697_v19 = vadd.f32 %v1696_v4, %v1695_v17  ;;  %v1754_v57 = vsel %vm904_vm15, %v1748_v37, 0.0 }
 0xb88   :  { %2289 = vrcp.f32 %v1713_v12 }
 0xb8a   :  { %v1737_v54 = vpop.permute.xlu2 %1736 }
 0xb8b   :  { %v1759_v28 = vsel %vm233_vm4, %v1737_v54, 0.0  ;;  %v1747_v27 = vmul.f32 %v1737_v54, %v3796_v18  ;;  %v1751_v54 = vadd.f32 %v1750_v43, %v1749_v35 }
 0xb8c   :  { %v1760_v30 = vadd.f32 %v1759_v28, %v1758_v49 }
 0xb8d   :  { %v1752_v0 = vsel %vm904_vm15, %v1747_v27, 0.0 }
 0xb8e   :  { %v1762_v60 = vadd.f32 %v1761_v50, %v1760_v30  ;;  %v2290_v21 = vpop.eup %2289  ;;  %v1753_v32 = vadd.f32 %v1752_v0, %v1751_v54 }
 0xb8f   :  { %v1715_v28 = vmul.f32 %v2290_v21, %v1697_v19 }
 0xb90   :  { %v1763_v55 = vmax.f32 %v1762_v60, 1e-09  ;;  %v1755_v46 = vadd.f32 %v1754_v57, %v1753_v32 }
 0xb92   :  { %2291 = vrcp.f32 %v1763_v55 }
 0xb98   :  { %v2292_v20 = vpop.eup %2291 }
 0xb99   :  { %v1765_v25 = vmul.f32 %v2292_v20, %v1755_v46 }
 0xbf1   :  { %v1821_v48 = vpop.f32.mrf.mxu0 }
 0xbf2   :  { %v1830_v59 = vrot.slane %v1821_v48, 4  ;;  %v1844_v63 = vadd.f32 %v3841_v31, %v1821_v48  ;;  %v1831_v52 = vrot.slane %v1821_v48, 6  ;;  %v1829_v33 = vrot.slane %v1821_v48, 2 }
 0xbf4   :  { %v1846_v36 = vadd.f32 %v3841_v31, %v1830_v59  ;;  %v1847_v58 = vadd.f32 %v3841_v31, %v1831_v52  ;;  %v1845_v42 = vadd.f32 %v3841_v31, %v1829_v33 }
 0xbf9   :  { %v1824_v49 = vpop.f32.mrf.mxu0 }
 0xbfa   :  { %v1832_v23 = vrot.slane %v1824_v49, 2  ;;  %v1833_v1 = vrot.slane %v1824_v49, 4 }
 0xbfc   :  { %v2031_v26 = vpop.f32.mrf.mxu1 }
 0xbfd   :  { %v2035_v56 = vrot.slane %v2031_v26, 2  ;;  %v2036_v51 = vrot.slane %v2031_v26, 4  ;;  %v2044_v22 = vadd.f32 %v2223_v53, %v2031_v26  ;;  %v2037_v15 = vrot.slane %v2031_v26, 6 }
 0xbff   :  { %v2045_v41 = vadd.f32 %v2223_v53, %v2035_v56  ;;  %v2046_v2 = vadd.f32 %v2223_v53, %v2036_v51  ;;  %2293 = vtanh.f32 %v2044_v22  ;;  %v2047_v44 = vadd.f32 %v2223_v53, %v2037_v15 }
 0xc00   :  { %v1849_v53 = vadd.f32 %v3841_v31, %v1832_v23  ;;  %v1850_v51 = vadd.f32 %v3841_v31, %v1833_v1  ;;  %v1848_v22 = vadd.f32 %v3841_v31, %v1824_v49 }
 0xc01   :  { %2295 = vtanh.f32 %v2045_v41 }
 0xc02   :  { %2297 = vtanh.f32 %v2046_v2  ;;  %v1834_v2 = vrot.slane %v1824_v49, 6 }
 0xc03   :  { %2299 = vtanh.f32 %v1844_v63 }
 0xc04   :  { %2301 = vtanh.f32 %v2047_v44  ;;  %v1851_v63 = vadd.f32 %v3841_v31, %v1834_v2 }
 0xc05   :  { %v2294_v9 = vpop.eup %2293  ;;  %2303 = vtanh.f32 %v1846_v36 }
 0xc06   :  { %v2052_v30 = vmul.f32 %v2294_v9, %v1715_v28  ;;  %2305 = vtanh.f32 %v1847_v58 }
 0xc07   :  { %v2296_v14 = vpop.eup %2295  ;;  %2307 = vtanh.f32 %v1845_v42 }
 0xc08   :  { %v2298_v50 = vpop.eup %2297  ;;  %v2053_v47 = vmul.f32 %v2296_v14, %v1715_v28  ;;  %v2056_v6 = vsel %vm904_vm15, %v2052_v30, 0.0  ;;  %2309 = vtanh.f32 %v1849_v53 }
 0xc09   :  { %v2054_v60 = vmul.f32 %v2298_v50, %v1715_v28  ;;  %v2300_v12 = vpop.eup %2299  ;;  %2057 = vadd.xlane.f32.xlu1 %v2056_v6  ;;  %2311 = vtanh.f32 %v1850_v51 }
 0xc0a   :  { %v2059_v61 = vsel %vm904_vm15, %v2053_v47, 0.0  ;;  %v2302_v48 = vpop.eup %2301  ;;  %v1860_v55 = vmul.f32 %v2300_v12, %v1765_v25  ;;  %2313 = vtanh.f32 %v1848_v22 }
 0xc0b   :  { %v2062_v16 = vsel %vm904_vm15, %v2054_v60, 0.0  ;;  %2060 = vadd.xlane.f32.xlu2 %v2059_v61  ;;  %v2304_v8 = vpop.eup %2303  ;;  %v2055_v26 = vmul.f32 %v2302_v48, %v1715_v28  ;;  %2315 = vtanh.f32 %v1851_v63 }
 0xc0c   :  { %2063 = vadd.xlane.f32.xlu0 %v2062_v16  ;;  %v1862_v56 = vmul.f32 %v2304_v8, %v1765_v25  ;;  %v1868_v7 = vsel %vm904_vm15, %v1860_v55, 0.0  ;;  %v2306_v40 = vpop.eup %2305 }
 0xc0d   :  { %v2065_v15 = vsel %vm904_vm15, %v2055_v26, 0.0  ;;  %v2308_v27 = vpop.eup %2307  ;;  %v1863_v13 = vmul.f32 %v2306_v40, %v1765_v25 }
 0xc0e   :  { %v1874_v59 = vsel %vm904_vm15, %v1862_v56, 0.0  ;;  %v2310_v41 = vpop.eup %2309  ;;  %v1861_v43 = vmul.f32 %v2308_v27, %v1765_v25 }
 0xc0f   :  { %v1865_v4 = vmul.f32 %v2310_v41, %v1765_v25  ;;  %v1877_v17 = vsel %vm904_vm15, %v1863_v13, 0.0  ;;  %v2312_v44 = vpop.eup %2311 }
 0xc10   :  { %v1871_v21 = vsel %vm904_vm15, %v1861_v43, 0.0  ;;  %v2314_v35 = vpop.eup %2313  ;;  %v1866_v36 = vmul.f32 %v2312_v44, %v1765_v25 }
 0xc11   :  { %1869 = vadd.xlane.f32.xlu1 %v1868_v7  ;;  %v1883_v0 = vsel %vm904_vm15, %v1865_v4, 0.0  ;;  %v1864_v54 = vmul.f32 %v2314_v35, %v1765_v25  ;;  %v2316_v31 = vpop.eup %2315 }
 0xc12   :  { %v1886_v19 = vsel %vm904_vm15, %v1866_v36, 0.0  ;;  %v1867_v37 = vmul.f32 %v2316_v31, %v1765_v25 }
 0xc13   :  { %2066 = vadd.xlane.f32.xlu2 %v2065_v15  ;;  %v1880_v49 = vsel %vm904_vm15, %v1864_v54, 0.0 }
 0xc14   :  { %1875 = vadd.xlane.f32.xlu0 %v1874_v59  ;;  %v1889_v52 = vsel %vm904_vm15, %v1867_v37, 0.0 }
 0xc19   :  { %1878 = vadd.xlane.f32.xlu1 %v1877_v17 }
 0xc1b   :  { %1872 = vadd.xlane.f32.xlu2 %v1871_v21 }
 0xc1c   :  { %1884 = vadd.xlane.f32.xlu0 %v1883_v0 }
 0xc21   :  { %1887 = vadd.xlane.f32.xlu1 %v1886_v19 }
 0xc23   :  { %1881 = vadd.xlane.f32.xlu2 %v1880_v49 }
 0xc2b   :  { %1890 = vadd.xlane.f32.xlu2 %v1889_v52 }
 0xc7c   :  { %v2058_v28 = vpop.xlane.xlu1 %2057 }
 0xc7d   :  { %v2068_v23 = vsel %vm233_vm4, %v2058_v28, -inf }
 0xc7e   :  { %v2061_v20 = vpop.xlane.xlu2 %2060 }
 0xc7f   :  { %v2064_v32 = vpop.xlane.xlu0 %2063  ;;  %v2069_v33 = vsel %vm233_vm4, %v2061_v20, -inf }
 0xc80   :  { %v2070_v14 = vsel %vm233_vm4, %v2064_v32, -inf  ;;  %v2072_v50 = vmax.f32 %v2068_v23, %v2069_v33 }
 0xc84   :  { %v3878_v8 = vpop.xlane.xlu1 %1869 }
 0xc85   :  { %v1892_v31 = vsel %vm233_vm4, %v3878_v8, -inf }
 0xc86   :  { %v2067_v9 = vpop.xlane.xlu2 %2066 }
 0xc87   :  { %v2071_v30 = vsel %vm233_vm4, %v2067_v9, -inf  ;;  %v3888_v41 = vpop.xlane.xlu0 %1875 }
 0xc88   :  { %v2073_v57 = vmax.f32 %v2070_v14, %v2071_v30  ;;  %v1894_v37 = vsel %vm233_vm4, %v3888_v41, -inf }
 0xc8a   :  { %v2074_v58 = vmax.f32 %v2072_v50, %v2073_v57 }
 0xc8c   :  { %v2075_v47 = vsub.f32 %v2058_v28, %v2074_v58  ;;  %v2076_v46 = vsub.f32 %v2061_v20, %v2074_v58  ;;  %v2077_v42 = vsub.f32 %v2064_v32, %v2074_v58  ;;  %v2078_v6 = vsub.f32 %v2067_v9, %v2074_v58  ;;  %v3886_v59 = vpop.xlane.xlu1 %1878  ;;  %v2143_v58 = vld [vmem:[%s4036_s18 + $0x78] sm:$0xff] }
 0xc8d   :  { %v1895_v0 = vsel %vm233_vm4, %v3886_v59, -inf  ;;  %2148 = vmatpush.msrb.mxu2 %v2143_v58 }
 0xc8e   :  { %v2079_v60 = vmul.f32 1.442695, %v2075_v47  ;;  %v2081_v12 = vmul.f32 1.442695, %v2076_v46  ;;  %v2083_v53 = vmul.f32 1.442695, %v2077_v42  ;;  %v3876_v48 = vpop.xlane.xlu2 %1872 }
 0xc8f   :  { %v2085_v61 = vmul.f32 1.442695, %v2078_v6  ;;  %v3898_v36 = vpop.xlane.xlu0 %1884  ;;  %v1893_v32 = vsel %vm233_vm4, %v3876_v48, -inf  ;;  %v2142_v47 = vld [vmem:[%s4036_s18 + $0x70] sm:$0xff] }
 0xc90   :  { %2317 = vpow2.f32 %v2079_v60  ;;  %v1898_v28 = vsel %vm233_vm4, %v3898_v36, -inf  ;;  %2149 = vmatpush.msrb.mxu2 %v2142_v47 }
 0xc91   :  { %2319 = vpow2.f32 %v2081_v12  ;;  %v1899_v46 = vmax.f32 %v1893_v32, %v1898_v28 }
 0xc92   :  { %2321 = vpow2.f32 %v2083_v53 }
 0xc93   :  { %2323 = vpow2.f32 %v2085_v61  ;;  %v2141_v61 = vld [vmem:[%s4036_s18 + $0x68] sm:$0xff] }
 0xc94   :  { %v3892_v63 = vpop.xlane.xlu1 %1887  ;;  %2150 = vmatpush.msrb.mxu2 %v2141_v61 }
 0xc95   :  { %v1900_v54 = vsel %vm233_vm4, %v3892_v63, -inf }
 0xc96   :  { %v2318_v25 = vpop.eup %2317  ;;  %v3884_v27 = vpop.xlane.xlu2 %1881  ;;  %v1901_v9 = vmax.f32 %v1894_v37, %v1900_v54  ;;  %v2131_v54 = vld [vmem:[%s4036_s18 + $0x18] sm:$0xff] }
 0xc97   :  { %v2320_v16 = vpop.eup %2319  ;;  %v2087_v1 = vsel %vm233_vm4, %v2318_v25, 0.0  ;;  %v1896_v19 = vsel %vm233_vm4, %v3884_v27, -inf }
 0xc98   :  { %v2322_v55 = vpop.eup %2321  ;;  %v2088_v26 = vsel %vm233_vm4, %v2320_v16, 0.0  ;;  %v1897_v23 = vmax.f32 %v1892_v31, %v1896_v19 }
 0xc99   :  { %v2324_v56 = vpop.eup %2323  ;;  %v2089_v51 = vadd.f32 %v2088_v26, %v2087_v1  ;;  %v2090_v22 = vsel %vm233_vm4, %v2322_v55, 0.0 }
 0xc9a   :  { %v2092_v40 = vsel %vm233_vm4, %v2324_v56, 0.0 }
 0xc9b   :  { %v2091_v7 = vadd.f32 %v2090_v22, %v2089_v51  ;;  %v2138_v22 = vld [vmem:[%s4036_s18 + $0x50] sm:$0xff] }
 0xc9d   :  { %v2093_v15 = vadd.f32 %v2092_v40, %v2091_v7 }
 0xc9e   :  { %v3890_v43 = vpop.xlane.xlu2 %1890 }
 0xc9f   :  { %2325 = vrcp.f32 %v2093_v15  ;;  %v2105_v17 = vand.u32 2147483648, %v2093_v15  ;;  %v1902_v44 = vsel %vm233_vm4, %v3890_v43, -inf  ;;  %v2103_v35 = vand.u32 2147483647, %v2093_v15 }
 0xca0   :  { %vm2099_vm10 = vweird.f32 %v2093_v15  ;;  %v1903_v52 = vmax.f32 %v1895_v0, %v1902_v44  ;;  %v2134_v44 = vld [vmem:[%s4036_s18 + $0x30] sm:$0xff] }
 0xca1   :  { %v2106_v20 = vor.u32 1.1754944e-38, %v2105_v17  ;;  %vm2104_vm12 = vcmp.eq.f32.partialorder %v2103_v35, 8.507059e+37 }
 0xca2   :  { %v1905_v42 = vmax.f32 %v1901_v9, %v1903_v52  ;;  %v2129_v52 = vld [vmem:[%s4036_s18 + $0x8] sm:$0xff] }
 0xca5   :  { %v2326_v2 = vpop.eup %2325 }
 0xca6   :  { %v2095_v13 = vmul.f32 %v2326_v2, %v2093_v15  ;;  %vm2100_vm0 = vweird.f32 %v2326_v2 }
 0xca7   :  { %vm2101_vm11 = vmor %vm2099_vm10, %vm2100_vm0 }
 0xca8   :  { %v2096_v4 = vsub.f32 1.0, %v2095_v13  ;;  %v2136_v13 = vld [vmem:[%s4036_s18 + $0x40] sm:$0xff] }
 0xcaa   :  { %v2097_v21 = vmul.f32 %v2326_v2, %v2096_v4 }
 0xcac   :  { %v2098_v49 = vadd.f32 %v2326_v2, %v2097_v21  ;;  %v2133_v21 = vld [vmem:[%s4036_s18 + $0x28] sm:$0xff] }
 0xcae   :  { %v2102_v33 = vsel %vm2101_vm11, %v2326_v2, %v2098_v49  ;;  %v2137_v2 = vld [vmem:[%s4036_s18 + $0x48] sm:$0xff] }
 0xcaf   :  { %v2107_v14 = vsel %vm2104_vm12, %v2106_v20, %v2102_v33 }
 0xcb0   :  { %v2108_v30 = vmul.f32 %v2318_v25, %v2107_v14  ;;  %v2109_v50 = vmul.f32 %v2320_v16, %v2107_v14  ;;  %v2110_v57 = vmul.f32 %v2322_v55, %v2107_v14  ;;  %v2111_v6 = vmul.f32 %v2324_v56, %v2107_v14  ;;  %v2139_v56 = vld [vmem:[%s4036_s18 + $0x58] sm:$0xff] }
 0xcb1   :  { %v1904_v25 = vmax.f32 %v1897_v23, %v1899_v46 }
 0xcb2   :  { %v2112_v60 = vmul.f32 %v2108_v30, %v3790_v24  ;;  %v2113_v12 = vmul.f32 %v2109_v50, %v3793_v5  ;;  %v2114_v53 = vmul.f32 %v2110_v57, %v3796_v18  ;;  %v2115_v16 = vmul.f32 %v2111_v6, %v3802_v39  ;;  %v2140_v24 = vld [vmem:[%s4036_s18 + $0x60] sm:$0xff] }
 0xcb3   :  { %v3930_v26 = vmax.f32 %v1904_v25, %v1905_v42  ;;  %2151 = vmatpush.msrb.mxu2 %v2140_v24 }
 0xcb4   :  { %v2116_v1 = vsel %vm904_vm15, %v2112_v60, 0.0  ;;  %v2117_v55 = vsel %vm904_vm15, %v2113_v12, 0.0  ;;  %v2119_v18 = vsel %vm904_vm15, %v2114_v53, 0.0  ;;  %v2121_v39 = vsel %vm904_vm15, %v2115_v16, 0.0 }
 0xcb5   :  { %v2118_v5 = vadd.f32 %v2117_v55, %v2116_v1  ;;  %v1907_v7 = vsub.f32 %v3878_v8, %v3930_v26  ;;  %2152 = vmatpush.msrb.mxu2 %v2139_v56  ;;  %v1908_v15 = vsub.f32 %v3876_v48, %v3930_v26  ;;  %v2135_v8 = vld [vmem:[%s4036_s18 + $0x38] sm:$0xff]  ;;  %v1909_v48 = vsub.f32 %v3888_v41, %v3930_v26  ;;  %v2132_v41 = vld [vmem:[%s4036_s18 + $0x20] sm:$0xff] }
 0xcb6   :  { %v1910_v35 = vsub.f32 %v3886_v59, %v3930_v26  ;;  %v1911_v31 = vsub.f32 %v3884_v27, %v3930_v26  ;;  %v2130_v59 = vld [vmem:[%s4036_s18 + $0x10] sm:$0xff]  ;;  %v1912_v32 = vsub.f32 %v3898_v36, %v3930_v26  ;;  %v1913_v23 = vsub.f32 %v3892_v63, %v3930_v26 }
 0xcb7   :  { %v2120_v51 = vadd.f32 %v2119_v18, %v2118_v5  ;;  %2153 = vmatpush.msrb.mxu2 %v2138_v22  ;;  %v1915_v4 = vmul.f32 1.442695, %v1907_v7  ;;  %v1917_v17 = vmul.f32 1.442695, %v1908_v15  ;;  %v1919_v0 = vmul.f32 1.442695, %v1909_v48 }
 0xcb8   :  { %v1921_v37 = vmul.f32 1.442695, %v1910_v35  ;;  %v1923_v27 = vmul.f32 1.442695, %v1911_v31  ;;  %v1925_v14 = vmul.f32 1.442695, %v1912_v32  ;;  %v1914_v58 = vsub.f32 %v3890_v43, %v3930_v26 }
 0xcb9   :  { %v2122_v40 = vadd.f32 %v2121_v39, %v2120_v51  ;;  %2154 = vmatpush.msrb.mxu2 %v2137_v2  ;;  %2327 = vpow2.f32 %v1915_v4  ;;  %v1927_v47 = vmul.f32 1.442695, %v1913_v23 }
 0xcba   :  { %2329 = vpow2.f32 %v1917_v17  ;;  %v1929_v6 = vmul.f32 1.442695, %v1914_v58 }
 0xcbb   :  { %2124 = vrot.lane.b32.xlu0 %v2122_v40, %s2483_s9  ;;  %2155 = vmatpush.msrb.mxu2 %v2136_v13  ;;  %2331 = vpow2.f32 %v1919_v0 }
 0xcbc   :  { %2333 = vpow2.f32 %v1921_v37 }
 0xcbd   :  { %2156 = vmatpush.msrb.mxu2 %v2135_v8  ;;  %2335 = vpow2.f32 %v1923_v27  ;;  %v2128_v8 = vld [vmem:[%s4036_s18] sm:$0xff] }
 0xcbe   :  { %2337 = vpow2.f32 %v1925_v14 }
 0xcbf   :  { %2157 = vmatpush.msrb.mxu2 %v2134_v44  ;;  %v2328_v19 = vpop.eup %2327  ;;  %2339 = vpow2.f32 %v1927_v47 }
 0xcc0   :  { %v2330_v49 = vpop.eup %2329  ;;  %v1931_v20 = vsel %vm233_vm4, %v2328_v19, 0.0  ;;  %2341 = vpow2.f32 %v1929_v6 }
 0xcc1   :  { %2158 = vmatpush.msrb.mxu2 %v2133_v21  ;;  %v1932_v28 = vsel %vm233_vm4, %v2330_v49, 0.0  ;;  %v2332_v33 = vpop.eup %2331 }
 0xcc2   :  { %v1933_v9 = vadd.f32 %v1932_v28, %v1931_v20  ;;  %v1934_v30 = vsel %vm233_vm4, %v2332_v33, 0.0  ;;  %v2334_v50 = vpop.eup %2333 }
 0xcc3   :  { %2159 = vmatpush.msrb.mxu2 %v2132_v41  ;;  %v1936_v36 = vsel %vm233_vm4, %v2334_v50, 0.0  ;;  %v2336_v46 = vpop.eup %2335 }
 0xcc4   :  { %v1935_v57 = vadd.f32 %v1934_v30, %v1933_v9  ;;  %v1938_v60 = vsel %vm233_vm4, %v2336_v46, 0.0  ;;  %v2338_v63 = vpop.eup %2337 }
 0xcc5   :  { %2160 = vmatpush.msrb.mxu2 %v2131_v54  ;;  %v1940_v53 = vsel %vm233_vm4, %v2338_v63, 0.0  ;;  %v2340_v61 = vpop.eup %2339 }
 0xcc6   :  { %v1937_v42 = vadd.f32 %v1936_v36, %v1935_v57  ;;  %v1942_v16 = vsel %vm233_vm4, %v2340_v61, 0.0  ;;  %v2342_v43 = vpop.eup %2341  ;;  %v2224_v57 = vld [vmem:[%s4037_s19] ss:$0 sm:$0xff] }
 0xcc7   :  { %2161 = vmatpush.msrb.mxu2 %v2130_v59  ;;  %v1944_v55 = vsel %vm233_vm4, %v2342_v43, 0.0  ;;  %vm2168_vm4 = vcmask 17408  }
 0xcc8   :  { %v1939_v12 = vadd.f32 %v1938_v60, %v1937_v42 }
 0xcc9   :  { %2162 = vmatpush.msrb.mxu2 %v2129_v52 }
 0xcca   :  { %v1941_v25 = vadd.f32 %v1940_v53, %v1939_v12 }
 0xccb   :  { %2163 = vmatpush.msrb.mxu2 %v2128_v8 }
 0xccc   :  { %v1943_v1 = vadd.f32 %v1942_v16, %v1941_v25 }
 0xcce   :  { %v1945_v24 = vadd.f32 %v1944_v55, %v1943_v1 }
 0xcd0   :  { %2343 = vrcp.f32 %v1945_v24  ;;  %v1957_v39 = vand.u32 2147483648, %v1945_v24  ;;  %vm1951_vm14 = vweird.f32 %v1945_v24  ;;  %v1955_v22 = vand.u32 2147483647, %v1945_v24 }
 0xcd2   :  { %v1958_v40 = vor.u32 1.1754944e-38, %v1957_v39  ;;  %vm1956_vm2 = vcmp.eq.f32.partialorder %v1955_v22, 8.507059e+37 }
 0xcd6   :  { %v2344_v26 = vpop.eup %2343 }
 0xcd7   :  { %v1947_v5 = vmul.f32 %v2344_v26, %v1945_v24  ;;  %vm1952_vm13 = vweird.f32 %v2344_v26 }
 0xcd8   :  { %vm1953_vm1 = vmor %vm1951_vm14, %vm1952_vm13 }
 0xcd9   :  { %v1948_v18 = vsub.f32 1.0, %v1947_v5 }
 0xcdb   :  { %v1949_v56 = vmul.f32 %v2344_v26, %v1948_v18 }
 0xcdd   :  { %v1950_v51 = vadd.f32 %v2344_v26, %v1949_v56 }
 0xcdf   :  { %v1954_v7 = vsel %vm1953_vm1, %v2344_v26, %v1950_v51 }
 0xce0   :  { %v1959_v15 = vsel %vm1956_vm2, %v1958_v40, %v1954_v7 }
 0xce1   :  { %v1960_v2 = vmul.f32 %v2328_v19, %v1959_v15  ;;  %v1961_v13 = vmul.f32 %v2330_v49, %v1959_v15  ;;  %v1962_v48 = vmul.f32 %v2332_v33, %v1959_v15  ;;  %v1963_v35 = vmul.f32 %v2334_v50, %v1959_v15 }
 0xce2   :  { %v1964_v54 = vmul.f32 %v2336_v46, %v1959_v15  ;;  %v1965_v49 = vmul.f32 %v2338_v63, %v1959_v15  ;;  %v1966_v52 = vmul.f32 %v2340_v61, %v1959_v15 }
 0xce3   :  { %v1968_v4 = vmul.f32 %v1960_v2, %v3782_v62  ;;  %v1969_v17 = vmul.f32 %v1961_v13, %v3747_v34  ;;  %v1970_v0 = vmul.f32 %v1962_v48, %v3720_v10  ;;  %v1971_v19 = vmul.f32 %v1963_v35, %v3689_v29 }
 0xce4   :  { %v1972_v31 = vmul.f32 %v1964_v54, %v3692_v45  ;;  %v1973_v20 = vmul.f32 %v1965_v49, %v3723_v11  ;;  %v1967_v10 = vmul.f32 %v2342_v43, %v1959_v15  ;;  %v1974_v27 = vmul.f32 %v1966_v52, %v3750_v38 }
 0xce5   :  { %v1976_v44 = vsel %vm904_vm15, %v1968_v4, 0.0  ;;  %v1977_v21 = vsel %vm904_vm15, %v1969_v17, 0.0  ;;  %v1979_v62 = vsel %vm904_vm15, %v1970_v0, 0.0  ;;  %v1981_v37 = vsel %vm904_vm15, %v1971_v19, 0.0 }
 0xce6   :  { %v1978_v41 = vadd.f32 %v1977_v21, %v1976_v44  ;;  %v1983_v28 = vsel %vm904_vm15, %v1972_v31, 0.0  ;;  %v1985_v29 = vsel %vm904_vm15, %v1973_v20, 0.0  ;;  %v1975_v9 = vmul.f32 %v1967_v10, %v3785_v3 }
 0xce7   :  { %v1987_v23 = vsel %vm904_vm15, %v1974_v27, 0.0 }
 0xce8   :  { %v1980_v34 = vadd.f32 %v1979_v62, %v1978_v41  ;;  %v1989_v14 = vsel %vm904_vm15, %v1975_v9, 0.0 }
 0xcea   :  { %v1982_v59 = vadd.f32 %v1981_v37, %v1980_v34 }
 0xcec   :  { %v1984_v32 = vadd.f32 %v1983_v28, %v1982_v59 }
 0xcee   :  { %v1986_v33 = vadd.f32 %v1985_v29, %v1984_v32 }
 0xcf0   :  { %v1988_v45 = vadd.f32 %v1987_v23, %v1986_v33 }
 0xcf2   :  { %v1990_v30 = vadd.f32 %v1989_v14, %v1988_v45 }
 0xd2d   :  { %v2125_v50 = vpop.permute.xlu0 %2124 }
 0xd2e   :  { %v2127_v11 = vsel %vm456_vm5, %v1990_v30, %v2125_v50 }
 0xd2f   :  { %2164 = vmatmul.f32.vlgmr.msrb.gmra.mxu2 %v2127_v11 }
 0xdb2   :  { %v2165_v38 = vpop.f32.mrf.mxu2 }
 0xdb3   :  { %v2166_v3 = vadd.f32 %v2224_v57, %v2165_v38 }
 0xdb5   :  { %2169 = vst.msk [vmem:[#allocation12] sm:$0x3] %vm2168_vm4, %v2166_v3 }
 0xdb6   :  { %2180 = dma.vmem_to_hbm [thread:$0]  %s2176_s0, 32, %s2178_s1, [#allocation6]  }
 0xdb7   :  { %2471 = dma.done.wait [#allocation6], 32  }
 0xdb8   :  { %2472 = vsyncadd [#allocation6], 4294967264 }
 0xdb9   :  { %2185 = vsyncpa [#allocation5], 1 }
 0xdba   :  { %2186 = vsyncpa [#allocation8], 1 }
 0xdbb   :  { %2187 = vsyncpa [#allocation11], 1 }
 0xdbc   :  { %2188 = vsyncpa [#allocation6], 1 }

</bundles_post_ra>
